<compile_context>
chip_gen: v6e
topology: v6e:2x2x1
jax: 0.10.0
libtpu: 0.0.40
codegen_flags: <defaults>
</compile_context>

<pallas_src>
import functools

import jax
import jax.numpy as jnp
from jax.experimental import pallas as pl
from jax.experimental.pallas import tpu as pltpu


# ---------------------------------------------------------------------------
# Fused Pallas kernel: full recurrence + output projection
# ---------------------------------------------------------------------------
def _fixed_rev_rnn_kernel(x_ref, h0_ref, wh_ref, wx_ref, wo_ref, o_ref, *,
                          seq, delay, depth, batch, hidden):
    B, H = batch, hidden
    h2 = 2 * H

    # Hoisted, hidden-independent input path for every (t, branch, depth):
    # one wide MXU op instead of 2*depth tiny dots per timestep on the
    # sequential critical chain.
    xw = jnp.dot(x_ref[...].astype(jnp.float32),
                 wx_ref[...].astype(jnp.float32),
                 preferred_element_type=jnp.float32)      # (seq*B, 2*depth*2H)

    wh = wh_ref[...].astype(jnp.float32)                  # (2*depth*H, 2H)

    def calc(out, br, t):
        for d in range(depth):
            k = br * depth + d
            c = out - jnp.mean(out, axis=0, keepdims=True)       # center (batch)
            z = (jnp.dot(c, wh[k * H:(k + 1) * H, :],
                         preferred_element_type=jnp.float32)
                 + xw[t * B:(t + 1) * B, k * h2:(k + 1) * h2])
            # relu6(z[:, :H]) * tanh(z[:, H:])
            out = jnp.clip(z[:, :H], 0.0, 6.0) * jnp.tanh(z[:, H:])
        return out

    h0 = h0_ref[...].astype(jnp.float32)
    ha, hb = h0[:, :H], h0[:, H:]

    kept = []
    for t in range(seq):                    # static, fully unrolled recurrence
        o1 = hb + calc(ha, 0, t)
        o0 = ha + calc(o1, 1, t)
        ha, hb = o0, o1
        if t >= delay:
            kept.append(jnp.concatenate([o0, o1], axis=1))

    # torch: cat(output[delay:], 0) -> time-major (ic*B, 2H) slab, then project.
    slab = jnp.concatenate(kept, axis=0)
    proj = jnp.dot(slab, wo_ref[...].astype(jnp.float32),
                   preferred_element_type=jnp.float32)
    o_ref[...] = proj.astype(o_ref.dtype)


# ---------------------------------------------------------------------------
# Wrapper (layout plumbing in plain JAX, hot path fully fused in Pallas)
# ---------------------------------------------------------------------------
def fixed_rev_rnn_forward(x, hidden_state, lp0, lp1, out_linear, *,
                          delay, depth):
    batch, input_count, feat = x.shape
    seq = input_count + delay
    f2 = feat + 2
    h2 = hidden_state.shape[0]
    H = h2 // 2
    dtype = x.dtype
    out_features = out_linear.shape[-1]

    # positional encoding: cat([idx, (idx - factor)/factor], -1), idx = 1..seq
    factor = (seq + 1) / 2.0
    idx = jnp.arange(1, seq + 1, dtype=dtype).reshape(seq, 1)
    pos = jnp.concatenate([idx, (idx - factor) / factor], axis=-1)      # (seq,2)
    pos = jnp.broadcast_to(pos[:, None, :], (seq, batch, 2))

    # time-major sequence input, zero padded for the trailing `delay` steps,
    # flattened to (seq*B, F+2) so the hoisted matmul is a single 2-D dot.
    x_t = jnp.transpose(x, (1, 0, 2))                                   # (ic,B,F)
    x_pad = jnp.concatenate(
        [x_t, jnp.zeros((delay, batch, feat), dtype)], axis=0)          # (seq,B,F)
    seq_in = jnp.concatenate([x_pad, pos], axis=-1).reshape(seq * batch, f2)

    h0 = jnp.broadcast_to(hidden_state[None, :], (batch, h2)).astype(dtype)

    # Split each layer weight into the recurrent (hidden) part and the
    # hidden-independent sequence-input part (the latter is hoisted in-kernel).
    # Row/column block k = branch*depth + d.
    wh = jnp.concatenate([lp0[:, :H, :], lp1[:, :H, :]], axis=0)    # (2d, H, 2H)
    wh = wh.reshape(2 * depth * H, h2)
    wx = jnp.concatenate([lp0[:, H:, :], lp1[:, H:, :]], axis=0)    # (2d, f2, 2H)
    wx = jnp.transpose(wx, (1, 0, 2)).reshape(f2, 2 * depth * h2)

    wo = out_linear.reshape(h2, out_features)

    kernel = functools.partial(_fixed_rev_rnn_kernel, seq=seq, delay=delay,
                               depth=depth, batch=batch, hidden=H)
    proj = pl.pallas_call(
        kernel,
        out_shape=jax.ShapeDtypeStruct((input_count * batch, out_features),
                                       dtype),
        grid=(1,),
        in_specs=[
            pl.BlockSpec((seq * batch, f2), lambda i: (0, 0)),
            pl.BlockSpec((batch, h2), lambda i: (0, 0)),
            pl.BlockSpec((2 * depth * H, h2), lambda i: (0, 0)),
            pl.BlockSpec((f2, 2 * depth * h2), lambda i: (0, 0)),
            pl.BlockSpec((h2, out_features), lambda i: (0, 0)),
        ],
        out_specs=pl.BlockSpec((input_count * batch, out_features),
                               lambda i: (0, 0)),
        compiler_params=pltpu.CompilerParams(
            dimension_semantics=("arbitrary",)),
    )(seq_in, h0, wh, wx, wo)

    # torch: cat(output[delay:], 0).view(batch, input_count, -1) @ out_linear
    return proj.reshape(batch, input_count, out_features)


# ---------------------------------------------------------------------------
# Pure-JAX reference (mirrors the PyTorch forward exactly)
# ---------------------------------------------------------------------------
def reference_forward(x, hidden_state, lp0, lp1, out_linear, *, delay, depth):
    batch, ic, feat = x.shape
    seq = ic + delay
    H = hidden_state.shape[0] // 2
    factor = (seq + 1) / 2.0
    idx = jnp.arange(1, seq + 1, dtype=x.dtype).reshape(seq, 1)
    pos = jnp.concatenate([idx, (idx - factor) / factor], axis=-1)

    def single(inp, s, w):
        c = inp - jnp.mean(inp, axis=0, keepdims=True)
        z = c @ w[:H] + s @ w[H:]
        return jnp.clip(z[:, :H], 0.0, 6.0) * jnp.tanh(z[:, H:])

    def calc(inp, s, lp):
        out = inp
        for d in range(depth):
            out = single(out, s, lp[d])
        return out

    h = jnp.broadcast_to(hidden_state[None, :], (batch, 2 * H))
    zeros = jnp.zeros((batch, feat), x.dtype)
    outs = []
    for t in range(seq):
        itm = x[:, t] if t < ic else zeros
        s = jnp.concatenate(
            [itm, jnp.broadcast_to(pos[t][None, :], (batch, 2))], axis=-1)
        h_a, h_b = h[:, :H], h[:, H:]
        o1 = h_b + calc(h_a, s, lp0)
        o0 = h_a + calc(o1, s, lp1)
        h = jnp.concatenate([o0, o1], axis=1)
        outs.append(h)
    kept = jnp.stack(outs[delay:], axis=0).reshape(ic * batch, 2 * H)
    of = out_linear.shape[-1]
    return (kept @ out_linear.reshape(2 * H, of)).reshape(batch, ic, of)


# ---------------------------------------------------------------------------
# Main
# ---------------------------------------------------------------------------
if __name__ == "__main__":
    # module config (small, consistent with FixedRevRNN.__init__):
    batch = 2
    input_features = 4          # self.input_features (before the internal +2)
    hidden_features = 32        # -> H = 16, hidden state = 2H = 32
    out_features = 8
    input_count = 8
    delay = 8
    depth = 2

    H = hidden_features // 2
    f_int = input_features + 2  # internal input features (+2 pos. enc.)

    key = jax.random.PRNGKey(0)
    k_x, k_h, k_l0, k_l1, k_o = jax.random.split(key, 5)

    x = jax.random.normal(k_x, (batch, input_count, input_features),
                          dtype=jnp.float32)

    # Deterministic parameter init (shapes from __init__). Torch uses
    # normal_ for hidden_state and orthogonal_ for the linear params; scaled
    # normals here keep the dynamics bounded and deterministic.
    hidden_state = jax.random.normal(k_h, (2 * H,), dtype=jnp.float32)
    lp0 = jax.random.normal(k_l0, (depth, f_int + H, 2 * H),
                            dtype=jnp.float32) * (1.0 / jnp.sqrt(f_int + H))
    lp1 = jax.random.normal(k_l1, (depth, f_int + H, 2 * H),
                            dtype=jnp.float32) * (1.0 / jnp.sqrt(f_int + H))
    # NOTE: in the PyTorch module out_linear is left at zeros (never init'ed);
    # we use a small random init so the kernel output is non-trivial.
    out_linear = jax.random.normal(k_o, (1, 2 * H, out_features),
                                   dtype=jnp.float32) * 0.1

    # TODO(synk): only the forward pass is implemented; the custom reversible
    # autograd backward (ReversibleRNNFunction.backward) is training-only.

    result = fixed_rev_rnn_forward(x, hidden_state, lp0, lp1, out_linear,
                                   delay=delay, depth=depth)
    result = jax.block_until_ready(result)

    expected = reference_forward(x, hidden_state, lp0, lp1, out_linear,
                                 delay=delay, depth=depth)
    expected = jax.block_until_ready(expected)

    assert result.shape == (batch, input_count, out_features), result.shape
    assert jnp.allclose(result, expected, rtol=1e-3, atol=1e-3), (
        "mismatch vs reference:"
        f" max abs err = {jnp.max(jnp.abs(result - expected))}")

    print("KERNEL_OK")
</pallas_src>

<mosaic_0001>
module attributes {stable_mosaic.version = 11 : i64} {
  func.func @_fixed_rev_rnn_kernel(%arg0: i32, %arg1: memref<32x6xf32, #tpu.memory_space<vmem>>, %arg2: memref<2x32xf32, #tpu.memory_space<vmem>>, %arg3: memref<64x32xf32, #tpu.memory_space<vmem>>, %arg4: memref<6x128xf32, #tpu.memory_space<vmem>>, %arg5: memref<32x8xf32, #tpu.memory_space<vmem>>, %arg6: memref<16x8xf32, #tpu.memory_space<vmem>>) attributes {dimension_semantics = [#tpu.dimension_semantics<arbitrary>], iteration_bounds = array<i64: 1>, scalar_prefetch = 0 : i64, scratch_operands = 0 : i64, tpu.core_type = #tpu.core_type<tc>, window_params = [{pipeline_mode = #tpu.pipeline_mode<synchronous>, transform_indices = @transform_0, window_bounds = array<i64: 32, 6>}, {pipeline_mode = #tpu.pipeline_mode<synchronous>, transform_indices = @transform_1, window_bounds = array<i64: 2, 32>}, {pipeline_mode = #tpu.pipeline_mode<synchronous>, transform_indices = @transform_2, window_bounds = array<i64: 64, 32>}, {pipeline_mode = #tpu.pipeline_mode<synchronous>, transform_indices = @transform_3, window_bounds = array<i64: 6, 128>}, {pipeline_mode = #tpu.pipeline_mode<synchronous>, transform_indices = @transform_4, window_bounds = array<i64: 32, 8>}, {pipeline_mode = #tpu.pipeline_mode<synchronous>, transform_indices = @transform_5, window_bounds = array<i64: 16, 8>}]} {
    %c0 = arith.constant 0 : index
    %c0_0 = arith.constant 0 : index
    %0 = vector.load %arg1[%c0, %c0_0] : memref<32x6xf32, #tpu.memory_space<vmem>>, vector<32x6xf32>
    %c0_1 = arith.constant 0 : index
    %c0_2 = arith.constant 0 : index
    %1 = vector.load %arg4[%c0_1, %c0_2] : memref<6x128xf32, #tpu.memory_space<vmem>>, vector<6x128xf32>
    %cst = arith.constant dense<0.000000e+00> : vector<32x128xf32>
    %2 = tpu.matmul %0, %1, %cst {dimension_numbers = #tpu.dot_dimension_numbers<[1], [0], [0], [1], [0, 0, 1, 1], [], []>} : vector<32x6xf32>, vector<6x128xf32>, vector<32x128xf32> -> vector<32x128xf32>
    %c0_3 = arith.constant 0 : index
    %c0_4 = arith.constant 0 : index
    %3 = vector.load %arg3[%c0_3, %c0_4] : memref<64x32xf32, #tpu.memory_space<vmem>>, vector<64x32xf32>
    %c0_5 = arith.constant 0 : index
    %c0_6 = arith.constant 0 : index
    %4 = vector.load %arg2[%c0_5, %c0_6] : memref<2x32xf32, #tpu.memory_space<vmem>>, vector<2x32xf32>
    %5 = vector.extract_strided_slice %4 {offsets = [0, 0], sizes = [2, 16], strides = [1, 1]} : vector<2x32xf32> to vector<2x16xf32>
    %6 = vector.extract_strided_slice %4 {offsets = [0, 16], sizes = [2, 16], strides = [1, 1]} : vector<2x32xf32> to vector<2x16xf32>
    %cst_7 = arith.constant dense<0.000000e+00> : vector<16xf32>
    %7 = vector.multi_reduction <add>, %5, %cst_7 [0] : vector<2x16xf32> to vector<16xf32>
    %8 = vector.shape_cast %7 : vector<16xf32> to vector<1x16xf32>
    %cst_8 = arith.constant 2.000000e+00 : f32
    %9 = vector.broadcast %cst_8 : f32 to vector<1x16xf32>
    %10 = arith.divf %8, %9 : vector<1x16xf32>
    %11 = vector.broadcast %10 : vector<1x16xf32> to vector<2x16xf32>
    %12 = arith.subf %5, %11 : vector<2x16xf32>
    %13 = vector.extract_strided_slice %3 {offsets = [0, 0], sizes = [16, 32], strides = [1, 1]} : vector<64x32xf32> to vector<16x32xf32>
    %cst_9 = arith.constant dense<0.000000e+00> : vector<2x32xf32>
    %14 = tpu.matmul %12, %13, %cst_9 {dimension_numbers = #tpu.dot_dimension_numbers<[1], [0], [0], [1], [0, 0, 1, 1], [], []>} : vector<2x16xf32>, vector<16x32xf32>, vector<2x32xf32> -> vector<2x32xf32>
    %15 = vector.extract_strided_slice %2 {offsets = [0, 0], sizes = [2, 32], strides = [1, 1]} : vector<32x128xf32> to vector<2x32xf32>
    %16 = arith.addf %14, %15 : vector<2x32xf32>
    %17 = vector.extract_strided_slice %16 {offsets = [0, 0], sizes = [2, 16], strides = [1, 1]} : vector<2x32xf32> to vector<2x16xf32>
    %cst_10 = arith.constant 0.000000e+00 : f32
    %cst_11 = arith.constant 6.000000e+00 : f32
    %18 = vector.broadcast %cst_10 : f32 to vector<2x16xf32>
    %19 = arith.maximumf %18, %17 : vector<2x16xf32>
    %20 = vector.broadcast %cst_11 : f32 to vector<2x16xf32>
    %21 = arith.minimumf %20, %19 : vector<2x16xf32>
    %22 = vector.extract_strided_slice %16 {offsets = [0, 16], sizes = [2, 16], strides = [1, 1]} : vector<2x32xf32> to vector<2x16xf32>
    %23 = math.tanh %22 : vector<2x16xf32>
    %24 = arith.mulf %21, %23 : vector<2x16xf32>
    %cst_12 = arith.constant dense<0.000000e+00> : vector<16xf32>
    %25 = vector.multi_reduction <add>, %24, %cst_12 [0] : vector<2x16xf32> to vector<16xf32>
    %26 = vector.shape_cast %25 : vector<16xf32> to vector<1x16xf32>
    %cst_13 = arith.constant 2.000000e+00 : f32
    %27 = vector.broadcast %cst_13 : f32 to vector<1x16xf32>
    %28 = arith.divf %26, %27 : vector<1x16xf32>
    %29 = vector.broadcast %28 : vector<1x16xf32> to vector<2x16xf32>
    %30 = arith.subf %24, %29 : vector<2x16xf32>
    %31 = vector.extract_strided_slice %3 {offsets = [16, 0], sizes = [16, 32], strides = [1, 1]} : vector<64x32xf32> to vector<16x32xf32>
    %cst_14 = arith.constant dense<0.000000e+00> : vector<2x32xf32>
    %32 = tpu.matmul %30, %31, %cst_14 {dimension_numbers = #tpu.dot_dimension_numbers<[1], [0], [0], [1], [0, 0, 1, 1], [], []>} : vector<2x16xf32>, vector<16x32xf32>, vector<2x32xf32> -> vector<2x32xf32>
    %33 = vector.extract_strided_slice %2 {offsets = [0, 32], sizes = [2, 32], strides = [1, 1]} : vector<32x128xf32> to vector<2x32xf32>
    %34 = arith.addf %32, %33 : vector<2x32xf32>
    %35 = vector.extract_strided_slice %34 {offsets = [0, 0], sizes = [2, 16], strides = [1, 1]} : vector<2x32xf32> to vector<2x16xf32>
    %cst_15 = arith.constant 0.000000e+00 : f32
    %cst_16 = arith.constant 6.000000e+00 : f32
    %36 = vector.broadcast %cst_15 : f32 to vector<2x16xf32>
    %37 = arith.maximumf %36, %35 : vector<2x16xf32>
    %38 = vector.broadcast %cst_16 : f32 to vector<2x16xf32>
    %39 = arith.minimumf %38, %37 : vector<2x16xf32>
    %40 = vector.extract_strided_slice %34 {offsets = [0, 16], sizes = [2, 16], strides = [1, 1]} : vector<2x32xf32> to vector<2x16xf32>
    %41 = math.tanh %40 : vector<2x16xf32>
    %42 = arith.mulf %39, %41 : vector<2x16xf32>
    %43 = arith.addf %6, %42 : vector<2x16xf32>
    %cst_17 = arith.constant dense<0.000000e+00> : vector<16xf32>
    %44 = vector.multi_reduction <add>, %43, %cst_17 [0] : vector<2x16xf32> to vector<16xf32>
    %45 = vector.shape_cast %44 : vector<16xf32> to vector<1x16xf32>
    %cst_18 = arith.constant 2.000000e+00 : f32
    %46 = vector.broadcast %cst_18 : f32 to vector<1x16xf32>
    %47 = arith.divf %45, %46 : vector<1x16xf32>
    %48 = vector.broadcast %47 : vector<1x16xf32> to vector<2x16xf32>
    %49 = arith.subf %43, %48 : vector<2x16xf32>
    %50 = vector.extract_strided_slice %3 {offsets = [32, 0], sizes = [16, 32], strides = [1, 1]} : vector<64x32xf32> to vector<16x32xf32>
    %cst_19 = arith.constant dense<0.000000e+00> : vector<2x32xf32>
    %51 = tpu.matmul %49, %50, %cst_19 {dimension_numbers = #tpu.dot_dimension_numbers<[1], [0], [0], [1], [0, 0, 1, 1], [], []>} : vector<2x16xf32>, vector<16x32xf32>, vector<2x32xf32> -> vector<2x32xf32>
    %52 = vector.extract_strided_slice %2 {offsets = [0, 64], sizes = [2, 32], strides = [1, 1]} : vector<32x128xf32> to vector<2x32xf32>
    %53 = arith.addf %51, %52 : vector<2x32xf32>
    %54 = vector.extract_strided_slice %53 {offsets = [0, 0], sizes = [2, 16], strides = [1, 1]} : vector<2x32xf32> to vector<2x16xf32>
    %cst_20 = arith.constant 0.000000e+00 : f32
    %cst_21 = arith.constant 6.000000e+00 : f32
    %55 = vector.broadcast %cst_20 : f32 to vector<2x16xf32>
    %56 = arith.maximumf %55, %54 : vector<2x16xf32>
    %57 = vector.broadcast %cst_21 : f32 to vector<2x16xf32>
    %58 = arith.minimumf %57, %56 : vector<2x16xf32>
    %59 = vector.extract_strided_slice %53 {offsets = [0, 16], sizes = [2, 16], strides = [1, 1]} : vector<2x32xf32> to vector<2x16xf32>
    %60 = math.tanh %59 : vector<2x16xf32>
    %61 = arith.mulf %58, %60 : vector<2x16xf32>
    %cst_22 = arith.constant dense<0.000000e+00> : vector<16xf32>
    %62 = vector.multi_reduction <add>, %61, %cst_22 [0] : vector<2x16xf32> to vector<16xf32>
    %63 = vector.shape_cast %62 : vector<16xf32> to vector<1x16xf32>
    %cst_23 = arith.constant 2.000000e+00 : f32
    %64 = vector.broadcast %cst_23 : f32 to vector<1x16xf32>
    %65 = arith.divf %63, %64 : vector<1x16xf32>
    %66 = vector.broadcast %65 : vector<1x16xf32> to vector<2x16xf32>
    %67 = arith.subf %61, %66 : vector<2x16xf32>
    %68 = vector.extract_strided_slice %3 {offsets = [48, 0], sizes = [16, 32], strides = [1, 1]} : vector<64x32xf32> to vector<16x32xf32>
    %cst_24 = arith.constant dense<0.000000e+00> : vector<2x32xf32>
    %69 = tpu.matmul %67, %68, %cst_24 {dimension_numbers = #tpu.dot_dimension_numbers<[1], [0], [0], [1], [0, 0, 1, 1], [], []>} : vector<2x16xf32>, vector<16x32xf32>, vector<2x32xf32> -> vector<2x32xf32>
    %70 = vector.extract_strided_slice %2 {offsets = [0, 96], sizes = [2, 32], strides = [1, 1]} : vector<32x128xf32> to vector<2x32xf32>
    %71 = arith.addf %69, %70 : vector<2x32xf32>
    %72 = vector.extract_strided_slice %71 {offsets = [0, 0], sizes = [2, 16], strides = [1, 1]} : vector<2x32xf32> to vector<2x16xf32>
    %cst_25 = arith.constant 0.000000e+00 : f32
    %cst_26 = arith.constant 6.000000e+00 : f32
    %73 = vector.broadcast %cst_25 : f32 to vector<2x16xf32>
    %74 = arith.maximumf %73, %72 : vector<2x16xf32>
    %75 = vector.broadcast %cst_26 : f32 to vector<2x16xf32>
    %76 = arith.minimumf %75, %74 : vector<2x16xf32>
    %77 = vector.extract_strided_slice %71 {offsets = [0, 16], sizes = [2, 16], strides = [1, 1]} : vector<2x32xf32> to vector<2x16xf32>
    %78 = math.tanh %77 : vector<2x16xf32>
    %79 = arith.mulf %76, %78 : vector<2x16xf32>
    %80 = arith.addf %5, %79 : vector<2x16xf32>
    %cst_27 = arith.constant dense<0.000000e+00> : vector<16xf32>
    %81 = vector.multi_reduction <add>, %80, %cst_27 [0] : vector<2x16xf32> to vector<16xf32>
    %82 = vector.shape_cast %81 : vector<16xf32> to vector<1x16xf32>
    %cst_28 = arith.constant 2.000000e+00 : f32
    %83 = vector.broadcast %cst_28 : f32 to vector<1x16xf32>
    %84 = arith.divf %82, %83 : vector<1x16xf32>
    %85 = vector.broadcast %84 : vector<1x16xf32> to vector<2x16xf32>
    %86 = arith.subf %80, %85 : vector<2x16xf32>
    %87 = vector.extract_strided_slice %3 {offsets = [0, 0], sizes = [16, 32], strides = [1, 1]} : vector<64x32xf32> to vector<16x32xf32>
    %cst_29 = arith.constant dense<0.000000e+00> : vector<2x32xf32>
    %88 = tpu.matmul %86, %87, %cst_29 {dimension_numbers = #tpu.dot_dimension_numbers<[1], [0], [0], [1], [0, 0, 1, 1], [], []>} : vector<2x16xf32>, vector<16x32xf32>, vector<2x32xf32> -> vector<2x32xf32>
    %89 = vector.extract_strided_slice %2 {offsets = [2, 0], sizes = [2, 32], strides = [1, 1]} : vector<32x128xf32> to vector<2x32xf32>
    %90 = arith.addf %88, %89 : vector<2x32xf32>
    %91 = vector.extract_strided_slice %90 {offsets = [0, 0], sizes = [2, 16], strides = [1, 1]} : vector<2x32xf32> to vector<2x16xf32>
    %cst_30 = arith.constant 0.000000e+00 : f32
    %cst_31 = arith.constant 6.000000e+00 : f32
    %92 = vector.broadcast %cst_30 : f32 to vector<2x16xf32>
    %93 = arith.maximumf %92, %91 : vector<2x16xf32>
    %94 = vector.broadcast %cst_31 : f32 to vector<2x16xf32>
    %95 = arith.minimumf %94, %93 : vector<2x16xf32>
    %96 = vector.extract_strided_slice %90 {offsets = [0, 16], sizes = [2, 16], strides = [1, 1]} : vector<2x32xf32> to vector<2x16xf32>
    %97 = math.tanh %96 : vector<2x16xf32>
    %98 = arith.mulf %95, %97 : vector<2x16xf32>
    %cst_32 = arith.constant dense<0.000000e+00> : vector<16xf32>
    %99 = vector.multi_reduction <add>, %98, %cst_32 [0] : vector<2x16xf32> to vector<16xf32>
    %100 = vector.shape_cast %99 : vector<16xf32> to vector<1x16xf32>
    %cst_33 = arith.constant 2.000000e+00 : f32
    %101 = vector.broadcast %cst_33 : f32 to vector<1x16xf32>
    %102 = arith.divf %100, %101 : vector<1x16xf32>
    %103 = vector.broadcast %102 : vector<1x16xf32> to vector<2x16xf32>
    %104 = arith.subf %98, %103 : vector<2x16xf32>
    %105 = vector.extract_strided_slice %3 {offsets = [16, 0], sizes = [16, 32], strides = [1, 1]} : vector<64x32xf32> to vector<16x32xf32>
    %cst_34 = arith.constant dense<0.000000e+00> : vector<2x32xf32>
    %106 = tpu.matmul %104, %105, %cst_34 {dimension_numbers = #tpu.dot_dimension_numbers<[1], [0], [0], [1], [0, 0, 1, 1], [], []>} : vector<2x16xf32>, vector<16x32xf32>, vector<2x32xf32> -> vector<2x32xf32>
    %107 = vector.extract_strided_slice %2 {offsets = [2, 32], sizes = [2, 32], strides = [1, 1]} : vector<32x128xf32> to vector<2x32xf32>
    %108 = arith.addf %106, %107 : vector<2x32xf32>
    %109 = vector.extract_strided_slice %108 {offsets = [0, 0], sizes = [2, 16], strides = [1, 1]} : vector<2x32xf32> to vector<2x16xf32>
    %cst_35 = arith.constant 0.000000e+00 : f32
    %cst_36 = arith.constant 6.000000e+00 : f32
    %110 = vector.broadcast %cst_35 : f32 to vector<2x16xf32>
    %111 = arith.maximumf %110, %109 : vector<2x16xf32>
    %112 = vector.broadcast %cst_36 : f32 to vector<2x16xf32>
    %113 = arith.minimumf %112, %111 : vector<2x16xf32>
    %114 = vector.extract_strided_slice %108 {offsets = [0, 16], sizes = [2, 16], strides = [1, 1]} : vector<2x32xf32> to vector<2x16xf32>
    %115 = math.tanh %114 : vector<2x16xf32>
    %116 = arith.mulf %113, %115 : vector<2x16xf32>
    %117 = arith.addf %43, %116 : vector<2x16xf32>
    %cst_37 = arith.constant dense<0.000000e+00> : vector<16xf32>
    %118 = vector.multi_reduction <add>, %117, %cst_37 [0] : vector<2x16xf32> to vector<16xf32>
    %119 = vector.shape_cast %118 : vector<16xf32> to vector<1x16xf32>
    %cst_38 = arith.constant 2.000000e+00 : f32
    %120 = vector.broadcast %cst_38 : f32 to vector<1x16xf32>
    %121 = arith.divf %119, %120 : vector<1x16xf32>
    %122 = vector.broadcast %121 : vector<1x16xf32> to vector<2x16xf32>
    %123 = arith.subf %117, %122 : vector<2x16xf32>
    %124 = vector.extract_strided_slice %3 {offsets = [32, 0], sizes = [16, 32], strides = [1, 1]} : vector<64x32xf32> to vector<16x32xf32>
    %cst_39 = arith.constant dense<0.000000e+00> : vector<2x32xf32>
    %125 = tpu.matmul %123, %124, %cst_39 {dimension_numbers = #tpu.dot_dimension_numbers<[1], [0], [0], [1], [0, 0, 1, 1], [], []>} : vector<2x16xf32>, vector<16x32xf32>, vector<2x32xf32> -> vector<2x32xf32>
    %126 = vector.extract_strided_slice %2 {offsets = [2, 64], sizes = [2, 32], strides = [1, 1]} : vector<32x128xf32> to vector<2x32xf32>
    %127 = arith.addf %125, %126 : vector<2x32xf32>
    %128 = vector.extract_strided_slice %127 {offsets = [0, 0], sizes = [2, 16], strides = [1, 1]} : vector<2x32xf32> to vector<2x16xf32>
    %cst_40 = arith.constant 0.000000e+00 : f32
    %cst_41 = arith.constant 6.000000e+00 : f32
    %129 = vector.broadcast %cst_40 : f32 to vector<2x16xf32>
    %130 = arith.maximumf %129, %128 : vector<2x16xf32>
    %131 = vector.broadcast %cst_41 : f32 to vector<2x16xf32>
    %132 = arith.minimumf %131, %130 : vector<2x16xf32>
    %133 = vector.extract_strided_slice %127 {offsets = [0, 16], sizes = [2, 16], strides = [1, 1]} : vector<2x32xf32> to vector<2x16xf32>
    %134 = math.tanh %133 : vector<2x16xf32>
    %135 = arith.mulf %132, %134 : vector<2x16xf32>
    %cst_42 = arith.constant dense<0.000000e+00> : vector<16xf32>
    %136 = vector.multi_reduction <add>, %135, %cst_42 [0] : vector<2x16xf32> to vector<16xf32>
    %137 = vector.shape_cast %136 : vector<16xf32> to vector<1x16xf32>
    %cst_43 = arith.constant 2.000000e+00 : f32
    %138 = vector.broadcast %cst_43 : f32 to vector<1x16xf32>
    %139 = arith.divf %137, %138 : vector<1x16xf32>
    %140 = vector.broadcast %139 : vector<1x16xf32> to vector<2x16xf32>
    %141 = arith.subf %135, %140 : vector<2x16xf32>
    %142 = vector.extract_strided_slice %3 {offsets = [48, 0], sizes = [16, 32], strides = [1, 1]} : vector<64x32xf32> to vector<16x32xf32>
    %cst_44 = arith.constant dense<0.000000e+00> : vector<2x32xf32>
    %143 = tpu.matmul %141, %142, %cst_44 {dimension_numbers = #tpu.dot_dimension_numbers<[1], [0], [0], [1], [0, 0, 1, 1], [], []>} : vector<2x16xf32>, vector<16x32xf32>, vector<2x32xf32> -> vector<2x32xf32>
    %144 = vector.extract_strided_slice %2 {offsets = [2, 96], sizes = [2, 32], strides = [1, 1]} : vector<32x128xf32> to vector<2x32xf32>
    %145 = arith.addf %143, %144 : vector<2x32xf32>
    %146 = vector.extract_strided_slice %145 {offsets = [0, 0], sizes = [2, 16], strides = [1, 1]} : vector<2x32xf32> to vector<2x16xf32>
    %cst_45 = arith.constant 0.000000e+00 : f32
    %cst_46 = arith.constant 6.000000e+00 : f32
    %147 = vector.broadcast %cst_45 : f32 to vector<2x16xf32>
    %148 = arith.maximumf %147, %146 : vector<2x16xf32>
    %149 = vector.broadcast %cst_46 : f32 to vector<2x16xf32>
    %150 = arith.minimumf %149, %148 : vector<2x16xf32>
    %151 = vector.extract_strided_slice %145 {offsets = [0, 16], sizes = [2, 16], strides = [1, 1]} : vector<2x32xf32> to vector<2x16xf32>
    %152 = math.tanh %151 : vector<2x16xf32>
    %153 = arith.mulf %150, %152 : vector<2x16xf32>
    %154 = arith.addf %80, %153 : vector<2x16xf32>
    %cst_47 = arith.constant dense<0.000000e+00> : vector<16xf32>
    %155 = vector.multi_reduction <add>, %154, %cst_47 [0] : vector<2x16xf32> to vector<16xf32>
    %156 = vector.shape_cast %155 : vector<16xf32> to vector<1x16xf32>
    %cst_48 = arith.constant 2.000000e+00 : f32
    %157 = vector.broadcast %cst_48 : f32 to vector<1x16xf32>
    %158 = arith.divf %156, %157 : vector<1x16xf32>
    %159 = vector.broadcast %158 : vector<1x16xf32> to vector<2x16xf32>
    %160 = arith.subf %154, %159 : vector<2x16xf32>
    %161 = vector.extract_strided_slice %3 {offsets = [0, 0], sizes = [16, 32], strides = [1, 1]} : vector<64x32xf32> to vector<16x32xf32>
    %cst_49 = arith.constant dense<0.000000e+00> : vector<2x32xf32>
    %162 = tpu.matmul %160, %161, %cst_49 {dimension_numbers = #tpu.dot_dimension_numbers<[1], [0], [0], [1], [0, 0, 1, 1], [], []>} : vector<2x16xf32>, vector<16x32xf32>, vector<2x32xf32> -> vector<2x32xf32>
    %163 = vector.extract_strided_slice %2 {offsets = [4, 0], sizes = [2, 32], strides = [1, 1]} : vector<32x128xf32> to vector<2x32xf32>
    %164 = arith.addf %162, %163 : vector<2x32xf32>
    %165 = vector.extract_strided_slice %164 {offsets = [0, 0], sizes = [2, 16], strides = [1, 1]} : vector<2x32xf32> to vector<2x16xf32>
    %cst_50 = arith.constant 0.000000e+00 : f32
    %cst_51 = arith.constant 6.000000e+00 : f32
    %166 = vector.broadcast %cst_50 : f32 to vector<2x16xf32>
    %167 = arith.maximumf %166, %165 : vector<2x16xf32>
    %168 = vector.broadcast %cst_51 : f32 to vector<2x16xf32>
    %169 = arith.minimumf %168, %167 : vector<2x16xf32>
    %170 = vector.extract_strided_slice %164 {offsets = [0, 16], sizes = [2, 16], strides = [1, 1]} : vector<2x32xf32> to vector<2x16xf32>
    %171 = math.tanh %170 : vector<2x16xf32>
    %172 = arith.mulf %169, %171 : vector<2x16xf32>
    %cst_52 = arith.constant dense<0.000000e+00> : vector<16xf32>
    %173 = vector.multi_reduction <add>, %172, %cst_52 [0] : vector<2x16xf32> to vector<16xf32>
    %174 = vector.shape_cast %173 : vector<16xf32> to vector<1x16xf32>
    %cst_53 = arith.constant 2.000000e+00 : f32
    %175 = vector.broadcast %cst_53 : f32 to vector<1x16xf32>
    %176 = arith.divf %174, %175 : vector<1x16xf32>
    %177 = vector.broadcast %176 : vector<1x16xf32> to vector<2x16xf32>
    %178 = arith.subf %172, %177 : vector<2x16xf32>
    %179 = vector.extract_strided_slice %3 {offsets = [16, 0], sizes = [16, 32], strides = [1, 1]} : vector<64x32xf32> to vector<16x32xf32>
    %cst_54 = arith.constant dense<0.000000e+00> : vector<2x32xf32>
    %180 = tpu.matmul %178, %179, %cst_54 {dimension_numbers = #tpu.dot_dimension_numbers<[1], [0], [0], [1], [0, 0, 1, 1], [], []>} : vector<2x16xf32>, vector<16x32xf32>, vector<2x32xf32> -> vector<2x32xf32>
    %181 = vector.extract_strided_slice %2 {offsets = [4, 32], sizes = [2, 32], strides = [1, 1]} : vector<32x128xf32> to vector<2x32xf32>
    %182 = arith.addf %180, %181 : vector<2x32xf32>
    %183 = vector.extract_strided_slice %182 {offsets = [0, 0], sizes = [2, 16], strides = [1, 1]} : vector<2x32xf32> to vector<2x16xf32>
    %cst_55 = arith.constant 0.000000e+00 : f32
    %cst_56 = arith.constant 6.000000e+00 : f32
    %184 = vector.broadcast %cst_55 : f32 to vector<2x16xf32>
    %185 = arith.maximumf %184, %183 : vector<2x16xf32>
    %186 = vector.broadcast %cst_56 : f32 to vector<2x16xf32>
    %187 = arith.minimumf %186, %185 : vector<2x16xf32>
    %188 = vector.extract_strided_slice %182 {offsets = [0, 16], sizes = [2, 16], strides = [1, 1]} : vector<2x32xf32> to vector<2x16xf32>
    %189 = math.tanh %188 : vector<2x16xf32>
    %190 = arith.mulf %187, %189 : vector<2x16xf32>
    %191 = arith.addf %117, %190 : vector<2x16xf32>
    %cst_57 = arith.constant dense<0.000000e+00> : vector<16xf32>
    %192 = vector.multi_reduction <add>, %191, %cst_57 [0] : vector<2x16xf32> to vector<16xf32>
    %193 = vector.shape_cast %192 : vector<16xf32> to vector<1x16xf32>
    %cst_58 = arith.constant 2.000000e+00 : f32
    %194 = vector.broadcast %cst_58 : f32 to vector<1x16xf32>
    %195 = arith.divf %193, %194 : vector<1x16xf32>
    %196 = vector.broadcast %195 : vector<1x16xf32> to vector<2x16xf32>
    %197 = arith.subf %191, %196 : vector<2x16xf32>
    %198 = vector.extract_strided_slice %3 {offsets = [32, 0], sizes = [16, 32], strides = [1, 1]} : vector<64x32xf32> to vector<16x32xf32>
    %cst_59 = arith.constant dense<0.000000e+00> : vector<2x32xf32>
    %199 = tpu.matmul %197, %198, %cst_59 {dimension_numbers = #tpu.dot_dimension_numbers<[1], [0], [0], [1], [0, 0, 1, 1], [], []>} : vector<2x16xf32>, vector<16x32xf32>, vector<2x32xf32> -> vector<2x32xf32>
    %200 = vector.extract_strided_slice %2 {offsets = [4, 64], sizes = [2, 32], strides = [1, 1]} : vector<32x128xf32> to vector<2x32xf32>
    %201 = arith.addf %199, %200 : vector<2x32xf32>
    %202 = vector.extract_strided_slice %201 {offsets = [0, 0], sizes = [2, 16], strides = [1, 1]} : vector<2x32xf32> to vector<2x16xf32>
    %cst_60 = arith.constant 0.000000e+00 : f32
    %cst_61 = arith.constant 6.000000e+00 : f32
    %203 = vector.broadcast %cst_60 : f32 to vector<2x16xf32>
    %204 = arith.maximumf %203, %202 : vector<2x16xf32>
    %205 = vector.broadcast %cst_61 : f32 to vector<2x16xf32>
    %206 = arith.minimumf %205, %204 : vector<2x16xf32>
    %207 = vector.extract_strided_slice %201 {offsets = [0, 16], sizes = [2, 16], strides = [1, 1]} : vector<2x32xf32> to vector<2x16xf32>
    %208 = math.tanh %207 : vector<2x16xf32>
    %209 = arith.mulf %206, %208 : vector<2x16xf32>
    %cst_62 = arith.constant dense<0.000000e+00> : vector<16xf32>
    %210 = vector.multi_reduction <add>, %209, %cst_62 [0] : vector<2x16xf32> to vector<16xf32>
    %211 = vector.shape_cast %210 : vector<16xf32> to vector<1x16xf32>
    %cst_63 = arith.constant 2.000000e+00 : f32
    %212 = vector.broadcast %cst_63 : f32 to vector<1x16xf32>
    %213 = arith.divf %211, %212 : vector<1x16xf32>
    %214 = vector.broadcast %213 : vector<1x16xf32> to vector<2x16xf32>
    %215 = arith.subf %209, %214 : vector<2x16xf32>
    %216 = vector.extract_strided_slice %3 {offsets = [48, 0], sizes = [16, 32], strides = [1, 1]} : vector<64x32xf32> to vector<16x32xf32>
    %cst_64 = arith.constant dense<0.000000e+00> : vector<2x32xf32>
    %217 = tpu.matmul %215, %216, %cst_64 {dimension_numbers = #tpu.dot_dimension_numbers<[1], [0], [0], [1], [0, 0, 1, 1], [], []>} : vector<2x16xf32>, vector<16x32xf32>, vector<2x32xf32> -> vector<2x32xf32>
    %218 = vector.extract_strided_slice %2 {offsets = [4, 96], sizes = [2, 32], strides = [1, 1]} : vector<32x128xf32> to vector<2x32xf32>
    %219 = arith.addf %217, %218 : vector<2x32xf32>
    %220 = vector.extract_strided_slice %219 {offsets = [0, 0], sizes = [2, 16], strides = [1, 1]} : vector<2x32xf32> to vector<2x16xf32>
    %cst_65 = arith.constant 0.000000e+00 : f32
    %cst_66 = arith.constant 6.000000e+00 : f32
    %221 = vector.broadcast %cst_65 : f32 to vector<2x16xf32>
    %222 = arith.maximumf %221, %220 : vector<2x16xf32>
    %223 = vector.broadcast %cst_66 : f32 to vector<2x16xf32>
    %224 = arith.minimumf %223, %222 : vector<2x16xf32>
    %225 = vector.extract_strided_slice %219 {offsets = [0, 16], sizes = [2, 16], strides = [1, 1]} : vector<2x32xf32> to vector<2x16xf32>
    %226 = math.tanh %225 : vector<2x16xf32>
    %227 = arith.mulf %224, %226 : vector<2x16xf32>
    %228 = arith.addf %154, %227 : vector<2x16xf32>
    %cst_67 = arith.constant dense<0.000000e+00> : vector<16xf32>
    %229 = vector.multi_reduction <add>, %228, %cst_67 [0] : vector<2x16xf32> to vector<16xf32>
    %230 = vector.shape_cast %229 : vector<16xf32> to vector<1x16xf32>
    %cst_68 = arith.constant 2.000000e+00 : f32
    %231 = vector.broadcast %cst_68 : f32 to vector<1x16xf32>
    %232 = arith.divf %230, %231 : vector<1x16xf32>
    %233 = vector.broadcast %232 : vector<1x16xf32> to vector<2x16xf32>
    %234 = arith.subf %228, %233 : vector<2x16xf32>
    %235 = vector.extract_strided_slice %3 {offsets = [0, 0], sizes = [16, 32], strides = [1, 1]} : vector<64x32xf32> to vector<16x32xf32>
    %cst_69 = arith.constant dense<0.000000e+00> : vector<2x32xf32>
    %236 = tpu.matmul %234, %235, %cst_69 {dimension_numbers = #tpu.dot_dimension_numbers<[1], [0], [0], [1], [0, 0, 1, 1], [], []>} : vector<2x16xf32>, vector<16x32xf32>, vector<2x32xf32> -> vector<2x32xf32>
    %237 = vector.extract_strided_slice %2 {offsets = [6, 0], sizes = [2, 32], strides = [1, 1]} : vector<32x128xf32> to vector<2x32xf32>
    %238 = arith.addf %236, %237 : vector<2x32xf32>
    %239 = vector.extract_strided_slice %238 {offsets = [0, 0], sizes = [2, 16], strides = [1, 1]} : vector<2x32xf32> to vector<2x16xf32>
    %cst_70 = arith.constant 0.000000e+00 : f32
    %cst_71 = arith.constant 6.000000e+00 : f32
    %240 = vector.broadcast %cst_70 : f32 to vector<2x16xf32>
    %241 = arith.maximumf %240, %239 : vector<2x16xf32>
    %242 = vector.broadcast %cst_71 : f32 to vector<2x16xf32>
    %243 = arith.minimumf %242, %241 : vector<2x16xf32>
    %244 = vector.extract_strided_slice %238 {offsets = [0, 16], sizes = [2, 16], strides = [1, 1]} : vector<2x32xf32> to vector<2x16xf32>
    %245 = math.tanh %244 : vector<2x16xf32>
    %246 = arith.mulf %243, %245 : vector<2x16xf32>
    %cst_72 = arith.constant dense<0.000000e+00> : vector<16xf32>
    %247 = vector.multi_reduction <add>, %246, %cst_72 [0] : vector<2x16xf32> to vector<16xf32>
    %248 = vector.shape_cast %247 : vector<16xf32> to vector<1x16xf32>
    %cst_73 = arith.constant 2.000000e+00 : f32
    %249 = vector.broadcast %cst_73 : f32 to vector<1x16xf32>
    %250 = arith.divf %248, %249 : vector<1x16xf32>
    %251 = vector.broadcast %250 : vector<1x16xf32> to vector<2x16xf32>
    %252 = arith.subf %246, %251 : vector<2x16xf32>
    %253 = vector.extract_strided_slice %3 {offsets = [16, 0], sizes = [16, 32], strides = [1, 1]} : vector<64x32xf32> to vector<16x32xf32>
    %cst_74 = arith.constant dense<0.000000e+00> : vector<2x32xf32>
    %254 = tpu.matmul %252, %253, %cst_74 {dimension_numbers = #tpu.dot_dimension_numbers<[1], [0], [0], [1], [0, 0, 1, 1], [], []>} : vector<2x16xf32>, vector<16x32xf32>, vector<2x32xf32> -> vector<2x32xf32>
    %255 = vector.extract_strided_slice %2 {offsets = [6, 32], sizes = [2, 32], strides = [1, 1]} : vector<32x128xf32> to vector<2x32xf32>
    %256 = arith.addf %254, %255 : vector<2x32xf32>
    %257 = vector.extract_strided_slice %256 {offsets = [0, 0], sizes = [2, 16], strides = [1, 1]} : vector<2x32xf32> to vector<2x16xf32>
    %cst_75 = arith.constant 0.000000e+00 : f32
    %cst_76 = arith.constant 6.000000e+00 : f32
    %258 = vector.broadcast %cst_75 : f32 to vector<2x16xf32>
    %259 = arith.maximumf %258, %257 : vector<2x16xf32>
    %260 = vector.broadcast %cst_76 : f32 to vector<2x16xf32>
    %261 = arith.minimumf %260, %259 : vector<2x16xf32>
    %262 = vector.extract_strided_slice %256 {offsets = [0, 16], sizes = [2, 16], strides = [1, 1]} : vector<2x32xf32> to vector<2x16xf32>
    %263 = math.tanh %262 : vector<2x16xf32>
    %264 = arith.mulf %261, %263 : vector<2x16xf32>
    %265 = arith.addf %191, %264 : vector<2x16xf32>
    %cst_77 = arith.constant dense<0.000000e+00> : vector<16xf32>
    %266 = vector.multi_reduction <add>, %265, %cst_77 [0] : vector<2x16xf32> to vector<16xf32>
    %267 = vector.shape_cast %266 : vector<16xf32> to vector<1x16xf32>
    %cst_78 = arith.constant 2.000000e+00 : f32
    %268 = vector.broadcast %cst_78 : f32 to vector<1x16xf32>
    %269 = arith.divf %267, %268 : vector<1x16xf32>
    %270 = vector.broadcast %269 : vector<1x16xf32> to vector<2x16xf32>
    %271 = arith.subf %265, %270 : vector<2x16xf32>
    %272 = vector.extract_strided_slice %3 {offsets = [32, 0], sizes = [16, 32], strides = [1, 1]} : vector<64x32xf32> to vector<16x32xf32>
    %cst_79 = arith.constant dense<0.000000e+00> : vector<2x32xf32>
    %273 = tpu.matmul %271, %272, %cst_79 {dimension_numbers = #tpu.dot_dimension_numbers<[1], [0], [0], [1], [0, 0, 1, 1], [], []>} : vector<2x16xf32>, vector<16x32xf32>, vector<2x32xf32> -> vector<2x32xf32>
    %274 = vector.extract_strided_slice %2 {offsets = [6, 64], sizes = [2, 32], strides = [1, 1]} : vector<32x128xf32> to vector<2x32xf32>
    %275 = arith.addf %273, %274 : vector<2x32xf32>
    %276 = vector.extract_strided_slice %275 {offsets = [0, 0], sizes = [2, 16], strides = [1, 1]} : vector<2x32xf32> to vector<2x16xf32>
    %cst_80 = arith.constant 0.000000e+00 : f32
    %cst_81 = arith.constant 6.000000e+00 : f32
    %277 = vector.broadcast %cst_80 : f32 to vector<2x16xf32>
    %278 = arith.maximumf %277, %276 : vector<2x16xf32>
    %279 = vector.broadcast %cst_81 : f32 to vector<2x16xf32>
    %280 = arith.minimumf %279, %278 : vector<2x16xf32>
    %281 = vector.extract_strided_slice %275 {offsets = [0, 16], sizes = [2, 16], strides = [1, 1]} : vector<2x32xf32> to vector<2x16xf32>
    %282 = math.tanh %281 : vector<2x16xf32>
    %283 = arith.mulf %280, %282 : vector<2x16xf32>
    %cst_82 = arith.constant dense<0.000000e+00> : vector<16xf32>
    %284 = vector.multi_reduction <add>, %283, %cst_82 [0] : vector<2x16xf32> to vector<16xf32>
    %285 = vector.shape_cast %284 : vector<16xf32> to vector<1x16xf32>
    %cst_83 = arith.constant 2.000000e+00 : f32
    %286 = vector.broadcast %cst_83 : f32 to vector<1x16xf32>
    %287 = arith.divf %285, %286 : vector<1x16xf32>
    %288 = vector.broadcast %287 : vector<1x16xf32> to vector<2x16xf32>
    %289 = arith.subf %283, %288 : vector<2x16xf32>
    %290 = vector.extract_strided_slice %3 {offsets = [48, 0], sizes = [16, 32], strides = [1, 1]} : vector<64x32xf32> to vector<16x32xf32>
    %cst_84 = arith.constant dense<0.000000e+00> : vector<2x32xf32>
    %291 = tpu.matmul %289, %290, %cst_84 {dimension_numbers = #tpu.dot_dimension_numbers<[1], [0], [0], [1], [0, 0, 1, 1], [], []>} : vector<2x16xf32>, vector<16x32xf32>, vector<2x32xf32> -> vector<2x32xf32>
    %292 = vector.extract_strided_slice %2 {offsets = [6, 96], sizes = [2, 32], strides = [1, 1]} : vector<32x128xf32> to vector<2x32xf32>
    %293 = arith.addf %291, %292 : vector<2x32xf32>
    %294 = vector.extract_strided_slice %293 {offsets = [0, 0], sizes = [2, 16], strides = [1, 1]} : vector<2x32xf32> to vector<2x16xf32>
    %cst_85 = arith.constant 0.000000e+00 : f32
    %cst_86 = arith.constant 6.000000e+00 : f32
    %295 = vector.broadcast %cst_85 : f32 to vector<2x16xf32>
    %296 = arith.maximumf %295, %294 : vector<2x16xf32>
    %297 = vector.broadcast %cst_86 : f32 to vector<2x16xf32>
    %298 = arith.minimumf %297, %296 : vector<2x16xf32>
    %299 = vector.extract_strided_slice %293 {offsets = [0, 16], sizes = [2, 16], strides = [1, 1]} : vector<2x32xf32> to vector<2x16xf32>
    %300 = math.tanh %299 : vector<2x16xf32>
    %301 = arith.mulf %298, %300 : vector<2x16xf32>
    %302 = arith.addf %228, %301 : vector<2x16xf32>
    %cst_87 = arith.constant dense<0.000000e+00> : vector<16xf32>
    %303 = vector.multi_reduction <add>, %302, %cst_87 [0] : vector<2x16xf32> to vector<16xf32>
    %304 = vector.shape_cast %303 : vector<16xf32> to vector<1x16xf32>
    %cst_88 = arith.constant 2.000000e+00 : f32
    %305 = vector.broadcast %cst_88 : f32 to vector<1x16xf32>
    %306 = arith.divf %304, %305 : vector<1x16xf32>
    %307 = vector.broadcast %306 : vector<1x16xf32> to vector<2x16xf32>
    %308 = arith.subf %302, %307 : vector<2x16xf32>
    %309 = vector.extract_strided_slice %3 {offsets = [0, 0], sizes = [16, 32], strides = [1, 1]} : vector<64x32xf32> to vector<16x32xf32>
    %cst_89 = arith.constant dense<0.000000e+00> : vector<2x32xf32>
    %310 = tpu.matmul %308, %309, %cst_89 {dimension_numbers = #tpu.dot_dimension_numbers<[1], [0], [0], [1], [0, 0, 1, 1], [], []>} : vector<2x16xf32>, vector<16x32xf32>, vector<2x32xf32> -> vector<2x32xf32>
    %311 = vector.extract_strided_slice %2 {offsets = [8, 0], sizes = [2, 32], strides = [1, 1]} : vector<32x128xf32> to vector<2x32xf32>
    %312 = arith.addf %310, %311 : vector<2x32xf32>
    %313 = vector.extract_strided_slice %312 {offsets = [0, 0], sizes = [2, 16], strides = [1, 1]} : vector<2x32xf32> to vector<2x16xf32>
    %cst_90 = arith.constant 0.000000e+00 : f32
    %cst_91 = arith.constant 6.000000e+00 : f32
    %314 = vector.broadcast %cst_90 : f32 to vector<2x16xf32>
    %315 = arith.maximumf %314, %313 : vector<2x16xf32>
    %316 = vector.broadcast %cst_91 : f32 to vector<2x16xf32>
    %317 = arith.minimumf %316, %315 : vector<2x16xf32>
    %318 = vector.extract_strided_slice %312 {offsets = [0, 16], sizes = [2, 16], strides = [1, 1]} : vector<2x32xf32> to vector<2x16xf32>
    %319 = math.tanh %318 : vector<2x16xf32>
    %320 = arith.mulf %317, %319 : vector<2x16xf32>
    %cst_92 = arith.constant dense<0.000000e+00> : vector<16xf32>
    %321 = vector.multi_reduction <add>, %320, %cst_92 [0] : vector<2x16xf32> to vector<16xf32>
    %322 = vector.shape_cast %321 : vector<16xf32> to vector<1x16xf32>
    %cst_93 = arith.constant 2.000000e+00 : f32
    %323 = vector.broadcast %cst_93 : f32 to vector<1x16xf32>
    %324 = arith.divf %322, %323 : vector<1x16xf32>
    %325 = vector.broadcast %324 : vector<1x16xf32> to vector<2x16xf32>
    %326 = arith.subf %320, %325 : vector<2x16xf32>
    %327 = vector.extract_strided_slice %3 {offsets = [16, 0], sizes = [16, 32], strides = [1, 1]} : vector<64x32xf32> to vector<16x32xf32>
    %cst_94 = arith.constant dense<0.000000e+00> : vector<2x32xf32>
    %328 = tpu.matmul %326, %327, %cst_94 {dimension_numbers = #tpu.dot_dimension_numbers<[1], [0], [0], [1], [0, 0, 1, 1], [], []>} : vector<2x16xf32>, vector<16x32xf32>, vector<2x32xf32> -> vector<2x32xf32>
    %329 = vector.extract_strided_slice %2 {offsets = [8, 32], sizes = [2, 32], strides = [1, 1]} : vector<32x128xf32> to vector<2x32xf32>
    %330 = arith.addf %328, %329 : vector<2x32xf32>
    %331 = vector.extract_strided_slice %330 {offsets = [0, 0], sizes = [2, 16], strides = [1, 1]} : vector<2x32xf32> to vector<2x16xf32>
    %cst_95 = arith.constant 0.000000e+00 : f32
    %cst_96 = arith.constant 6.000000e+00 : f32
    %332 = vector.broadcast %cst_95 : f32 to vector<2x16xf32>
    %333 = arith.maximumf %332, %331 : vector<2x16xf32>
    %334 = vector.broadcast %cst_96 : f32 to vector<2x16xf32>
    %335 = arith.minimumf %334, %333 : vector<2x16xf32>
    %336 = vector.extract_strided_slice %330 {offsets = [0, 16], sizes = [2, 16], strides = [1, 1]} : vector<2x32xf32> to vector<2x16xf32>
    %337 = math.tanh %336 : vector<2x16xf32>
    %338 = arith.mulf %335, %337 : vector<2x16xf32>
    %339 = arith.addf %265, %338 : vector<2x16xf32>
    %cst_97 = arith.constant dense<0.000000e+00> : vector<16xf32>
    %340 = vector.multi_reduction <add>, %339, %cst_97 [0] : vector<2x16xf32> to vector<16xf32>
    %341 = vector.shape_cast %340 : vector<16xf32> to vector<1x16xf32>
    %cst_98 = arith.constant 2.000000e+00 : f32
    %342 = vector.broadcast %cst_98 : f32 to vector<1x16xf32>
    %343 = arith.divf %341, %342 : vector<1x16xf32>
    %344 = vector.broadcast %343 : vector<1x16xf32> to vector<2x16xf32>
    %345 = arith.subf %339, %344 : vector<2x16xf32>
    %346 = vector.extract_strided_slice %3 {offsets = [32, 0], sizes = [16, 32], strides = [1, 1]} : vector<64x32xf32> to vector<16x32xf32>
    %cst_99 = arith.constant dense<0.000000e+00> : vector<2x32xf32>
    %347 = tpu.matmul %345, %346, %cst_99 {dimension_numbers = #tpu.dot_dimension_numbers<[1], [0], [0], [1], [0, 0, 1, 1], [], []>} : vector<2x16xf32>, vector<16x32xf32>, vector<2x32xf32> -> vector<2x32xf32>
    %348 = vector.extract_strided_slice %2 {offsets = [8, 64], sizes = [2, 32], strides = [1, 1]} : vector<32x128xf32> to vector<2x32xf32>
    %349 = arith.addf %347, %348 : vector<2x32xf32>
    %350 = vector.extract_strided_slice %349 {offsets = [0, 0], sizes = [2, 16], strides = [1, 1]} : vector<2x32xf32> to vector<2x16xf32>
    %cst_100 = arith.constant 0.000000e+00 : f32
    %cst_101 = arith.constant 6.000000e+00 : f32
    %351 = vector.broadcast %cst_100 : f32 to vector<2x16xf32>
    %352 = arith.maximumf %351, %350 : vector<2x16xf32>
    %353 = vector.broadcast %cst_101 : f32 to vector<2x16xf32>
    %354 = arith.minimumf %353, %352 : vector<2x16xf32>
    %355 = vector.extract_strided_slice %349 {offsets = [0, 16], sizes = [2, 16], strides = [1, 1]} : vector<2x32xf32> to vector<2x16xf32>
    %356 = math.tanh %355 : vector<2x16xf32>
    %357 = arith.mulf %354, %356 : vector<2x16xf32>
    %cst_102 = arith.constant dense<0.000000e+00> : vector<16xf32>
    %358 = vector.multi_reduction <add>, %357, %cst_102 [0] : vector<2x16xf32> to vector<16xf32>
    %359 = vector.shape_cast %358 : vector<16xf32> to vector<1x16xf32>
    %cst_103 = arith.constant 2.000000e+00 : f32
    %360 = vector.broadcast %cst_103 : f32 to vector<1x16xf32>
    %361 = arith.divf %359, %360 : vector<1x16xf32>
    %362 = vector.broadcast %361 : vector<1x16xf32> to vector<2x16xf32>
    %363 = arith.subf %357, %362 : vector<2x16xf32>
    %364 = vector.extract_strided_slice %3 {offsets = [48, 0], sizes = [16, 32], strides = [1, 1]} : vector<64x32xf32> to vector<16x32xf32>
    %cst_104 = arith.constant dense<0.000000e+00> : vector<2x32xf32>
    %365 = tpu.matmul %363, %364, %cst_104 {dimension_numbers = #tpu.dot_dimension_numbers<[1], [0], [0], [1], [0, 0, 1, 1], [], []>} : vector<2x16xf32>, vector<16x32xf32>, vector<2x32xf32> -> vector<2x32xf32>
    %366 = vector.extract_strided_slice %2 {offsets = [8, 96], sizes = [2, 32], strides = [1, 1]} : vector<32x128xf32> to vector<2x32xf32>
    %367 = arith.addf %365, %366 : vector<2x32xf32>
    %368 = vector.extract_strided_slice %367 {offsets = [0, 0], sizes = [2, 16], strides = [1, 1]} : vector<2x32xf32> to vector<2x16xf32>
    %cst_105 = arith.constant 0.000000e+00 : f32
    %cst_106 = arith.constant 6.000000e+00 : f32
    %369 = vector.broadcast %cst_105 : f32 to vector<2x16xf32>
    %370 = arith.maximumf %369, %368 : vector<2x16xf32>
    %371 = vector.broadcast %cst_106 : f32 to vector<2x16xf32>
    %372 = arith.minimumf %371, %370 : vector<2x16xf32>
    %373 = vector.extract_strided_slice %367 {offsets = [0, 16], sizes = [2, 16], strides = [1, 1]} : vector<2x32xf32> to vector<2x16xf32>
    %374 = math.tanh %373 : vector<2x16xf32>
    %375 = arith.mulf %372, %374 : vector<2x16xf32>
    %376 = arith.addf %302, %375 : vector<2x16xf32>
    %cst_107 = arith.constant dense<0.000000e+00> : vector<16xf32>
    %377 = vector.multi_reduction <add>, %376, %cst_107 [0] : vector<2x16xf32> to vector<16xf32>
    %378 = vector.shape_cast %377 : vector<16xf32> to vector<1x16xf32>
    %cst_108 = arith.constant 2.000000e+00 : f32
    %379 = vector.broadcast %cst_108 : f32 to vector<1x16xf32>
    %380 = arith.divf %378, %379 : vector<1x16xf32>
    %381 = vector.broadcast %380 : vector<1x16xf32> to vector<2x16xf32>
    %382 = arith.subf %376, %381 : vector<2x16xf32>
    %383 = vector.extract_strided_slice %3 {offsets = [0, 0], sizes = [16, 32], strides = [1, 1]} : vector<64x32xf32> to vector<16x32xf32>
    %cst_109 = arith.constant dense<0.000000e+00> : vector<2x32xf32>
    %384 = tpu.matmul %382, %383, %cst_109 {dimension_numbers = #tpu.dot_dimension_numbers<[1], [0], [0], [1], [0, 0, 1, 1], [], []>} : vector<2x16xf32>, vector<16x32xf32>, vector<2x32xf32> -> vector<2x32xf32>
    %385 = vector.extract_strided_slice %2 {offsets = [10, 0], sizes = [2, 32], strides = [1, 1]} : vector<32x128xf32> to vector<2x32xf32>
    %386 = arith.addf %384, %385 : vector<2x32xf32>
    %387 = vector.extract_strided_slice %386 {offsets = [0, 0], sizes = [2, 16], strides = [1, 1]} : vector<2x32xf32> to vector<2x16xf32>
    %cst_110 = arith.constant 0.000000e+00 : f32
    %cst_111 = arith.constant 6.000000e+00 : f32
    %388 = vector.broadcast %cst_110 : f32 to vector<2x16xf32>
    %389 = arith.maximumf %388, %387 : vector<2x16xf32>
    %390 = vector.broadcast %cst_111 : f32 to vector<2x16xf32>
    %391 = arith.minimumf %390, %389 : vector<2x16xf32>
    %392 = vector.extract_strided_slice %386 {offsets = [0, 16], sizes = [2, 16], strides = [1, 1]} : vector<2x32xf32> to vector<2x16xf32>
    %393 = math.tanh %392 : vector<2x16xf32>
    %394 = arith.mulf %391, %393 : vector<2x16xf32>
    %cst_112 = arith.constant dense<0.000000e+00> : vector<16xf32>
    %395 = vector.multi_reduction <add>, %394, %cst_112 [0] : vector<2x16xf32> to vector<16xf32>
    %396 = vector.shape_cast %395 : vector<16xf32> to vector<1x16xf32>
    %cst_113 = arith.constant 2.000000e+00 : f32
    %397 = vector.broadcast %cst_113 : f32 to vector<1x16xf32>
    %398 = arith.divf %396, %397 : vector<1x16xf32>
    %399 = vector.broadcast %398 : vector<1x16xf32> to vector<2x16xf32>
    %400 = arith.subf %394, %399 : vector<2x16xf32>
    %401 = vector.extract_strided_slice %3 {offsets = [16, 0], sizes = [16, 32], strides = [1, 1]} : vector<64x32xf32> to vector<16x32xf32>
    %cst_114 = arith.constant dense<0.000000e+00> : vector<2x32xf32>
    %402 = tpu.matmul %400, %401, %cst_114 {dimension_numbers = #tpu.dot_dimension_numbers<[1], [0], [0], [1], [0, 0, 1, 1], [], []>} : vector<2x16xf32>, vector<16x32xf32>, vector<2x32xf32> -> vector<2x32xf32>
    %403 = vector.extract_strided_slice %2 {offsets = [10, 32], sizes = [2, 32], strides = [1, 1]} : vector<32x128xf32> to vector<2x32xf32>
    %404 = arith.addf %402, %403 : vector<2x32xf32>
    %405 = vector.extract_strided_slice %404 {offsets = [0, 0], sizes = [2, 16], strides = [1, 1]} : vector<2x32xf32> to vector<2x16xf32>
    %cst_115 = arith.constant 0.000000e+00 : f32
    %cst_116 = arith.constant 6.000000e+00 : f32
    %406 = vector.broadcast %cst_115 : f32 to vector<2x16xf32>
    %407 = arith.maximumf %406, %405 : vector<2x16xf32>
    %408 = vector.broadcast %cst_116 : f32 to vector<2x16xf32>
    %409 = arith.minimumf %408, %407 : vector<2x16xf32>
    %410 = vector.extract_strided_slice %404 {offsets = [0, 16], sizes = [2, 16], strides = [1, 1]} : vector<2x32xf32> to vector<2x16xf32>
    %411 = math.tanh %410 : vector<2x16xf32>
    %412 = arith.mulf %409, %411 : vector<2x16xf32>
    %413 = arith.addf %339, %412 : vector<2x16xf32>
    %cst_117 = arith.constant dense<0.000000e+00> : vector<16xf32>
    %414 = vector.multi_reduction <add>, %413, %cst_117 [0] : vector<2x16xf32> to vector<16xf32>
    %415 = vector.shape_cast %414 : vector<16xf32> to vector<1x16xf32>
    %cst_118 = arith.constant 2.000000e+00 : f32
    %416 = vector.broadcast %cst_118 : f32 to vector<1x16xf32>
    %417 = arith.divf %415, %416 : vector<1x16xf32>
    %418 = vector.broadcast %417 : vector<1x16xf32> to vector<2x16xf32>
    %419 = arith.subf %413, %418 : vector<2x16xf32>
    %420 = vector.extract_strided_slice %3 {offsets = [32, 0], sizes = [16, 32], strides = [1, 1]} : vector<64x32xf32> to vector<16x32xf32>
    %cst_119 = arith.constant dense<0.000000e+00> : vector<2x32xf32>
    %421 = tpu.matmul %419, %420, %cst_119 {dimension_numbers = #tpu.dot_dimension_numbers<[1], [0], [0], [1], [0, 0, 1, 1], [], []>} : vector<2x16xf32>, vector<16x32xf32>, vector<2x32xf32> -> vector<2x32xf32>
    %422 = vector.extract_strided_slice %2 {offsets = [10, 64], sizes = [2, 32], strides = [1, 1]} : vector<32x128xf32> to vector<2x32xf32>
    %423 = arith.addf %421, %422 : vector<2x32xf32>
    %424 = vector.extract_strided_slice %423 {offsets = [0, 0], sizes = [2, 16], strides = [1, 1]} : vector<2x32xf32> to vector<2x16xf32>
    %cst_120 = arith.constant 0.000000e+00 : f32
    %cst_121 = arith.constant 6.000000e+00 : f32
    %425 = vector.broadcast %cst_120 : f32 to vector<2x16xf32>
    %426 = arith.maximumf %425, %424 : vector<2x16xf32>
    %427 = vector.broadcast %cst_121 : f32 to vector<2x16xf32>
    %428 = arith.minimumf %427, %426 : vector<2x16xf32>
    %429 = vector.extract_strided_slice %423 {offsets = [0, 16], sizes = [2, 16], strides = [1, 1]} : vector<2x32xf32> to vector<2x16xf32>
    %430 = math.tanh %429 : vector<2x16xf32>
    %431 = arith.mulf %428, %430 : vector<2x16xf32>
    %cst_122 = arith.constant dense<0.000000e+00> : vector<16xf32>
    %432 = vector.multi_reduction <add>, %431, %cst_122 [0] : vector<2x16xf32> to vector<16xf32>
    %433 = vector.shape_cast %432 : vector<16xf32> to vector<1x16xf32>
    %cst_123 = arith.constant 2.000000e+00 : f32
    %434 = vector.broadcast %cst_123 : f32 to vector<1x16xf32>
    %435 = arith.divf %433, %434 : vector<1x16xf32>
    %436 = vector.broadcast %435 : vector<1x16xf32> to vector<2x16xf32>
    %437 = arith.subf %431, %436 : vector<2x16xf32>
    %438 = vector.extract_strided_slice %3 {offsets = [48, 0], sizes = [16, 32], strides = [1, 1]} : vector<64x32xf32> to vector<16x32xf32>
    %cst_124 = arith.constant dense<0.000000e+00> : vector<2x32xf32>
    %439 = tpu.matmul %437, %438, %cst_124 {dimension_numbers = #tpu.dot_dimension_numbers<[1], [0], [0], [1], [0, 0, 1, 1], [], []>} : vector<2x16xf32>, vector<16x32xf32>, vector<2x32xf32> -> vector<2x32xf32>
    %440 = vector.extract_strided_slice %2 {offsets = [10, 96], sizes = [2, 32], strides = [1, 1]} : vector<32x128xf32> to vector<2x32xf32>
    %441 = arith.addf %439, %440 : vector<2x32xf32>
    %442 = vector.extract_strided_slice %441 {offsets = [0, 0], sizes = [2, 16], strides = [1, 1]} : vector<2x32xf32> to vector<2x16xf32>
    %cst_125 = arith.constant 0.000000e+00 : f32
    %cst_126 = arith.constant 6.000000e+00 : f32
    %443 = vector.broadcast %cst_125 : f32 to vector<2x16xf32>
    %444 = arith.maximumf %443, %442 : vector<2x16xf32>
    %445 = vector.broadcast %cst_126 : f32 to vector<2x16xf32>
    %446 = arith.minimumf %445, %444 : vector<2x16xf32>
    %447 = vector.extract_strided_slice %441 {offsets = [0, 16], sizes = [2, 16], strides = [1, 1]} : vector<2x32xf32> to vector<2x16xf32>
    %448 = math.tanh %447 : vector<2x16xf32>
    %449 = arith.mulf %446, %448 : vector<2x16xf32>
    %450 = arith.addf %376, %449 : vector<2x16xf32>
    %cst_127 = arith.constant dense<0.000000e+00> : vector<16xf32>
    %451 = vector.multi_reduction <add>, %450, %cst_127 [0] : vector<2x16xf32> to vector<16xf32>
    %452 = vector.shape_cast %451 : vector<16xf32> to vector<1x16xf32>
    %cst_128 = arith.constant 2.000000e+00 : f32
    %453 = vector.broadcast %cst_128 : f32 to vector<1x16xf32>
    %454 = arith.divf %452, %453 : vector<1x16xf32>
    %455 = vector.broadcast %454 : vector<1x16xf32> to vector<2x16xf32>
    %456 = arith.subf %450, %455 : vector<2x16xf32>
    %457 = vector.extract_strided_slice %3 {offsets = [0, 0], sizes = [16, 32], strides = [1, 1]} : vector<64x32xf32> to vector<16x32xf32>
    %cst_129 = arith.constant dense<0.000000e+00> : vector<2x32xf32>
    %458 = tpu.matmul %456, %457, %cst_129 {dimension_numbers = #tpu.dot_dimension_numbers<[1], [0], [0], [1], [0, 0, 1, 1], [], []>} : vector<2x16xf32>, vector<16x32xf32>, vector<2x32xf32> -> vector<2x32xf32>
    %459 = vector.extract_strided_slice %2 {offsets = [12, 0], sizes = [2, 32], strides = [1, 1]} : vector<32x128xf32> to vector<2x32xf32>
    %460 = arith.addf %458, %459 : vector<2x32xf32>
    %461 = vector.extract_strided_slice %460 {offsets = [0, 0], sizes = [2, 16], strides = [1, 1]} : vector<2x32xf32> to vector<2x16xf32>
    %cst_130 = arith.constant 0.000000e+00 : f32
    %cst_131 = arith.constant 6.000000e+00 : f32
    %462 = vector.broadcast %cst_130 : f32 to vector<2x16xf32>
    %463 = arith.maximumf %462, %461 : vector<2x16xf32>
    %464 = vector.broadcast %cst_131 : f32 to vector<2x16xf32>
    %465 = arith.minimumf %464, %463 : vector<2x16xf32>
    %466 = vector.extract_strided_slice %460 {offsets = [0, 16], sizes = [2, 16], strides = [1, 1]} : vector<2x32xf32> to vector<2x16xf32>
    %467 = math.tanh %466 : vector<2x16xf32>
    %468 = arith.mulf %465, %467 : vector<2x16xf32>
    %cst_132 = arith.constant dense<0.000000e+00> : vector<16xf32>
    %469 = vector.multi_reduction <add>, %468, %cst_132 [0] : vector<2x16xf32> to vector<16xf32>
    %470 = vector.shape_cast %469 : vector<16xf32> to vector<1x16xf32>
    %cst_133 = arith.constant 2.000000e+00 : f32
    %471 = vector.broadcast %cst_133 : f32 to vector<1x16xf32>
    %472 = arith.divf %470, %471 : vector<1x16xf32>
    %473 = vector.broadcast %472 : vector<1x16xf32> to vector<2x16xf32>
    %474 = arith.subf %468, %473 : vector<2x16xf32>
    %475 = vector.extract_strided_slice %3 {offsets = [16, 0], sizes = [16, 32], strides = [1, 1]} : vector<64x32xf32> to vector<16x32xf32>
    %cst_134 = arith.constant dense<0.000000e+00> : vector<2x32xf32>
    %476 = tpu.matmul %474, %475, %cst_134 {dimension_numbers = #tpu.dot_dimension_numbers<[1], [0], [0], [1], [0, 0, 1, 1], [], []>} : vector<2x16xf32>, vector<16x32xf32>, vector<2x32xf32> -> vector<2x32xf32>
    %477 = vector.extract_strided_slice %2 {offsets = [12, 32], sizes = [2, 32], strides = [1, 1]} : vector<32x128xf32> to vector<2x32xf32>
    %478 = arith.addf %476, %477 : vector<2x32xf32>
    %479 = vector.extract_strided_slice %478 {offsets = [0, 0], sizes = [2, 16], strides = [1, 1]} : vector<2x32xf32> to vector<2x16xf32>
    %cst_135 = arith.constant 0.000000e+00 : f32
    %cst_136 = arith.constant 6.000000e+00 : f32
    %480 = vector.broadcast %cst_135 : f32 to vector<2x16xf32>
    %481 = arith.maximumf %480, %479 : vector<2x16xf32>
    %482 = vector.broadcast %cst_136 : f32 to vector<2x16xf32>
    %483 = arith.minimumf %482, %481 : vector<2x16xf32>
    %484 = vector.extract_strided_slice %478 {offsets = [0, 16], sizes = [2, 16], strides = [1, 1]} : vector<2x32xf32> to vector<2x16xf32>
    %485 = math.tanh %484 : vector<2x16xf32>
    %486 = arith.mulf %483, %485 : vector<2x16xf32>
    %487 = arith.addf %413, %486 : vector<2x16xf32>
    %cst_137 = arith.constant dense<0.000000e+00> : vector<16xf32>
    %488 = vector.multi_reduction <add>, %487, %cst_137 [0] : vector<2x16xf32> to vector<16xf32>
    %489 = vector.shape_cast %488 : vector<16xf32> to vector<1x16xf32>
    %cst_138 = arith.constant 2.000000e+00 : f32
    %490 = vector.broadcast %cst_138 : f32 to vector<1x16xf32>
    %491 = arith.divf %489, %490 : vector<1x16xf32>
    %492 = vector.broadcast %491 : vector<1x16xf32> to vector<2x16xf32>
    %493 = arith.subf %487, %492 : vector<2x16xf32>
    %494 = vector.extract_strided_slice %3 {offsets = [32, 0], sizes = [16, 32], strides = [1, 1]} : vector<64x32xf32> to vector<16x32xf32>
    %cst_139 = arith.constant dense<0.000000e+00> : vector<2x32xf32>
    %495 = tpu.matmul %493, %494, %cst_139 {dimension_numbers = #tpu.dot_dimension_numbers<[1], [0], [0], [1], [0, 0, 1, 1], [], []>} : vector<2x16xf32>, vector<16x32xf32>, vector<2x32xf32> -> vector<2x32xf32>
    %496 = vector.extract_strided_slice %2 {offsets = [12, 64], sizes = [2, 32], strides = [1, 1]} : vector<32x128xf32> to vector<2x32xf32>
    %497 = arith.addf %495, %496 : vector<2x32xf32>
    %498 = vector.extract_strided_slice %497 {offsets = [0, 0], sizes = [2, 16], strides = [1, 1]} : vector<2x32xf32> to vector<2x16xf32>
    %cst_140 = arith.constant 0.000000e+00 : f32
    %cst_141 = arith.constant 6.000000e+00 : f32
    %499 = vector.broadcast %cst_140 : f32 to vector<2x16xf32>
    %500 = arith.maximumf %499, %498 : vector<2x16xf32>
    %501 = vector.broadcast %cst_141 : f32 to vector<2x16xf32>
    %502 = arith.minimumf %501, %500 : vector<2x16xf32>
    %503 = vector.extract_strided_slice %497 {offsets = [0, 16], sizes = [2, 16], strides = [1, 1]} : vector<2x32xf32> to vector<2x16xf32>
    %504 = math.tanh %503 : vector<2x16xf32>
    %505 = arith.mulf %502, %504 : vector<2x16xf32>
    %cst_142 = arith.constant dense<0.000000e+00> : vector<16xf32>
    %506 = vector.multi_reduction <add>, %505, %cst_142 [0] : vector<2x16xf32> to vector<16xf32>
    %507 = vector.shape_cast %506 : vector<16xf32> to vector<1x16xf32>
    %cst_143 = arith.constant 2.000000e+00 : f32
    %508 = vector.broadcast %cst_143 : f32 to vector<1x16xf32>
    %509 = arith.divf %507, %508 : vector<1x16xf32>
    %510 = vector.broadcast %509 : vector<1x16xf32> to vector<2x16xf32>
    %511 = arith.subf %505, %510 : vector<2x16xf32>
    %512 = vector.extract_strided_slice %3 {offsets = [48, 0], sizes = [16, 32], strides = [1, 1]} : vector<64x32xf32> to vector<16x32xf32>
    %cst_144 = arith.constant dense<0.000000e+00> : vector<2x32xf32>
    %513 = tpu.matmul %511, %512, %cst_144 {dimension_numbers = #tpu.dot_dimension_numbers<[1], [0], [0], [1], [0, 0, 1, 1], [], []>} : vector<2x16xf32>, vector<16x32xf32>, vector<2x32xf32> -> vector<2x32xf32>
    %514 = vector.extract_strided_slice %2 {offsets = [12, 96], sizes = [2, 32], strides = [1, 1]} : vector<32x128xf32> to vector<2x32xf32>
    %515 = arith.addf %513, %514 : vector<2x32xf32>
    %516 = vector.extract_strided_slice %515 {offsets = [0, 0], sizes = [2, 16], strides = [1, 1]} : vector<2x32xf32> to vector<2x16xf32>
    %cst_145 = arith.constant 0.000000e+00 : f32
    %cst_146 = arith.constant 6.000000e+00 : f32
    %517 = vector.broadcast %cst_145 : f32 to vector<2x16xf32>
    %518 = arith.maximumf %517, %516 : vector<2x16xf32>
    %519 = vector.broadcast %cst_146 : f32 to vector<2x16xf32>
    %520 = arith.minimumf %519, %518 : vector<2x16xf32>
    %521 = vector.extract_strided_slice %515 {offsets = [0, 16], sizes = [2, 16], strides = [1, 1]} : vector<2x32xf32> to vector<2x16xf32>
    %522 = math.tanh %521 : vector<2x16xf32>
    %523 = arith.mulf %520, %522 : vector<2x16xf32>
    %524 = arith.addf %450, %523 : vector<2x16xf32>
    %cst_147 = arith.constant dense<0.000000e+00> : vector<16xf32>
    %525 = vector.multi_reduction <add>, %524, %cst_147 [0] : vector<2x16xf32> to vector<16xf32>
    %526 = vector.shape_cast %525 : vector<16xf32> to vector<1x16xf32>
    %cst_148 = arith.constant 2.000000e+00 : f32
    %527 = vector.broadcast %cst_148 : f32 to vector<1x16xf32>
    %528 = arith.divf %526, %527 : vector<1x16xf32>
    %529 = vector.broadcast %528 : vector<1x16xf32> to vector<2x16xf32>
    %530 = arith.subf %524, %529 : vector<2x16xf32>
    %531 = vector.extract_strided_slice %3 {offsets = [0, 0], sizes = [16, 32], strides = [1, 1]} : vector<64x32xf32> to vector<16x32xf32>
    %cst_149 = arith.constant dense<0.000000e+00> : vector<2x32xf32>
    %532 = tpu.matmul %530, %531, %cst_149 {dimension_numbers = #tpu.dot_dimension_numbers<[1], [0], [0], [1], [0, 0, 1, 1], [], []>} : vector<2x16xf32>, vector<16x32xf32>, vector<2x32xf32> -> vector<2x32xf32>
    %533 = vector.extract_strided_slice %2 {offsets = [14, 0], sizes = [2, 32], strides = [1, 1]} : vector<32x128xf32> to vector<2x32xf32>
    %534 = arith.addf %532, %533 : vector<2x32xf32>
    %535 = vector.extract_strided_slice %534 {offsets = [0, 0], sizes = [2, 16], strides = [1, 1]} : vector<2x32xf32> to vector<2x16xf32>
    %cst_150 = arith.constant 0.000000e+00 : f32
    %cst_151 = arith.constant 6.000000e+00 : f32
    %536 = vector.broadcast %cst_150 : f32 to vector<2x16xf32>
    %537 = arith.maximumf %536, %535 : vector<2x16xf32>
    %538 = vector.broadcast %cst_151 : f32 to vector<2x16xf32>
    %539 = arith.minimumf %538, %537 : vector<2x16xf32>
    %540 = vector.extract_strided_slice %534 {offsets = [0, 16], sizes = [2, 16], strides = [1, 1]} : vector<2x32xf32> to vector<2x16xf32>
    %541 = math.tanh %540 : vector<2x16xf32>
    %542 = arith.mulf %539, %541 : vector<2x16xf32>
    %cst_152 = arith.constant dense<0.000000e+00> : vector<16xf32>
    %543 = vector.multi_reduction <add>, %542, %cst_152 [0] : vector<2x16xf32> to vector<16xf32>
    %544 = vector.shape_cast %543 : vector<16xf32> to vector<1x16xf32>
    %cst_153 = arith.constant 2.000000e+00 : f32
    %545 = vector.broadcast %cst_153 : f32 to vector<1x16xf32>
    %546 = arith.divf %544, %545 : vector<1x16xf32>
    %547 = vector.broadcast %546 : vector<1x16xf32> to vector<2x16xf32>
    %548 = arith.subf %542, %547 : vector<2x16xf32>
    %549 = vector.extract_strided_slice %3 {offsets = [16, 0], sizes = [16, 32], strides = [1, 1]} : vector<64x32xf32> to vector<16x32xf32>
    %cst_154 = arith.constant dense<0.000000e+00> : vector<2x32xf32>
    %550 = tpu.matmul %548, %549, %cst_154 {dimension_numbers = #tpu.dot_dimension_numbers<[1], [0], [0], [1], [0, 0, 1, 1], [], []>} : vector<2x16xf32>, vector<16x32xf32>, vector<2x32xf32> -> vector<2x32xf32>
    %551 = vector.extract_strided_slice %2 {offsets = [14, 32], sizes = [2, 32], strides = [1, 1]} : vector<32x128xf32> to vector<2x32xf32>
    %552 = arith.addf %550, %551 : vector<2x32xf32>
    %553 = vector.extract_strided_slice %552 {offsets = [0, 0], sizes = [2, 16], strides = [1, 1]} : vector<2x32xf32> to vector<2x16xf32>
    %cst_155 = arith.constant 0.000000e+00 : f32
    %cst_156 = arith.constant 6.000000e+00 : f32
    %554 = vector.broadcast %cst_155 : f32 to vector<2x16xf32>
    %555 = arith.maximumf %554, %553 : vector<2x16xf32>
    %556 = vector.broadcast %cst_156 : f32 to vector<2x16xf32>
    %557 = arith.minimumf %556, %555 : vector<2x16xf32>
    %558 = vector.extract_strided_slice %552 {offsets = [0, 16], sizes = [2, 16], strides = [1, 1]} : vector<2x32xf32> to vector<2x16xf32>
    %559 = math.tanh %558 : vector<2x16xf32>
    %560 = arith.mulf %557, %559 : vector<2x16xf32>
    %561 = arith.addf %487, %560 : vector<2x16xf32>
    %cst_157 = arith.constant dense<0.000000e+00> : vector<16xf32>
    %562 = vector.multi_reduction <add>, %561, %cst_157 [0] : vector<2x16xf32> to vector<16xf32>
    %563 = vector.shape_cast %562 : vector<16xf32> to vector<1x16xf32>
    %cst_158 = arith.constant 2.000000e+00 : f32
    %564 = vector.broadcast %cst_158 : f32 to vector<1x16xf32>
    %565 = arith.divf %563, %564 : vector<1x16xf32>
    %566 = vector.broadcast %565 : vector<1x16xf32> to vector<2x16xf32>
    %567 = arith.subf %561, %566 : vector<2x16xf32>
    %568 = vector.extract_strided_slice %3 {offsets = [32, 0], sizes = [16, 32], strides = [1, 1]} : vector<64x32xf32> to vector<16x32xf32>
    %cst_159 = arith.constant dense<0.000000e+00> : vector<2x32xf32>
    %569 = tpu.matmul %567, %568, %cst_159 {dimension_numbers = #tpu.dot_dimension_numbers<[1], [0], [0], [1], [0, 0, 1, 1], [], []>} : vector<2x16xf32>, vector<16x32xf32>, vector<2x32xf32> -> vector<2x32xf32>
    %570 = vector.extract_strided_slice %2 {offsets = [14, 64], sizes = [2, 32], strides = [1, 1]} : vector<32x128xf32> to vector<2x32xf32>
    %571 = arith.addf %569, %570 : vector<2x32xf32>
    %572 = vector.extract_strided_slice %571 {offsets = [0, 0], sizes = [2, 16], strides = [1, 1]} : vector<2x32xf32> to vector<2x16xf32>
    %cst_160 = arith.constant 0.000000e+00 : f32
    %cst_161 = arith.constant 6.000000e+00 : f32
    %573 = vector.broadcast %cst_160 : f32 to vector<2x16xf32>
    %574 = arith.maximumf %573, %572 : vector<2x16xf32>
    %575 = vector.broadcast %cst_161 : f32 to vector<2x16xf32>
    %576 = arith.minimumf %575, %574 : vector<2x16xf32>
    %577 = vector.extract_strided_slice %571 {offsets = [0, 16], sizes = [2, 16], strides = [1, 1]} : vector<2x32xf32> to vector<2x16xf32>
    %578 = math.tanh %577 : vector<2x16xf32>
    %579 = arith.mulf %576, %578 : vector<2x16xf32>
    %cst_162 = arith.constant dense<0.000000e+00> : vector<16xf32>
    %580 = vector.multi_reduction <add>, %579, %cst_162 [0] : vector<2x16xf32> to vector<16xf32>
    %581 = vector.shape_cast %580 : vector<16xf32> to vector<1x16xf32>
    %cst_163 = arith.constant 2.000000e+00 : f32
    %582 = vector.broadcast %cst_163 : f32 to vector<1x16xf32>
    %583 = arith.divf %581, %582 : vector<1x16xf32>
    %584 = vector.broadcast %583 : vector<1x16xf32> to vector<2x16xf32>
    %585 = arith.subf %579, %584 : vector<2x16xf32>
    %586 = vector.extract_strided_slice %3 {offsets = [48, 0], sizes = [16, 32], strides = [1, 1]} : vector<64x32xf32> to vector<16x32xf32>
    %cst_164 = arith.constant dense<0.000000e+00> : vector<2x32xf32>
    %587 = tpu.matmul %585, %586, %cst_164 {dimension_numbers = #tpu.dot_dimension_numbers<[1], [0], [0], [1], [0, 0, 1, 1], [], []>} : vector<2x16xf32>, vector<16x32xf32>, vector<2x32xf32> -> vector<2x32xf32>
    %588 = vector.extract_strided_slice %2 {offsets = [14, 96], sizes = [2, 32], strides = [1, 1]} : vector<32x128xf32> to vector<2x32xf32>
    %589 = arith.addf %587, %588 : vector<2x32xf32>
    %590 = vector.extract_strided_slice %589 {offsets = [0, 0], sizes = [2, 16], strides = [1, 1]} : vector<2x32xf32> to vector<2x16xf32>
    %cst_165 = arith.constant 0.000000e+00 : f32
    %cst_166 = arith.constant 6.000000e+00 : f32
    %591 = vector.broadcast %cst_165 : f32 to vector<2x16xf32>
    %592 = arith.maximumf %591, %590 : vector<2x16xf32>
    %593 = vector.broadcast %cst_166 : f32 to vector<2x16xf32>
    %594 = arith.minimumf %593, %592 : vector<2x16xf32>
    %595 = vector.extract_strided_slice %589 {offsets = [0, 16], sizes = [2, 16], strides = [1, 1]} : vector<2x32xf32> to vector<2x16xf32>
    %596 = math.tanh %595 : vector<2x16xf32>
    %597 = arith.mulf %594, %596 : vector<2x16xf32>
    %598 = arith.addf %524, %597 : vector<2x16xf32>
    %cst_167 = arith.constant dense<0.000000e+00> : vector<16xf32>
    %599 = vector.multi_reduction <add>, %598, %cst_167 [0] : vector<2x16xf32> to vector<16xf32>
    %600 = vector.shape_cast %599 : vector<16xf32> to vector<1x16xf32>
    %cst_168 = arith.constant 2.000000e+00 : f32
    %601 = vector.broadcast %cst_168 : f32 to vector<1x16xf32>
    %602 = arith.divf %600, %601 : vector<1x16xf32>
    %603 = vector.broadcast %602 : vector<1x16xf32> to vector<2x16xf32>
    %604 = arith.subf %598, %603 : vector<2x16xf32>
    %605 = vector.extract_strided_slice %3 {offsets = [0, 0], sizes = [16, 32], strides = [1, 1]} : vector<64x32xf32> to vector<16x32xf32>
    %cst_169 = arith.constant dense<0.000000e+00> : vector<2x32xf32>
    %606 = tpu.matmul %604, %605, %cst_169 {dimension_numbers = #tpu.dot_dimension_numbers<[1], [0], [0], [1], [0, 0, 1, 1], [], []>} : vector<2x16xf32>, vector<16x32xf32>, vector<2x32xf32> -> vector<2x32xf32>
    %607 = vector.extract_strided_slice %2 {offsets = [16, 0], sizes = [2, 32], strides = [1, 1]} : vector<32x128xf32> to vector<2x32xf32>
    %608 = arith.addf %606, %607 : vector<2x32xf32>
    %609 = vector.extract_strided_slice %608 {offsets = [0, 0], sizes = [2, 16], strides = [1, 1]} : vector<2x32xf32> to vector<2x16xf32>
    %cst_170 = arith.constant 0.000000e+00 : f32
    %cst_171 = arith.constant 6.000000e+00 : f32
    %610 = vector.broadcast %cst_170 : f32 to vector<2x16xf32>
    %611 = arith.maximumf %610, %609 : vector<2x16xf32>
    %612 = vector.broadcast %cst_171 : f32 to vector<2x16xf32>
    %613 = arith.minimumf %612, %611 : vector<2x16xf32>
    %614 = vector.extract_strided_slice %608 {offsets = [0, 16], sizes = [2, 16], strides = [1, 1]} : vector<2x32xf32> to vector<2x16xf32>
    %615 = math.tanh %614 : vector<2x16xf32>
    %616 = arith.mulf %613, %615 : vector<2x16xf32>
    %cst_172 = arith.constant dense<0.000000e+00> : vector<16xf32>
    %617 = vector.multi_reduction <add>, %616, %cst_172 [0] : vector<2x16xf32> to vector<16xf32>
    %618 = vector.shape_cast %617 : vector<16xf32> to vector<1x16xf32>
    %cst_173 = arith.constant 2.000000e+00 : f32
    %619 = vector.broadcast %cst_173 : f32 to vector<1x16xf32>
    %620 = arith.divf %618, %619 : vector<1x16xf32>
    %621 = vector.broadcast %620 : vector<1x16xf32> to vector<2x16xf32>
    %622 = arith.subf %616, %621 : vector<2x16xf32>
    %623 = vector.extract_strided_slice %3 {offsets = [16, 0], sizes = [16, 32], strides = [1, 1]} : vector<64x32xf32> to vector<16x32xf32>
    %cst_174 = arith.constant dense<0.000000e+00> : vector<2x32xf32>
    %624 = tpu.matmul %622, %623, %cst_174 {dimension_numbers = #tpu.dot_dimension_numbers<[1], [0], [0], [1], [0, 0, 1, 1], [], []>} : vector<2x16xf32>, vector<16x32xf32>, vector<2x32xf32> -> vector<2x32xf32>
    %625 = vector.extract_strided_slice %2 {offsets = [16, 32], sizes = [2, 32], strides = [1, 1]} : vector<32x128xf32> to vector<2x32xf32>
    %626 = arith.addf %624, %625 : vector<2x32xf32>
    %627 = vector.extract_strided_slice %626 {offsets = [0, 0], sizes = [2, 16], strides = [1, 1]} : vector<2x32xf32> to vector<2x16xf32>
    %cst_175 = arith.constant 0.000000e+00 : f32
    %cst_176 = arith.constant 6.000000e+00 : f32
    %628 = vector.broadcast %cst_175 : f32 to vector<2x16xf32>
    %629 = arith.maximumf %628, %627 : vector<2x16xf32>
    %630 = vector.broadcast %cst_176 : f32 to vector<2x16xf32>
    %631 = arith.minimumf %630, %629 : vector<2x16xf32>
    %632 = vector.extract_strided_slice %626 {offsets = [0, 16], sizes = [2, 16], strides = [1, 1]} : vector<2x32xf32> to vector<2x16xf32>
    %633 = math.tanh %632 : vector<2x16xf32>
    %634 = arith.mulf %631, %633 : vector<2x16xf32>
    %635 = arith.addf %561, %634 : vector<2x16xf32>
    %cst_177 = arith.constant dense<0.000000e+00> : vector<16xf32>
    %636 = vector.multi_reduction <add>, %635, %cst_177 [0] : vector<2x16xf32> to vector<16xf32>
    %637 = vector.shape_cast %636 : vector<16xf32> to vector<1x16xf32>
    %cst_178 = arith.constant 2.000000e+00 : f32
    %638 = vector.broadcast %cst_178 : f32 to vector<1x16xf32>
    %639 = arith.divf %637, %638 : vector<1x16xf32>
    %640 = vector.broadcast %639 : vector<1x16xf32> to vector<2x16xf32>
    %641 = arith.subf %635, %640 : vector<2x16xf32>
    %642 = vector.extract_strided_slice %3 {offsets = [32, 0], sizes = [16, 32], strides = [1, 1]} : vector<64x32xf32> to vector<16x32xf32>
    %cst_179 = arith.constant dense<0.000000e+00> : vector<2x32xf32>
    %643 = tpu.matmul %641, %642, %cst_179 {dimension_numbers = #tpu.dot_dimension_numbers<[1], [0], [0], [1], [0, 0, 1, 1], [], []>} : vector<2x16xf32>, vector<16x32xf32>, vector<2x32xf32> -> vector<2x32xf32>
    %644 = vector.extract_strided_slice %2 {offsets = [16, 64], sizes = [2, 32], strides = [1, 1]} : vector<32x128xf32> to vector<2x32xf32>
    %645 = arith.addf %643, %644 : vector<2x32xf32>
    %646 = vector.extract_strided_slice %645 {offsets = [0, 0], sizes = [2, 16], strides = [1, 1]} : vector<2x32xf32> to vector<2x16xf32>
    %cst_180 = arith.constant 0.000000e+00 : f32
    %cst_181 = arith.constant 6.000000e+00 : f32
    %647 = vector.broadcast %cst_180 : f32 to vector<2x16xf32>
    %648 = arith.maximumf %647, %646 : vector<2x16xf32>
    %649 = vector.broadcast %cst_181 : f32 to vector<2x16xf32>
    %650 = arith.minimumf %649, %648 : vector<2x16xf32>
    %651 = vector.extract_strided_slice %645 {offsets = [0, 16], sizes = [2, 16], strides = [1, 1]} : vector<2x32xf32> to vector<2x16xf32>
    %652 = math.tanh %651 : vector<2x16xf32>
    %653 = arith.mulf %650, %652 : vector<2x16xf32>
    %cst_182 = arith.constant dense<0.000000e+00> : vector<16xf32>
    %654 = vector.multi_reduction <add>, %653, %cst_182 [0] : vector<2x16xf32> to vector<16xf32>
    %655 = vector.shape_cast %654 : vector<16xf32> to vector<1x16xf32>
    %cst_183 = arith.constant 2.000000e+00 : f32
    %656 = vector.broadcast %cst_183 : f32 to vector<1x16xf32>
    %657 = arith.divf %655, %656 : vector<1x16xf32>
    %658 = vector.broadcast %657 : vector<1x16xf32> to vector<2x16xf32>
    %659 = arith.subf %653, %658 : vector<2x16xf32>
    %660 = vector.extract_strided_slice %3 {offsets = [48, 0], sizes = [16, 32], strides = [1, 1]} : vector<64x32xf32> to vector<16x32xf32>
    %cst_184 = arith.constant dense<0.000000e+00> : vector<2x32xf32>
    %661 = tpu.matmul %659, %660, %cst_184 {dimension_numbers = #tpu.dot_dimension_numbers<[1], [0], [0], [1], [0, 0, 1, 1], [], []>} : vector<2x16xf32>, vector<16x32xf32>, vector<2x32xf32> -> vector<2x32xf32>
    %662 = vector.extract_strided_slice %2 {offsets = [16, 96], sizes = [2, 32], strides = [1, 1]} : vector<32x128xf32> to vector<2x32xf32>
    %663 = arith.addf %661, %662 : vector<2x32xf32>
    %664 = vector.extract_strided_slice %663 {offsets = [0, 0], sizes = [2, 16], strides = [1, 1]} : vector<2x32xf32> to vector<2x16xf32>
    %cst_185 = arith.constant 0.000000e+00 : f32
    %cst_186 = arith.constant 6.000000e+00 : f32
    %665 = vector.broadcast %cst_185 : f32 to vector<2x16xf32>
    %666 = arith.maximumf %665, %664 : vector<2x16xf32>
    %667 = vector.broadcast %cst_186 : f32 to vector<2x16xf32>
    %668 = arith.minimumf %667, %666 : vector<2x16xf32>
    %669 = vector.extract_strided_slice %663 {offsets = [0, 16], sizes = [2, 16], strides = [1, 1]} : vector<2x32xf32> to vector<2x16xf32>
    %670 = math.tanh %669 : vector<2x16xf32>
    %671 = arith.mulf %668, %670 : vector<2x16xf32>
    %672 = arith.addf %598, %671 : vector<2x16xf32>
    %673 = tpu.concatenate %672, %635 in 1 : vector<2x16xf32>, vector<2x16xf32> -> vector<2x32xf32>
    %cst_187 = arith.constant dense<0.000000e+00> : vector<16xf32>
    %674 = vector.multi_reduction <add>, %672, %cst_187 [0] : vector<2x16xf32> to vector<16xf32>
    %675 = vector.shape_cast %674 : vector<16xf32> to vector<1x16xf32>
    %cst_188 = arith.constant 2.000000e+00 : f32
    %676 = vector.broadcast %cst_188 : f32 to vector<1x16xf32>
    %677 = arith.divf %675, %676 : vector<1x16xf32>
    %678 = vector.broadcast %677 : vector<1x16xf32> to vector<2x16xf32>
    %679 = arith.subf %672, %678 : vector<2x16xf32>
    %680 = vector.extract_strided_slice %3 {offsets = [0, 0], sizes = [16, 32], strides = [1, 1]} : vector<64x32xf32> to vector<16x32xf32>
    %cst_189 = arith.constant dense<0.000000e+00> : vector<2x32xf32>
    %681 = tpu.matmul %679, %680, %cst_189 {dimension_numbers = #tpu.dot_dimension_numbers<[1], [0], [0], [1], [0, 0, 1, 1], [], []>} : vector<2x16xf32>, vector<16x32xf32>, vector<2x32xf32> -> vector<2x32xf32>
    %682 = vector.extract_strided_slice %2 {offsets = [18, 0], sizes = [2, 32], strides = [1, 1]} : vector<32x128xf32> to vector<2x32xf32>
    %683 = arith.addf %681, %682 : vector<2x32xf32>
    %684 = vector.extract_strided_slice %683 {offsets = [0, 0], sizes = [2, 16], strides = [1, 1]} : vector<2x32xf32> to vector<2x16xf32>
    %cst_190 = arith.constant 0.000000e+00 : f32
    %cst_191 = arith.constant 6.000000e+00 : f32
    %685 = vector.broadcast %cst_190 : f32 to vector<2x16xf32>
    %686 = arith.maximumf %685, %684 : vector<2x16xf32>
    %687 = vector.broadcast %cst_191 : f32 to vector<2x16xf32>
    %688 = arith.minimumf %687, %686 : vector<2x16xf32>
    %689 = vector.extract_strided_slice %683 {offsets = [0, 16], sizes = [2, 16], strides = [1, 1]} : vector<2x32xf32> to vector<2x16xf32>
    %690 = math.tanh %689 : vector<2x16xf32>
    %691 = arith.mulf %688, %690 : vector<2x16xf32>
    %cst_192 = arith.constant dense<0.000000e+00> : vector<16xf32>
    %692 = vector.multi_reduction <add>, %691, %cst_192 [0] : vector<2x16xf32> to vector<16xf32>
    %693 = vector.shape_cast %692 : vector<16xf32> to vector<1x16xf32>
    %cst_193 = arith.constant 2.000000e+00 : f32
    %694 = vector.broadcast %cst_193 : f32 to vector<1x16xf32>
    %695 = arith.divf %693, %694 : vector<1x16xf32>
    %696 = vector.broadcast %695 : vector<1x16xf32> to vector<2x16xf32>
    %697 = arith.subf %691, %696 : vector<2x16xf32>
    %698 = vector.extract_strided_slice %3 {offsets = [16, 0], sizes = [16, 32], strides = [1, 1]} : vector<64x32xf32> to vector<16x32xf32>
    %cst_194 = arith.constant dense<0.000000e+00> : vector<2x32xf32>
    %699 = tpu.matmul %697, %698, %cst_194 {dimension_numbers = #tpu.dot_dimension_numbers<[1], [0], [0], [1], [0, 0, 1, 1], [], []>} : vector<2x16xf32>, vector<16x32xf32>, vector<2x32xf32> -> vector<2x32xf32>
    %700 = vector.extract_strided_slice %2 {offsets = [18, 32], sizes = [2, 32], strides = [1, 1]} : vector<32x128xf32> to vector<2x32xf32>
    %701 = arith.addf %699, %700 : vector<2x32xf32>
    %702 = vector.extract_strided_slice %701 {offsets = [0, 0], sizes = [2, 16], strides = [1, 1]} : vector<2x32xf32> to vector<2x16xf32>
    %cst_195 = arith.constant 0.000000e+00 : f32
    %cst_196 = arith.constant 6.000000e+00 : f32
    %703 = vector.broadcast %cst_195 : f32 to vector<2x16xf32>
    %704 = arith.maximumf %703, %702 : vector<2x16xf32>
    %705 = vector.broadcast %cst_196 : f32 to vector<2x16xf32>
    %706 = arith.minimumf %705, %704 : vector<2x16xf32>
    %707 = vector.extract_strided_slice %701 {offsets = [0, 16], sizes = [2, 16], strides = [1, 1]} : vector<2x32xf32> to vector<2x16xf32>
    %708 = math.tanh %707 : vector<2x16xf32>
    %709 = arith.mulf %706, %708 : vector<2x16xf32>
    %710 = arith.addf %635, %709 : vector<2x16xf32>
    %cst_197 = arith.constant dense<0.000000e+00> : vector<16xf32>
    %711 = vector.multi_reduction <add>, %710, %cst_197 [0] : vector<2x16xf32> to vector<16xf32>
    %712 = vector.shape_cast %711 : vector<16xf32> to vector<1x16xf32>
    %cst_198 = arith.constant 2.000000e+00 : f32
    %713 = vector.broadcast %cst_198 : f32 to vector<1x16xf32>
    %714 = arith.divf %712, %713 : vector<1x16xf32>
    %715 = vector.broadcast %714 : vector<1x16xf32> to vector<2x16xf32>
    %716 = arith.subf %710, %715 : vector<2x16xf32>
    %717 = vector.extract_strided_slice %3 {offsets = [32, 0], sizes = [16, 32], strides = [1, 1]} : vector<64x32xf32> to vector<16x32xf32>
    %cst_199 = arith.constant dense<0.000000e+00> : vector<2x32xf32>
    %718 = tpu.matmul %716, %717, %cst_199 {dimension_numbers = #tpu.dot_dimension_numbers<[1], [0], [0], [1], [0, 0, 1, 1], [], []>} : vector<2x16xf32>, vector<16x32xf32>, vector<2x32xf32> -> vector<2x32xf32>
    %719 = vector.extract_strided_slice %2 {offsets = [18, 64], sizes = [2, 32], strides = [1, 1]} : vector<32x128xf32> to vector<2x32xf32>
    %720 = arith.addf %718, %719 : vector<2x32xf32>
    %721 = vector.extract_strided_slice %720 {offsets = [0, 0], sizes = [2, 16], strides = [1, 1]} : vector<2x32xf32> to vector<2x16xf32>
    %cst_200 = arith.constant 0.000000e+00 : f32
    %cst_201 = arith.constant 6.000000e+00 : f32
    %722 = vector.broadcast %cst_200 : f32 to vector<2x16xf32>
    %723 = arith.maximumf %722, %721 : vector<2x16xf32>
    %724 = vector.broadcast %cst_201 : f32 to vector<2x16xf32>
    %725 = arith.minimumf %724, %723 : vector<2x16xf32>
    %726 = vector.extract_strided_slice %720 {offsets = [0, 16], sizes = [2, 16], strides = [1, 1]} : vector<2x32xf32> to vector<2x16xf32>
    %727 = math.tanh %726 : vector<2x16xf32>
    %728 = arith.mulf %725, %727 : vector<2x16xf32>
    %cst_202 = arith.constant dense<0.000000e+00> : vector<16xf32>
    %729 = vector.multi_reduction <add>, %728, %cst_202 [0] : vector<2x16xf32> to vector<16xf32>
    %730 = vector.shape_cast %729 : vector<16xf32> to vector<1x16xf32>
    %cst_203 = arith.constant 2.000000e+00 : f32
    %731 = vector.broadcast %cst_203 : f32 to vector<1x16xf32>
    %732 = arith.divf %730, %731 : vector<1x16xf32>
    %733 = vector.broadcast %732 : vector<1x16xf32> to vector<2x16xf32>
    %734 = arith.subf %728, %733 : vector<2x16xf32>
    %735 = vector.extract_strided_slice %3 {offsets = [48, 0], sizes = [16, 32], strides = [1, 1]} : vector<64x32xf32> to vector<16x32xf32>
    %cst_204 = arith.constant dense<0.000000e+00> : vector<2x32xf32>
    %736 = tpu.matmul %734, %735, %cst_204 {dimension_numbers = #tpu.dot_dimension_numbers<[1], [0], [0], [1], [0, 0, 1, 1], [], []>} : vector<2x16xf32>, vector<16x32xf32>, vector<2x32xf32> -> vector<2x32xf32>
    %737 = vector.extract_strided_slice %2 {offsets = [18, 96], sizes = [2, 32], strides = [1, 1]} : vector<32x128xf32> to vector<2x32xf32>
    %738 = arith.addf %736, %737 : vector<2x32xf32>
    %739 = vector.extract_strided_slice %738 {offsets = [0, 0], sizes = [2, 16], strides = [1, 1]} : vector<2x32xf32> to vector<2x16xf32>
    %cst_205 = arith.constant 0.000000e+00 : f32
    %cst_206 = arith.constant 6.000000e+00 : f32
    %740 = vector.broadcast %cst_205 : f32 to vector<2x16xf32>
    %741 = arith.maximumf %740, %739 : vector<2x16xf32>
    %742 = vector.broadcast %cst_206 : f32 to vector<2x16xf32>
    %743 = arith.minimumf %742, %741 : vector<2x16xf32>
    %744 = vector.extract_strided_slice %738 {offsets = [0, 16], sizes = [2, 16], strides = [1, 1]} : vector<2x32xf32> to vector<2x16xf32>
    %745 = math.tanh %744 : vector<2x16xf32>
    %746 = arith.mulf %743, %745 : vector<2x16xf32>
    %747 = arith.addf %672, %746 : vector<2x16xf32>
    %748 = tpu.concatenate %747, %710 in 1 : vector<2x16xf32>, vector<2x16xf32> -> vector<2x32xf32>
    %cst_207 = arith.constant dense<0.000000e+00> : vector<16xf32>
    %749 = vector.multi_reduction <add>, %747, %cst_207 [0] : vector<2x16xf32> to vector<16xf32>
    %750 = vector.shape_cast %749 : vector<16xf32> to vector<1x16xf32>
    %cst_208 = arith.constant 2.000000e+00 : f32
    %751 = vector.broadcast %cst_208 : f32 to vector<1x16xf32>
    %752 = arith.divf %750, %751 : vector<1x16xf32>
    %753 = vector.broadcast %752 : vector<1x16xf32> to vector<2x16xf32>
    %754 = arith.subf %747, %753 : vector<2x16xf32>
    %755 = vector.extract_strided_slice %3 {offsets = [0, 0], sizes = [16, 32], strides = [1, 1]} : vector<64x32xf32> to vector<16x32xf32>
    %cst_209 = arith.constant dense<0.000000e+00> : vector<2x32xf32>
    %756 = tpu.matmul %754, %755, %cst_209 {dimension_numbers = #tpu.dot_dimension_numbers<[1], [0], [0], [1], [0, 0, 1, 1], [], []>} : vector<2x16xf32>, vector<16x32xf32>, vector<2x32xf32> -> vector<2x32xf32>
    %757 = vector.extract_strided_slice %2 {offsets = [20, 0], sizes = [2, 32], strides = [1, 1]} : vector<32x128xf32> to vector<2x32xf32>
    %758 = arith.addf %756, %757 : vector<2x32xf32>
    %759 = vector.extract_strided_slice %758 {offsets = [0, 0], sizes = [2, 16], strides = [1, 1]} : vector<2x32xf32> to vector<2x16xf32>
    %cst_210 = arith.constant 0.000000e+00 : f32
    %cst_211 = arith.constant 6.000000e+00 : f32
    %760 = vector.broadcast %cst_210 : f32 to vector<2x16xf32>
    %761 = arith.maximumf %760, %759 : vector<2x16xf32>
    %762 = vector.broadcast %cst_211 : f32 to vector<2x16xf32>
    %763 = arith.minimumf %762, %761 : vector<2x16xf32>
    %764 = vector.extract_strided_slice %758 {offsets = [0, 16], sizes = [2, 16], strides = [1, 1]} : vector<2x32xf32> to vector<2x16xf32>
    %765 = math.tanh %764 : vector<2x16xf32>
    %766 = arith.mulf %763, %765 : vector<2x16xf32>
    %cst_212 = arith.constant dense<0.000000e+00> : vector<16xf32>
    %767 = vector.multi_reduction <add>, %766, %cst_212 [0] : vector<2x16xf32> to vector<16xf32>
    %768 = vector.shape_cast %767 : vector<16xf32> to vector<1x16xf32>
    %cst_213 = arith.constant 2.000000e+00 : f32
    %769 = vector.broadcast %cst_213 : f32 to vector<1x16xf32>
    %770 = arith.divf %768, %769 : vector<1x16xf32>
    %771 = vector.broadcast %770 : vector<1x16xf32> to vector<2x16xf32>
    %772 = arith.subf %766, %771 : vector<2x16xf32>
    %773 = vector.extract_strided_slice %3 {offsets = [16, 0], sizes = [16, 32], strides = [1, 1]} : vector<64x32xf32> to vector<16x32xf32>
    %cst_214 = arith.constant dense<0.000000e+00> : vector<2x32xf32>
    %774 = tpu.matmul %772, %773, %cst_214 {dimension_numbers = #tpu.dot_dimension_numbers<[1], [0], [0], [1], [0, 0, 1, 1], [], []>} : vector<2x16xf32>, vector<16x32xf32>, vector<2x32xf32> -> vector<2x32xf32>
    %775 = vector.extract_strided_slice %2 {offsets = [20, 32], sizes = [2, 32], strides = [1, 1]} : vector<32x128xf32> to vector<2x32xf32>
    %776 = arith.addf %774, %775 : vector<2x32xf32>
    %777 = vector.extract_strided_slice %776 {offsets = [0, 0], sizes = [2, 16], strides = [1, 1]} : vector<2x32xf32> to vector<2x16xf32>
    %cst_215 = arith.constant 0.000000e+00 : f32
    %cst_216 = arith.constant 6.000000e+00 : f32
    %778 = vector.broadcast %cst_215 : f32 to vector<2x16xf32>
    %779 = arith.maximumf %778, %777 : vector<2x16xf32>
    %780 = vector.broadcast %cst_216 : f32 to vector<2x16xf32>
    %781 = arith.minimumf %780, %779 : vector<2x16xf32>
    %782 = vector.extract_strided_slice %776 {offsets = [0, 16], sizes = [2, 16], strides = [1, 1]} : vector<2x32xf32> to vector<2x16xf32>
    %783 = math.tanh %782 : vector<2x16xf32>
    %784 = arith.mulf %781, %783 : vector<2x16xf32>
    %785 = arith.addf %710, %784 : vector<2x16xf32>
    %cst_217 = arith.constant dense<0.000000e+00> : vector<16xf32>
    %786 = vector.multi_reduction <add>, %785, %cst_217 [0] : vector<2x16xf32> to vector<16xf32>
    %787 = vector.shape_cast %786 : vector<16xf32> to vector<1x16xf32>
    %cst_218 = arith.constant 2.000000e+00 : f32
    %788 = vector.broadcast %cst_218 : f32 to vector<1x16xf32>
    %789 = arith.divf %787, %788 : vector<1x16xf32>
    %790 = vector.broadcast %789 : vector<1x16xf32> to vector<2x16xf32>
    %791 = arith.subf %785, %790 : vector<2x16xf32>
    %792 = vector.extract_strided_slice %3 {offsets = [32, 0], sizes = [16, 32], strides = [1, 1]} : vector<64x32xf32> to vector<16x32xf32>
    %cst_219 = arith.constant dense<0.000000e+00> : vector<2x32xf32>
    %793 = tpu.matmul %791, %792, %cst_219 {dimension_numbers = #tpu.dot_dimension_numbers<[1], [0], [0], [1], [0, 0, 1, 1], [], []>} : vector<2x16xf32>, vector<16x32xf32>, vector<2x32xf32> -> vector<2x32xf32>
    %794 = vector.extract_strided_slice %2 {offsets = [20, 64], sizes = [2, 32], strides = [1, 1]} : vector<32x128xf32> to vector<2x32xf32>
    %795 = arith.addf %793, %794 : vector<2x32xf32>
    %796 = vector.extract_strided_slice %795 {offsets = [0, 0], sizes = [2, 16], strides = [1, 1]} : vector<2x32xf32> to vector<2x16xf32>
    %cst_220 = arith.constant 0.000000e+00 : f32
    %cst_221 = arith.constant 6.000000e+00 : f32
    %797 = vector.broadcast %cst_220 : f32 to vector<2x16xf32>
    %798 = arith.maximumf %797, %796 : vector<2x16xf32>
    %799 = vector.broadcast %cst_221 : f32 to vector<2x16xf32>
    %800 = arith.minimumf %799, %798 : vector<2x16xf32>
    %801 = vector.extract_strided_slice %795 {offsets = [0, 16], sizes = [2, 16], strides = [1, 1]} : vector<2x32xf32> to vector<2x16xf32>
    %802 = math.tanh %801 : vector<2x16xf32>
    %803 = arith.mulf %800, %802 : vector<2x16xf32>
    %cst_222 = arith.constant dense<0.000000e+00> : vector<16xf32>
    %804 = vector.multi_reduction <add>, %803, %cst_222 [0] : vector<2x16xf32> to vector<16xf32>
    %805 = vector.shape_cast %804 : vector<16xf32> to vector<1x16xf32>
    %cst_223 = arith.constant 2.000000e+00 : f32
    %806 = vector.broadcast %cst_223 : f32 to vector<1x16xf32>
    %807 = arith.divf %805, %806 : vector<1x16xf32>
    %808 = vector.broadcast %807 : vector<1x16xf32> to vector<2x16xf32>
    %809 = arith.subf %803, %808 : vector<2x16xf32>
    %810 = vector.extract_strided_slice %3 {offsets = [48, 0], sizes = [16, 32], strides = [1, 1]} : vector<64x32xf32> to vector<16x32xf32>
    %cst_224 = arith.constant dense<0.000000e+00> : vector<2x32xf32>
    %811 = tpu.matmul %809, %810, %cst_224 {dimension_numbers = #tpu.dot_dimension_numbers<[1], [0], [0], [1], [0, 0, 1, 1], [], []>} : vector<2x16xf32>, vector<16x32xf32>, vector<2x32xf32> -> vector<2x32xf32>
    %812 = vector.extract_strided_slice %2 {offsets = [20, 96], sizes = [2, 32], strides = [1, 1]} : vector<32x128xf32> to vector<2x32xf32>
    %813 = arith.addf %811, %812 : vector<2x32xf32>
    %814 = vector.extract_strided_slice %813 {offsets = [0, 0], sizes = [2, 16], strides = [1, 1]} : vector<2x32xf32> to vector<2x16xf32>
    %cst_225 = arith.constant 0.000000e+00 : f32
    %cst_226 = arith.constant 6.000000e+00 : f32
    %815 = vector.broadcast %cst_225 : f32 to vector<2x16xf32>
    %816 = arith.maximumf %815, %814 : vector<2x16xf32>
    %817 = vector.broadcast %cst_226 : f32 to vector<2x16xf32>
    %818 = arith.minimumf %817, %816 : vector<2x16xf32>
    %819 = vector.extract_strided_slice %813 {offsets = [0, 16], sizes = [2, 16], strides = [1, 1]} : vector<2x32xf32> to vector<2x16xf32>
    %820 = math.tanh %819 : vector<2x16xf32>
    %821 = arith.mulf %818, %820 : vector<2x16xf32>
    %822 = arith.addf %747, %821 : vector<2x16xf32>
    %823 = tpu.concatenate %822, %785 in 1 : vector<2x16xf32>, vector<2x16xf32> -> vector<2x32xf32>
    %cst_227 = arith.constant dense<0.000000e+00> : vector<16xf32>
    %824 = vector.multi_reduction <add>, %822, %cst_227 [0] : vector<2x16xf32> to vector<16xf32>
    %825 = vector.shape_cast %824 : vector<16xf32> to vector<1x16xf32>
    %cst_228 = arith.constant 2.000000e+00 : f32
    %826 = vector.broadcast %cst_228 : f32 to vector<1x16xf32>
    %827 = arith.divf %825, %826 : vector<1x16xf32>
    %828 = vector.broadcast %827 : vector<1x16xf32> to vector<2x16xf32>
    %829 = arith.subf %822, %828 : vector<2x16xf32>
    %830 = vector.extract_strided_slice %3 {offsets = [0, 0], sizes = [16, 32], strides = [1, 1]} : vector<64x32xf32> to vector<16x32xf32>
    %cst_229 = arith.constant dense<0.000000e+00> : vector<2x32xf32>
    %831 = tpu.matmul %829, %830, %cst_229 {dimension_numbers = #tpu.dot_dimension_numbers<[1], [0], [0], [1], [0, 0, 1, 1], [], []>} : vector<2x16xf32>, vector<16x32xf32>, vector<2x32xf32> -> vector<2x32xf32>
    %832 = vector.extract_strided_slice %2 {offsets = [22, 0], sizes = [2, 32], strides = [1, 1]} : vector<32x128xf32> to vector<2x32xf32>
    %833 = arith.addf %831, %832 : vector<2x32xf32>
    %834 = vector.extract_strided_slice %833 {offsets = [0, 0], sizes = [2, 16], strides = [1, 1]} : vector<2x32xf32> to vector<2x16xf32>
    %cst_230 = arith.constant 0.000000e+00 : f32
    %cst_231 = arith.constant 6.000000e+00 : f32
    %835 = vector.broadcast %cst_230 : f32 to vector<2x16xf32>
    %836 = arith.maximumf %835, %834 : vector<2x16xf32>
    %837 = vector.broadcast %cst_231 : f32 to vector<2x16xf32>
    %838 = arith.minimumf %837, %836 : vector<2x16xf32>
    %839 = vector.extract_strided_slice %833 {offsets = [0, 16], sizes = [2, 16], strides = [1, 1]} : vector<2x32xf32> to vector<2x16xf32>
    %840 = math.tanh %839 : vector<2x16xf32>
    %841 = arith.mulf %838, %840 : vector<2x16xf32>
    %cst_232 = arith.constant dense<0.000000e+00> : vector<16xf32>
    %842 = vector.multi_reduction <add>, %841, %cst_232 [0] : vector<2x16xf32> to vector<16xf32>
    %843 = vector.shape_cast %842 : vector<16xf32> to vector<1x16xf32>
    %cst_233 = arith.constant 2.000000e+00 : f32
    %844 = vector.broadcast %cst_233 : f32 to vector<1x16xf32>
    %845 = arith.divf %843, %844 : vector<1x16xf32>
    %846 = vector.broadcast %845 : vector<1x16xf32> to vector<2x16xf32>
    %847 = arith.subf %841, %846 : vector<2x16xf32>
    %848 = vector.extract_strided_slice %3 {offsets = [16, 0], sizes = [16, 32], strides = [1, 1]} : vector<64x32xf32> to vector<16x32xf32>
    %cst_234 = arith.constant dense<0.000000e+00> : vector<2x32xf32>
    %849 = tpu.matmul %847, %848, %cst_234 {dimension_numbers = #tpu.dot_dimension_numbers<[1], [0], [0], [1], [0, 0, 1, 1], [], []>} : vector<2x16xf32>, vector<16x32xf32>, vector<2x32xf32> -> vector<2x32xf32>
    %850 = vector.extract_strided_slice %2 {offsets = [22, 32], sizes = [2, 32], strides = [1, 1]} : vector<32x128xf32> to vector<2x32xf32>
    %851 = arith.addf %849, %850 : vector<2x32xf32>
    %852 = vector.extract_strided_slice %851 {offsets = [0, 0], sizes = [2, 16], strides = [1, 1]} : vector<2x32xf32> to vector<2x16xf32>
    %cst_235 = arith.constant 0.000000e+00 : f32
    %cst_236 = arith.constant 6.000000e+00 : f32
    %853 = vector.broadcast %cst_235 : f32 to vector<2x16xf32>
    %854 = arith.maximumf %853, %852 : vector<2x16xf32>
    %855 = vector.broadcast %cst_236 : f32 to vector<2x16xf32>
    %856 = arith.minimumf %855, %854 : vector<2x16xf32>
    %857 = vector.extract_strided_slice %851 {offsets = [0, 16], sizes = [2, 16], strides = [1, 1]} : vector<2x32xf32> to vector<2x16xf32>
    %858 = math.tanh %857 : vector<2x16xf32>
    %859 = arith.mulf %856, %858 : vector<2x16xf32>
    %860 = arith.addf %785, %859 : vector<2x16xf32>
    %cst_237 = arith.constant dense<0.000000e+00> : vector<16xf32>
    %861 = vector.multi_reduction <add>, %860, %cst_237 [0] : vector<2x16xf32> to vector<16xf32>
    %862 = vector.shape_cast %861 : vector<16xf32> to vector<1x16xf32>
    %cst_238 = arith.constant 2.000000e+00 : f32
    %863 = vector.broadcast %cst_238 : f32 to vector<1x16xf32>
    %864 = arith.divf %862, %863 : vector<1x16xf32>
    %865 = vector.broadcast %864 : vector<1x16xf32> to vector<2x16xf32>
    %866 = arith.subf %860, %865 : vector<2x16xf32>
    %867 = vector.extract_strided_slice %3 {offsets = [32, 0], sizes = [16, 32], strides = [1, 1]} : vector<64x32xf32> to vector<16x32xf32>
    %cst_239 = arith.constant dense<0.000000e+00> : vector<2x32xf32>
    %868 = tpu.matmul %866, %867, %cst_239 {dimension_numbers = #tpu.dot_dimension_numbers<[1], [0], [0], [1], [0, 0, 1, 1], [], []>} : vector<2x16xf32>, vector<16x32xf32>, vector<2x32xf32> -> vector<2x32xf32>
    %869 = vector.extract_strided_slice %2 {offsets = [22, 64], sizes = [2, 32], strides = [1, 1]} : vector<32x128xf32> to vector<2x32xf32>
    %870 = arith.addf %868, %869 : vector<2x32xf32>
    %871 = vector.extract_strided_slice %870 {offsets = [0, 0], sizes = [2, 16], strides = [1, 1]} : vector<2x32xf32> to vector<2x16xf32>
    %cst_240 = arith.constant 0.000000e+00 : f32
    %cst_241 = arith.constant 6.000000e+00 : f32
    %872 = vector.broadcast %cst_240 : f32 to vector<2x16xf32>
    %873 = arith.maximumf %872, %871 : vector<2x16xf32>
    %874 = vector.broadcast %cst_241 : f32 to vector<2x16xf32>
    %875 = arith.minimumf %874, %873 : vector<2x16xf32>
    %876 = vector.extract_strided_slice %870 {offsets = [0, 16], sizes = [2, 16], strides = [1, 1]} : vector<2x32xf32> to vector<2x16xf32>
    %877 = math.tanh %876 : vector<2x16xf32>
    %878 = arith.mulf %875, %877 : vector<2x16xf32>
    %cst_242 = arith.constant dense<0.000000e+00> : vector<16xf32>
    %879 = vector.multi_reduction <add>, %878, %cst_242 [0] : vector<2x16xf32> to vector<16xf32>
    %880 = vector.shape_cast %879 : vector<16xf32> to vector<1x16xf32>
    %cst_243 = arith.constant 2.000000e+00 : f32
    %881 = vector.broadcast %cst_243 : f32 to vector<1x16xf32>
    %882 = arith.divf %880, %881 : vector<1x16xf32>
    %883 = vector.broadcast %882 : vector<1x16xf32> to vector<2x16xf32>
    %884 = arith.subf %878, %883 : vector<2x16xf32>
    %885 = vector.extract_strided_slice %3 {offsets = [48, 0], sizes = [16, 32], strides = [1, 1]} : vector<64x32xf32> to vector<16x32xf32>
    %cst_244 = arith.constant dense<0.000000e+00> : vector<2x32xf32>
    %886 = tpu.matmul %884, %885, %cst_244 {dimension_numbers = #tpu.dot_dimension_numbers<[1], [0], [0], [1], [0, 0, 1, 1], [], []>} : vector<2x16xf32>, vector<16x32xf32>, vector<2x32xf32> -> vector<2x32xf32>
    %887 = vector.extract_strided_slice %2 {offsets = [22, 96], sizes = [2, 32], strides = [1, 1]} : vector<32x128xf32> to vector<2x32xf32>
    %888 = arith.addf %886, %887 : vector<2x32xf32>
    %889 = vector.extract_strided_slice %888 {offsets = [0, 0], sizes = [2, 16], strides = [1, 1]} : vector<2x32xf32> to vector<2x16xf32>
    %cst_245 = arith.constant 0.000000e+00 : f32
    %cst_246 = arith.constant 6.000000e+00 : f32
    %890 = vector.broadcast %cst_245 : f32 to vector<2x16xf32>
    %891 = arith.maximumf %890, %889 : vector<2x16xf32>
    %892 = vector.broadcast %cst_246 : f32 to vector<2x16xf32>
    %893 = arith.minimumf %892, %891 : vector<2x16xf32>
    %894 = vector.extract_strided_slice %888 {offsets = [0, 16], sizes = [2, 16], strides = [1, 1]} : vector<2x32xf32> to vector<2x16xf32>
    %895 = math.tanh %894 : vector<2x16xf32>
    %896 = arith.mulf %893, %895 : vector<2x16xf32>
    %897 = arith.addf %822, %896 : vector<2x16xf32>
    %898 = tpu.concatenate %897, %860 in 1 : vector<2x16xf32>, vector<2x16xf32> -> vector<2x32xf32>
    %cst_247 = arith.constant dense<0.000000e+00> : vector<16xf32>
    %899 = vector.multi_reduction <add>, %897, %cst_247 [0] : vector<2x16xf32> to vector<16xf32>
    %900 = vector.shape_cast %899 : vector<16xf32> to vector<1x16xf32>
    %cst_248 = arith.constant 2.000000e+00 : f32
    %901 = vector.broadcast %cst_248 : f32 to vector<1x16xf32>
    %902 = arith.divf %900, %901 : vector<1x16xf32>
    %903 = vector.broadcast %902 : vector<1x16xf32> to vector<2x16xf32>
    %904 = arith.subf %897, %903 : vector<2x16xf32>
    %905 = vector.extract_strided_slice %3 {offsets = [0, 0], sizes = [16, 32], strides = [1, 1]} : vector<64x32xf32> to vector<16x32xf32>
    %cst_249 = arith.constant dense<0.000000e+00> : vector<2x32xf32>
    %906 = tpu.matmul %904, %905, %cst_249 {dimension_numbers = #tpu.dot_dimension_numbers<[1], [0], [0], [1], [0, 0, 1, 1], [], []>} : vector<2x16xf32>, vector<16x32xf32>, vector<2x32xf32> -> vector<2x32xf32>
    %907 = vector.extract_strided_slice %2 {offsets = [24, 0], sizes = [2, 32], strides = [1, 1]} : vector<32x128xf32> to vector<2x32xf32>
    %908 = arith.addf %906, %907 : vector<2x32xf32>
    %909 = vector.extract_strided_slice %908 {offsets = [0, 0], sizes = [2, 16], strides = [1, 1]} : vector<2x32xf32> to vector<2x16xf32>
    %cst_250 = arith.constant 0.000000e+00 : f32
    %cst_251 = arith.constant 6.000000e+00 : f32
    %910 = vector.broadcast %cst_250 : f32 to vector<2x16xf32>
    %911 = arith.maximumf %910, %909 : vector<2x16xf32>
    %912 = vector.broadcast %cst_251 : f32 to vector<2x16xf32>
    %913 = arith.minimumf %912, %911 : vector<2x16xf32>
    %914 = vector.extract_strided_slice %908 {offsets = [0, 16], sizes = [2, 16], strides = [1, 1]} : vector<2x32xf32> to vector<2x16xf32>
    %915 = math.tanh %914 : vector<2x16xf32>
    %916 = arith.mulf %913, %915 : vector<2x16xf32>
    %cst_252 = arith.constant dense<0.000000e+00> : vector<16xf32>
    %917 = vector.multi_reduction <add>, %916, %cst_252 [0] : vector<2x16xf32> to vector<16xf32>
    %918 = vector.shape_cast %917 : vector<16xf32> to vector<1x16xf32>
    %cst_253 = arith.constant 2.000000e+00 : f32
    %919 = vector.broadcast %cst_253 : f32 to vector<1x16xf32>
    %920 = arith.divf %918, %919 : vector<1x16xf32>
    %921 = vector.broadcast %920 : vector<1x16xf32> to vector<2x16xf32>
    %922 = arith.subf %916, %921 : vector<2x16xf32>
    %923 = vector.extract_strided_slice %3 {offsets = [16, 0], sizes = [16, 32], strides = [1, 1]} : vector<64x32xf32> to vector<16x32xf32>
    %cst_254 = arith.constant dense<0.000000e+00> : vector<2x32xf32>
    %924 = tpu.matmul %922, %923, %cst_254 {dimension_numbers = #tpu.dot_dimension_numbers<[1], [0], [0], [1], [0, 0, 1, 1], [], []>} : vector<2x16xf32>, vector<16x32xf32>, vector<2x32xf32> -> vector<2x32xf32>
    %925 = vector.extract_strided_slice %2 {offsets = [24, 32], sizes = [2, 32], strides = [1, 1]} : vector<32x128xf32> to vector<2x32xf32>
    %926 = arith.addf %924, %925 : vector<2x32xf32>
    %927 = vector.extract_strided_slice %926 {offsets = [0, 0], sizes = [2, 16], strides = [1, 1]} : vector<2x32xf32> to vector<2x16xf32>
    %cst_255 = arith.constant 0.000000e+00 : f32
    %cst_256 = arith.constant 6.000000e+00 : f32
    %928 = vector.broadcast %cst_255 : f32 to vector<2x16xf32>
    %929 = arith.maximumf %928, %927 : vector<2x16xf32>
    %930 = vector.broadcast %cst_256 : f32 to vector<2x16xf32>
    %931 = arith.minimumf %930, %929 : vector<2x16xf32>
    %932 = vector.extract_strided_slice %926 {offsets = [0, 16], sizes = [2, 16], strides = [1, 1]} : vector<2x32xf32> to vector<2x16xf32>
    %933 = math.tanh %932 : vector<2x16xf32>
    %934 = arith.mulf %931, %933 : vector<2x16xf32>
    %935 = arith.addf %860, %934 : vector<2x16xf32>
    %cst_257 = arith.constant dense<0.000000e+00> : vector<16xf32>
    %936 = vector.multi_reduction <add>, %935, %cst_257 [0] : vector<2x16xf32> to vector<16xf32>
    %937 = vector.shape_cast %936 : vector<16xf32> to vector<1x16xf32>
    %cst_258 = arith.constant 2.000000e+00 : f32
    %938 = vector.broadcast %cst_258 : f32 to vector<1x16xf32>
    %939 = arith.divf %937, %938 : vector<1x16xf32>
    %940 = vector.broadcast %939 : vector<1x16xf32> to vector<2x16xf32>
    %941 = arith.subf %935, %940 : vector<2x16xf32>
    %942 = vector.extract_strided_slice %3 {offsets = [32, 0], sizes = [16, 32], strides = [1, 1]} : vector<64x32xf32> to vector<16x32xf32>
    %cst_259 = arith.constant dense<0.000000e+00> : vector<2x32xf32>
    %943 = tpu.matmul %941, %942, %cst_259 {dimension_numbers = #tpu.dot_dimension_numbers<[1], [0], [0], [1], [0, 0, 1, 1], [], []>} : vector<2x16xf32>, vector<16x32xf32>, vector<2x32xf32> -> vector<2x32xf32>
    %944 = vector.extract_strided_slice %2 {offsets = [24, 64], sizes = [2, 32], strides = [1, 1]} : vector<32x128xf32> to vector<2x32xf32>
    %945 = arith.addf %943, %944 : vector<2x32xf32>
    %946 = vector.extract_strided_slice %945 {offsets = [0, 0], sizes = [2, 16], strides = [1, 1]} : vector<2x32xf32> to vector<2x16xf32>
    %cst_260 = arith.constant 0.000000e+00 : f32
    %cst_261 = arith.constant 6.000000e+00 : f32
    %947 = vector.broadcast %cst_260 : f32 to vector<2x16xf32>
    %948 = arith.maximumf %947, %946 : vector<2x16xf32>
    %949 = vector.broadcast %cst_261 : f32 to vector<2x16xf32>
    %950 = arith.minimumf %949, %948 : vector<2x16xf32>
    %951 = vector.extract_strided_slice %945 {offsets = [0, 16], sizes = [2, 16], strides = [1, 1]} : vector<2x32xf32> to vector<2x16xf32>
    %952 = math.tanh %951 : vector<2x16xf32>
    %953 = arith.mulf %950, %952 : vector<2x16xf32>
    %cst_262 = arith.constant dense<0.000000e+00> : vector<16xf32>
    %954 = vector.multi_reduction <add>, %953, %cst_262 [0] : vector<2x16xf32> to vector<16xf32>
    %955 = vector.shape_cast %954 : vector<16xf32> to vector<1x16xf32>
    %cst_263 = arith.constant 2.000000e+00 : f32
    %956 = vector.broadcast %cst_263 : f32 to vector<1x16xf32>
    %957 = arith.divf %955, %956 : vector<1x16xf32>
    %958 = vector.broadcast %957 : vector<1x16xf32> to vector<2x16xf32>
    %959 = arith.subf %953, %958 : vector<2x16xf32>
    %960 = vector.extract_strided_slice %3 {offsets = [48, 0], sizes = [16, 32], strides = [1, 1]} : vector<64x32xf32> to vector<16x32xf32>
    %cst_264 = arith.constant dense<0.000000e+00> : vector<2x32xf32>
    %961 = tpu.matmul %959, %960, %cst_264 {dimension_numbers = #tpu.dot_dimension_numbers<[1], [0], [0], [1], [0, 0, 1, 1], [], []>} : vector<2x16xf32>, vector<16x32xf32>, vector<2x32xf32> -> vector<2x32xf32>
    %962 = vector.extract_strided_slice %2 {offsets = [24, 96], sizes = [2, 32], strides = [1, 1]} : vector<32x128xf32> to vector<2x32xf32>
    %963 = arith.addf %961, %962 : vector<2x32xf32>
    %964 = vector.extract_strided_slice %963 {offsets = [0, 0], sizes = [2, 16], strides = [1, 1]} : vector<2x32xf32> to vector<2x16xf32>
    %cst_265 = arith.constant 0.000000e+00 : f32
    %cst_266 = arith.constant 6.000000e+00 : f32
    %965 = vector.broadcast %cst_265 : f32 to vector<2x16xf32>
    %966 = arith.maximumf %965, %964 : vector<2x16xf32>
    %967 = vector.broadcast %cst_266 : f32 to vector<2x16xf32>
    %968 = arith.minimumf %967, %966 : vector<2x16xf32>
    %969 = vector.extract_strided_slice %963 {offsets = [0, 16], sizes = [2, 16], strides = [1, 1]} : vector<2x32xf32> to vector<2x16xf32>
    %970 = math.tanh %969 : vector<2x16xf32>
    %971 = arith.mulf %968, %970 : vector<2x16xf32>
    %972 = arith.addf %897, %971 : vector<2x16xf32>
    %973 = tpu.concatenate %972, %935 in 1 : vector<2x16xf32>, vector<2x16xf32> -> vector<2x32xf32>
    %cst_267 = arith.constant dense<0.000000e+00> : vector<16xf32>
    %974 = vector.multi_reduction <add>, %972, %cst_267 [0] : vector<2x16xf32> to vector<16xf32>
    %975 = vector.shape_cast %974 : vector<16xf32> to vector<1x16xf32>
    %cst_268 = arith.constant 2.000000e+00 : f32
    %976 = vector.broadcast %cst_268 : f32 to vector<1x16xf32>
    %977 = arith.divf %975, %976 : vector<1x16xf32>
    %978 = vector.broadcast %977 : vector<1x16xf32> to vector<2x16xf32>
    %979 = arith.subf %972, %978 : vector<2x16xf32>
    %980 = vector.extract_strided_slice %3 {offsets = [0, 0], sizes = [16, 32], strides = [1, 1]} : vector<64x32xf32> to vector<16x32xf32>
    %cst_269 = arith.constant dense<0.000000e+00> : vector<2x32xf32>
    %981 = tpu.matmul %979, %980, %cst_269 {dimension_numbers = #tpu.dot_dimension_numbers<[1], [0], [0], [1], [0, 0, 1, 1], [], []>} : vector<2x16xf32>, vector<16x32xf32>, vector<2x32xf32> -> vector<2x32xf32>
    %982 = vector.extract_strided_slice %2 {offsets = [26, 0], sizes = [2, 32], strides = [1, 1]} : vector<32x128xf32> to vector<2x32xf32>
    %983 = arith.addf %981, %982 : vector<2x32xf32>
    %984 = vector.extract_strided_slice %983 {offsets = [0, 0], sizes = [2, 16], strides = [1, 1]} : vector<2x32xf32> to vector<2x16xf32>
    %cst_270 = arith.constant 0.000000e+00 : f32
    %cst_271 = arith.constant 6.000000e+00 : f32
    %985 = vector.broadcast %cst_270 : f32 to vector<2x16xf32>
    %986 = arith.maximumf %985, %984 : vector<2x16xf32>
    %987 = vector.broadcast %cst_271 : f32 to vector<2x16xf32>
    %988 = arith.minimumf %987, %986 : vector<2x16xf32>
    %989 = vector.extract_strided_slice %983 {offsets = [0, 16], sizes = [2, 16], strides = [1, 1]} : vector<2x32xf32> to vector<2x16xf32>
    %990 = math.tanh %989 : vector<2x16xf32>
    %991 = arith.mulf %988, %990 : vector<2x16xf32>
    %cst_272 = arith.constant dense<0.000000e+00> : vector<16xf32>
    %992 = vector.multi_reduction <add>, %991, %cst_272 [0] : vector<2x16xf32> to vector<16xf32>
    %993 = vector.shape_cast %992 : vector<16xf32> to vector<1x16xf32>
    %cst_273 = arith.constant 2.000000e+00 : f32
    %994 = vector.broadcast %cst_273 : f32 to vector<1x16xf32>
    %995 = arith.divf %993, %994 : vector<1x16xf32>
    %996 = vector.broadcast %995 : vector<1x16xf32> to vector<2x16xf32>
    %997 = arith.subf %991, %996 : vector<2x16xf32>
    %998 = vector.extract_strided_slice %3 {offsets = [16, 0], sizes = [16, 32], strides = [1, 1]} : vector<64x32xf32> to vector<16x32xf32>
    %cst_274 = arith.constant dense<0.000000e+00> : vector<2x32xf32>
    %999 = tpu.matmul %997, %998, %cst_274 {dimension_numbers = #tpu.dot_dimension_numbers<[1], [0], [0], [1], [0, 0, 1, 1], [], []>} : vector<2x16xf32>, vector<16x32xf32>, vector<2x32xf32> -> vector<2x32xf32>
    %1000 = vector.extract_strided_slice %2 {offsets = [26, 32], sizes = [2, 32], strides = [1, 1]} : vector<32x128xf32> to vector<2x32xf32>
    %1001 = arith.addf %999, %1000 : vector<2x32xf32>
    %1002 = vector.extract_strided_slice %1001 {offsets = [0, 0], sizes = [2, 16], strides = [1, 1]} : vector<2x32xf32> to vector<2x16xf32>
    %cst_275 = arith.constant 0.000000e+00 : f32
    %cst_276 = arith.constant 6.000000e+00 : f32
    %1003 = vector.broadcast %cst_275 : f32 to vector<2x16xf32>
    %1004 = arith.maximumf %1003, %1002 : vector<2x16xf32>
    %1005 = vector.broadcast %cst_276 : f32 to vector<2x16xf32>
    %1006 = arith.minimumf %1005, %1004 : vector<2x16xf32>
    %1007 = vector.extract_strided_slice %1001 {offsets = [0, 16], sizes = [2, 16], strides = [1, 1]} : vector<2x32xf32> to vector<2x16xf32>
    %1008 = math.tanh %1007 : vector<2x16xf32>
    %1009 = arith.mulf %1006, %1008 : vector<2x16xf32>
    %1010 = arith.addf %935, %1009 : vector<2x16xf32>
    %cst_277 = arith.constant dense<0.000000e+00> : vector<16xf32>
    %1011 = vector.multi_reduction <add>, %1010, %cst_277 [0] : vector<2x16xf32> to vector<16xf32>
    %1012 = vector.shape_cast %1011 : vector<16xf32> to vector<1x16xf32>
    %cst_278 = arith.constant 2.000000e+00 : f32
    %1013 = vector.broadcast %cst_278 : f32 to vector<1x16xf32>
    %1014 = arith.divf %1012, %1013 : vector<1x16xf32>
    %1015 = vector.broadcast %1014 : vector<1x16xf32> to vector<2x16xf32>
    %1016 = arith.subf %1010, %1015 : vector<2x16xf32>
    %1017 = vector.extract_strided_slice %3 {offsets = [32, 0], sizes = [16, 32], strides = [1, 1]} : vector<64x32xf32> to vector<16x32xf32>
    %cst_279 = arith.constant dense<0.000000e+00> : vector<2x32xf32>
    %1018 = tpu.matmul %1016, %1017, %cst_279 {dimension_numbers = #tpu.dot_dimension_numbers<[1], [0], [0], [1], [0, 0, 1, 1], [], []>} : vector<2x16xf32>, vector<16x32xf32>, vector<2x32xf32> -> vector<2x32xf32>
    %1019 = vector.extract_strided_slice %2 {offsets = [26, 64], sizes = [2, 32], strides = [1, 1]} : vector<32x128xf32> to vector<2x32xf32>
    %1020 = arith.addf %1018, %1019 : vector<2x32xf32>
    %1021 = vector.extract_strided_slice %1020 {offsets = [0, 0], sizes = [2, 16], strides = [1, 1]} : vector<2x32xf32> to vector<2x16xf32>
    %cst_280 = arith.constant 0.000000e+00 : f32
    %cst_281 = arith.constant 6.000000e+00 : f32
    %1022 = vector.broadcast %cst_280 : f32 to vector<2x16xf32>
    %1023 = arith.maximumf %1022, %1021 : vector<2x16xf32>
    %1024 = vector.broadcast %cst_281 : f32 to vector<2x16xf32>
    %1025 = arith.minimumf %1024, %1023 : vector<2x16xf32>
    %1026 = vector.extract_strided_slice %1020 {offsets = [0, 16], sizes = [2, 16], strides = [1, 1]} : vector<2x32xf32> to vector<2x16xf32>
    %1027 = math.tanh %1026 : vector<2x16xf32>
    %1028 = arith.mulf %1025, %1027 : vector<2x16xf32>
    %cst_282 = arith.constant dense<0.000000e+00> : vector<16xf32>
    %1029 = vector.multi_reduction <add>, %1028, %cst_282 [0] : vector<2x16xf32> to vector<16xf32>
    %1030 = vector.shape_cast %1029 : vector<16xf32> to vector<1x16xf32>
    %cst_283 = arith.constant 2.000000e+00 : f32
    %1031 = vector.broadcast %cst_283 : f32 to vector<1x16xf32>
    %1032 = arith.divf %1030, %1031 : vector<1x16xf32>
    %1033 = vector.broadcast %1032 : vector<1x16xf32> to vector<2x16xf32>
    %1034 = arith.subf %1028, %1033 : vector<2x16xf32>
    %1035 = vector.extract_strided_slice %3 {offsets = [48, 0], sizes = [16, 32], strides = [1, 1]} : vector<64x32xf32> to vector<16x32xf32>
    %cst_284 = arith.constant dense<0.000000e+00> : vector<2x32xf32>
    %1036 = tpu.matmul %1034, %1035, %cst_284 {dimension_numbers = #tpu.dot_dimension_numbers<[1], [0], [0], [1], [0, 0, 1, 1], [], []>} : vector<2x16xf32>, vector<16x32xf32>, vector<2x32xf32> -> vector<2x32xf32>
    %1037 = vector.extract_strided_slice %2 {offsets = [26, 96], sizes = [2, 32], strides = [1, 1]} : vector<32x128xf32> to vector<2x32xf32>
    %1038 = arith.addf %1036, %1037 : vector<2x32xf32>
    %1039 = vector.extract_strided_slice %1038 {offsets = [0, 0], sizes = [2, 16], strides = [1, 1]} : vector<2x32xf32> to vector<2x16xf32>
    %cst_285 = arith.constant 0.000000e+00 : f32
    %cst_286 = arith.constant 6.000000e+00 : f32
    %1040 = vector.broadcast %cst_285 : f32 to vector<2x16xf32>
    %1041 = arith.maximumf %1040, %1039 : vector<2x16xf32>
    %1042 = vector.broadcast %cst_286 : f32 to vector<2x16xf32>
    %1043 = arith.minimumf %1042, %1041 : vector<2x16xf32>
    %1044 = vector.extract_strided_slice %1038 {offsets = [0, 16], sizes = [2, 16], strides = [1, 1]} : vector<2x32xf32> to vector<2x16xf32>
    %1045 = math.tanh %1044 : vector<2x16xf32>
    %1046 = arith.mulf %1043, %1045 : vector<2x16xf32>
    %1047 = arith.addf %972, %1046 : vector<2x16xf32>
    %1048 = tpu.concatenate %1047, %1010 in 1 : vector<2x16xf32>, vector<2x16xf32> -> vector<2x32xf32>
    %cst_287 = arith.constant dense<0.000000e+00> : vector<16xf32>
    %1049 = vector.multi_reduction <add>, %1047, %cst_287 [0] : vector<2x16xf32> to vector<16xf32>
    %1050 = vector.shape_cast %1049 : vector<16xf32> to vector<1x16xf32>
    %cst_288 = arith.constant 2.000000e+00 : f32
    %1051 = vector.broadcast %cst_288 : f32 to vector<1x16xf32>
    %1052 = arith.divf %1050, %1051 : vector<1x16xf32>
    %1053 = vector.broadcast %1052 : vector<1x16xf32> to vector<2x16xf32>
    %1054 = arith.subf %1047, %1053 : vector<2x16xf32>
    %1055 = vector.extract_strided_slice %3 {offsets = [0, 0], sizes = [16, 32], strides = [1, 1]} : vector<64x32xf32> to vector<16x32xf32>
    %cst_289 = arith.constant dense<0.000000e+00> : vector<2x32xf32>
    %1056 = tpu.matmul %1054, %1055, %cst_289 {dimension_numbers = #tpu.dot_dimension_numbers<[1], [0], [0], [1], [0, 0, 1, 1], [], []>} : vector<2x16xf32>, vector<16x32xf32>, vector<2x32xf32> -> vector<2x32xf32>
    %1057 = vector.extract_strided_slice %2 {offsets = [28, 0], sizes = [2, 32], strides = [1, 1]} : vector<32x128xf32> to vector<2x32xf32>
    %1058 = arith.addf %1056, %1057 : vector<2x32xf32>
    %1059 = vector.extract_strided_slice %1058 {offsets = [0, 0], sizes = [2, 16], strides = [1, 1]} : vector<2x32xf32> to vector<2x16xf32>
    %cst_290 = arith.constant 0.000000e+00 : f32
    %cst_291 = arith.constant 6.000000e+00 : f32
    %1060 = vector.broadcast %cst_290 : f32 to vector<2x16xf32>
    %1061 = arith.maximumf %1060, %1059 : vector<2x16xf32>
    %1062 = vector.broadcast %cst_291 : f32 to vector<2x16xf32>
    %1063 = arith.minimumf %1062, %1061 : vector<2x16xf32>
    %1064 = vector.extract_strided_slice %1058 {offsets = [0, 16], sizes = [2, 16], strides = [1, 1]} : vector<2x32xf32> to vector<2x16xf32>
    %1065 = math.tanh %1064 : vector<2x16xf32>
    %1066 = arith.mulf %1063, %1065 : vector<2x16xf32>
    %cst_292 = arith.constant dense<0.000000e+00> : vector<16xf32>
    %1067 = vector.multi_reduction <add>, %1066, %cst_292 [0] : vector<2x16xf32> to vector<16xf32>
    %1068 = vector.shape_cast %1067 : vector<16xf32> to vector<1x16xf32>
    %cst_293 = arith.constant 2.000000e+00 : f32
    %1069 = vector.broadcast %cst_293 : f32 to vector<1x16xf32>
    %1070 = arith.divf %1068, %1069 : vector<1x16xf32>
    %1071 = vector.broadcast %1070 : vector<1x16xf32> to vector<2x16xf32>
    %1072 = arith.subf %1066, %1071 : vector<2x16xf32>
    %1073 = vector.extract_strided_slice %3 {offsets = [16, 0], sizes = [16, 32], strides = [1, 1]} : vector<64x32xf32> to vector<16x32xf32>
    %cst_294 = arith.constant dense<0.000000e+00> : vector<2x32xf32>
    %1074 = tpu.matmul %1072, %1073, %cst_294 {dimension_numbers = #tpu.dot_dimension_numbers<[1], [0], [0], [1], [0, 0, 1, 1], [], []>} : vector<2x16xf32>, vector<16x32xf32>, vector<2x32xf32> -> vector<2x32xf32>
    %1075 = vector.extract_strided_slice %2 {offsets = [28, 32], sizes = [2, 32], strides = [1, 1]} : vector<32x128xf32> to vector<2x32xf32>
    %1076 = arith.addf %1074, %1075 : vector<2x32xf32>
    %1077 = vector.extract_strided_slice %1076 {offsets = [0, 0], sizes = [2, 16], strides = [1, 1]} : vector<2x32xf32> to vector<2x16xf32>
    %cst_295 = arith.constant 0.000000e+00 : f32
    %cst_296 = arith.constant 6.000000e+00 : f32
    %1078 = vector.broadcast %cst_295 : f32 to vector<2x16xf32>
    %1079 = arith.maximumf %1078, %1077 : vector<2x16xf32>
    %1080 = vector.broadcast %cst_296 : f32 to vector<2x16xf32>
    %1081 = arith.minimumf %1080, %1079 : vector<2x16xf32>
    %1082 = vector.extract_strided_slice %1076 {offsets = [0, 16], sizes = [2, 16], strides = [1, 1]} : vector<2x32xf32> to vector<2x16xf32>
    %1083 = math.tanh %1082 : vector<2x16xf32>
    %1084 = arith.mulf %1081, %1083 : vector<2x16xf32>
    %1085 = arith.addf %1010, %1084 : vector<2x16xf32>
    %cst_297 = arith.constant dense<0.000000e+00> : vector<16xf32>
    %1086 = vector.multi_reduction <add>, %1085, %cst_297 [0] : vector<2x16xf32> to vector<16xf32>
    %1087 = vector.shape_cast %1086 : vector<16xf32> to vector<1x16xf32>
    %cst_298 = arith.constant 2.000000e+00 : f32
    %1088 = vector.broadcast %cst_298 : f32 to vector<1x16xf32>
    %1089 = arith.divf %1087, %1088 : vector<1x16xf32>
    %1090 = vector.broadcast %1089 : vector<1x16xf32> to vector<2x16xf32>
    %1091 = arith.subf %1085, %1090 : vector<2x16xf32>
    %1092 = vector.extract_strided_slice %3 {offsets = [32, 0], sizes = [16, 32], strides = [1, 1]} : vector<64x32xf32> to vector<16x32xf32>
    %cst_299 = arith.constant dense<0.000000e+00> : vector<2x32xf32>
    %1093 = tpu.matmul %1091, %1092, %cst_299 {dimension_numbers = #tpu.dot_dimension_numbers<[1], [0], [0], [1], [0, 0, 1, 1], [], []>} : vector<2x16xf32>, vector<16x32xf32>, vector<2x32xf32> -> vector<2x32xf32>
    %1094 = vector.extract_strided_slice %2 {offsets = [28, 64], sizes = [2, 32], strides = [1, 1]} : vector<32x128xf32> to vector<2x32xf32>
    %1095 = arith.addf %1093, %1094 : vector<2x32xf32>
    %1096 = vector.extract_strided_slice %1095 {offsets = [0, 0], sizes = [2, 16], strides = [1, 1]} : vector<2x32xf32> to vector<2x16xf32>
    %cst_300 = arith.constant 0.000000e+00 : f32
    %cst_301 = arith.constant 6.000000e+00 : f32
    %1097 = vector.broadcast %cst_300 : f32 to vector<2x16xf32>
    %1098 = arith.maximumf %1097, %1096 : vector<2x16xf32>
    %1099 = vector.broadcast %cst_301 : f32 to vector<2x16xf32>
    %1100 = arith.minimumf %1099, %1098 : vector<2x16xf32>
    %1101 = vector.extract_strided_slice %1095 {offsets = [0, 16], sizes = [2, 16], strides = [1, 1]} : vector<2x32xf32> to vector<2x16xf32>
    %1102 = math.tanh %1101 : vector<2x16xf32>
    %1103 = arith.mulf %1100, %1102 : vector<2x16xf32>
    %cst_302 = arith.constant dense<0.000000e+00> : vector<16xf32>
    %1104 = vector.multi_reduction <add>, %1103, %cst_302 [0] : vector<2x16xf32> to vector<16xf32>
    %1105 = vector.shape_cast %1104 : vector<16xf32> to vector<1x16xf32>
    %cst_303 = arith.constant 2.000000e+00 : f32
    %1106 = vector.broadcast %cst_303 : f32 to vector<1x16xf32>
    %1107 = arith.divf %1105, %1106 : vector<1x16xf32>
    %1108 = vector.broadcast %1107 : vector<1x16xf32> to vector<2x16xf32>
    %1109 = arith.subf %1103, %1108 : vector<2x16xf32>
    %1110 = vector.extract_strided_slice %3 {offsets = [48, 0], sizes = [16, 32], strides = [1, 1]} : vector<64x32xf32> to vector<16x32xf32>
    %cst_304 = arith.constant dense<0.000000e+00> : vector<2x32xf32>
    %1111 = tpu.matmul %1109, %1110, %cst_304 {dimension_numbers = #tpu.dot_dimension_numbers<[1], [0], [0], [1], [0, 0, 1, 1], [], []>} : vector<2x16xf32>, vector<16x32xf32>, vector<2x32xf32> -> vector<2x32xf32>
    %1112 = vector.extract_strided_slice %2 {offsets = [28, 96], sizes = [2, 32], strides = [1, 1]} : vector<32x128xf32> to vector<2x32xf32>
    %1113 = arith.addf %1111, %1112 : vector<2x32xf32>
    %1114 = vector.extract_strided_slice %1113 {offsets = [0, 0], sizes = [2, 16], strides = [1, 1]} : vector<2x32xf32> to vector<2x16xf32>
    %cst_305 = arith.constant 0.000000e+00 : f32
    %cst_306 = arith.constant 6.000000e+00 : f32
    %1115 = vector.broadcast %cst_305 : f32 to vector<2x16xf32>
    %1116 = arith.maximumf %1115, %1114 : vector<2x16xf32>
    %1117 = vector.broadcast %cst_306 : f32 to vector<2x16xf32>
    %1118 = arith.minimumf %1117, %1116 : vector<2x16xf32>
    %1119 = vector.extract_strided_slice %1113 {offsets = [0, 16], sizes = [2, 16], strides = [1, 1]} : vector<2x32xf32> to vector<2x16xf32>
    %1120 = math.tanh %1119 : vector<2x16xf32>
    %1121 = arith.mulf %1118, %1120 : vector<2x16xf32>
    %1122 = arith.addf %1047, %1121 : vector<2x16xf32>
    %1123 = tpu.concatenate %1122, %1085 in 1 : vector<2x16xf32>, vector<2x16xf32> -> vector<2x32xf32>
    %cst_307 = arith.constant dense<0.000000e+00> : vector<16xf32>
    %1124 = vector.multi_reduction <add>, %1122, %cst_307 [0] : vector<2x16xf32> to vector<16xf32>
    %1125 = vector.shape_cast %1124 : vector<16xf32> to vector<1x16xf32>
    %cst_308 = arith.constant 2.000000e+00 : f32
    %1126 = vector.broadcast %cst_308 : f32 to vector<1x16xf32>
    %1127 = arith.divf %1125, %1126 : vector<1x16xf32>
    %1128 = vector.broadcast %1127 : vector<1x16xf32> to vector<2x16xf32>
    %1129 = arith.subf %1122, %1128 : vector<2x16xf32>
    %1130 = vector.extract_strided_slice %3 {offsets = [0, 0], sizes = [16, 32], strides = [1, 1]} : vector<64x32xf32> to vector<16x32xf32>
    %cst_309 = arith.constant dense<0.000000e+00> : vector<2x32xf32>
    %1131 = tpu.matmul %1129, %1130, %cst_309 {dimension_numbers = #tpu.dot_dimension_numbers<[1], [0], [0], [1], [0, 0, 1, 1], [], []>} : vector<2x16xf32>, vector<16x32xf32>, vector<2x32xf32> -> vector<2x32xf32>
    %1132 = vector.extract_strided_slice %2 {offsets = [30, 0], sizes = [2, 32], strides = [1, 1]} : vector<32x128xf32> to vector<2x32xf32>
    %1133 = arith.addf %1131, %1132 : vector<2x32xf32>
    %1134 = vector.extract_strided_slice %1133 {offsets = [0, 0], sizes = [2, 16], strides = [1, 1]} : vector<2x32xf32> to vector<2x16xf32>
    %cst_310 = arith.constant 0.000000e+00 : f32
    %cst_311 = arith.constant 6.000000e+00 : f32
    %1135 = vector.broadcast %cst_310 : f32 to vector<2x16xf32>
    %1136 = arith.maximumf %1135, %1134 : vector<2x16xf32>
    %1137 = vector.broadcast %cst_311 : f32 to vector<2x16xf32>
    %1138 = arith.minimumf %1137, %1136 : vector<2x16xf32>
    %1139 = vector.extract_strided_slice %1133 {offsets = [0, 16], sizes = [2, 16], strides = [1, 1]} : vector<2x32xf32> to vector<2x16xf32>
    %1140 = math.tanh %1139 : vector<2x16xf32>
    %1141 = arith.mulf %1138, %1140 : vector<2x16xf32>
    %cst_312 = arith.constant dense<0.000000e+00> : vector<16xf32>
    %1142 = vector.multi_reduction <add>, %1141, %cst_312 [0] : vector<2x16xf32> to vector<16xf32>
    %1143 = vector.shape_cast %1142 : vector<16xf32> to vector<1x16xf32>
    %cst_313 = arith.constant 2.000000e+00 : f32
    %1144 = vector.broadcast %cst_313 : f32 to vector<1x16xf32>
    %1145 = arith.divf %1143, %1144 : vector<1x16xf32>
    %1146 = vector.broadcast %1145 : vector<1x16xf32> to vector<2x16xf32>
    %1147 = arith.subf %1141, %1146 : vector<2x16xf32>
    %1148 = vector.extract_strided_slice %3 {offsets = [16, 0], sizes = [16, 32], strides = [1, 1]} : vector<64x32xf32> to vector<16x32xf32>
    %cst_314 = arith.constant dense<0.000000e+00> : vector<2x32xf32>
    %1149 = tpu.matmul %1147, %1148, %cst_314 {dimension_numbers = #tpu.dot_dimension_numbers<[1], [0], [0], [1], [0, 0, 1, 1], [], []>} : vector<2x16xf32>, vector<16x32xf32>, vector<2x32xf32> -> vector<2x32xf32>
    %1150 = vector.extract_strided_slice %2 {offsets = [30, 32], sizes = [2, 32], strides = [1, 1]} : vector<32x128xf32> to vector<2x32xf32>
    %1151 = arith.addf %1149, %1150 : vector<2x32xf32>
    %1152 = vector.extract_strided_slice %1151 {offsets = [0, 0], sizes = [2, 16], strides = [1, 1]} : vector<2x32xf32> to vector<2x16xf32>
    %cst_315 = arith.constant 0.000000e+00 : f32
    %cst_316 = arith.constant 6.000000e+00 : f32
    %1153 = vector.broadcast %cst_315 : f32 to vector<2x16xf32>
    %1154 = arith.maximumf %1153, %1152 : vector<2x16xf32>
    %1155 = vector.broadcast %cst_316 : f32 to vector<2x16xf32>
    %1156 = arith.minimumf %1155, %1154 : vector<2x16xf32>
    %1157 = vector.extract_strided_slice %1151 {offsets = [0, 16], sizes = [2, 16], strides = [1, 1]} : vector<2x32xf32> to vector<2x16xf32>
    %1158 = math.tanh %1157 : vector<2x16xf32>
    %1159 = arith.mulf %1156, %1158 : vector<2x16xf32>
    %1160 = arith.addf %1085, %1159 : vector<2x16xf32>
    %cst_317 = arith.constant dense<0.000000e+00> : vector<16xf32>
    %1161 = vector.multi_reduction <add>, %1160, %cst_317 [0] : vector<2x16xf32> to vector<16xf32>
    %1162 = vector.shape_cast %1161 : vector<16xf32> to vector<1x16xf32>
    %cst_318 = arith.constant 2.000000e+00 : f32
    %1163 = vector.broadcast %cst_318 : f32 to vector<1x16xf32>
    %1164 = arith.divf %1162, %1163 : vector<1x16xf32>
    %1165 = vector.broadcast %1164 : vector<1x16xf32> to vector<2x16xf32>
    %1166 = arith.subf %1160, %1165 : vector<2x16xf32>
    %1167 = vector.extract_strided_slice %3 {offsets = [32, 0], sizes = [16, 32], strides = [1, 1]} : vector<64x32xf32> to vector<16x32xf32>
    %cst_319 = arith.constant dense<0.000000e+00> : vector<2x32xf32>
    %1168 = tpu.matmul %1166, %1167, %cst_319 {dimension_numbers = #tpu.dot_dimension_numbers<[1], [0], [0], [1], [0, 0, 1, 1], [], []>} : vector<2x16xf32>, vector<16x32xf32>, vector<2x32xf32> -> vector<2x32xf32>
    %1169 = vector.extract_strided_slice %2 {offsets = [30, 64], sizes = [2, 32], strides = [1, 1]} : vector<32x128xf32> to vector<2x32xf32>
    %1170 = arith.addf %1168, %1169 : vector<2x32xf32>
    %1171 = vector.extract_strided_slice %1170 {offsets = [0, 0], sizes = [2, 16], strides = [1, 1]} : vector<2x32xf32> to vector<2x16xf32>
    %cst_320 = arith.constant 0.000000e+00 : f32
    %cst_321 = arith.constant 6.000000e+00 : f32
    %1172 = vector.broadcast %cst_320 : f32 to vector<2x16xf32>
    %1173 = arith.maximumf %1172, %1171 : vector<2x16xf32>
    %1174 = vector.broadcast %cst_321 : f32 to vector<2x16xf32>
    %1175 = arith.minimumf %1174, %1173 : vector<2x16xf32>
    %1176 = vector.extract_strided_slice %1170 {offsets = [0, 16], sizes = [2, 16], strides = [1, 1]} : vector<2x32xf32> to vector<2x16xf32>
    %1177 = math.tanh %1176 : vector<2x16xf32>
    %1178 = arith.mulf %1175, %1177 : vector<2x16xf32>
    %cst_322 = arith.constant dense<0.000000e+00> : vector<16xf32>
    %1179 = vector.multi_reduction <add>, %1178, %cst_322 [0] : vector<2x16xf32> to vector<16xf32>
    %1180 = vector.shape_cast %1179 : vector<16xf32> to vector<1x16xf32>
    %cst_323 = arith.constant 2.000000e+00 : f32
    %1181 = vector.broadcast %cst_323 : f32 to vector<1x16xf32>
    %1182 = arith.divf %1180, %1181 : vector<1x16xf32>
    %1183 = vector.broadcast %1182 : vector<1x16xf32> to vector<2x16xf32>
    %1184 = arith.subf %1178, %1183 : vector<2x16xf32>
    %1185 = vector.extract_strided_slice %3 {offsets = [48, 0], sizes = [16, 32], strides = [1, 1]} : vector<64x32xf32> to vector<16x32xf32>
    %cst_324 = arith.constant dense<0.000000e+00> : vector<2x32xf32>
    %1186 = tpu.matmul %1184, %1185, %cst_324 {dimension_numbers = #tpu.dot_dimension_numbers<[1], [0], [0], [1], [0, 0, 1, 1], [], []>} : vector<2x16xf32>, vector<16x32xf32>, vector<2x32xf32> -> vector<2x32xf32>
    %1187 = vector.extract_strided_slice %2 {offsets = [30, 96], sizes = [2, 32], strides = [1, 1]} : vector<32x128xf32> to vector<2x32xf32>
    %1188 = arith.addf %1186, %1187 : vector<2x32xf32>
    %1189 = vector.extract_strided_slice %1188 {offsets = [0, 0], sizes = [2, 16], strides = [1, 1]} : vector<2x32xf32> to vector<2x16xf32>
    %cst_325 = arith.constant 0.000000e+00 : f32
    %cst_326 = arith.constant 6.000000e+00 : f32
    %1190 = vector.broadcast %cst_325 : f32 to vector<2x16xf32>
    %1191 = arith.maximumf %1190, %1189 : vector<2x16xf32>
    %1192 = vector.broadcast %cst_326 : f32 to vector<2x16xf32>
    %1193 = arith.minimumf %1192, %1191 : vector<2x16xf32>
    %1194 = vector.extract_strided_slice %1188 {offsets = [0, 16], sizes = [2, 16], strides = [1, 1]} : vector<2x32xf32> to vector<2x16xf32>
    %1195 = math.tanh %1194 : vector<2x16xf32>
    %1196 = arith.mulf %1193, %1195 : vector<2x16xf32>
    %1197 = arith.addf %1122, %1196 : vector<2x16xf32>
    %1198 = tpu.concatenate %1197, %1160 in 1 : vector<2x16xf32>, vector<2x16xf32> -> vector<2x32xf32>
    %1199 = tpu.concatenate %673, %748, %823, %898, %973, %1048, %1123, %1198 in 0 : vector<2x32xf32>, vector<2x32xf32>, vector<2x32xf32>, vector<2x32xf32>, vector<2x32xf32>, vector<2x32xf32>, vector<2x32xf32>, vector<2x32xf32> -> vector<16x32xf32>
    %c0_327 = arith.constant 0 : index
    %c0_328 = arith.constant 0 : index
    %1200 = vector.load %arg5[%c0_327, %c0_328] : memref<32x8xf32, #tpu.memory_space<vmem>>, vector<32x8xf32>
    %cst_329 = arith.constant dense<0.000000e+00> : vector<16x8xf32>
    %1201 = tpu.matmul %1199, %1200, %cst_329 {dimension_numbers = #tpu.dot_dimension_numbers<[1], [0], [0], [1], [0, 0, 1, 1], [], []>} : vector<16x32xf32>, vector<32x8xf32>, vector<16x8xf32> -> vector<16x8xf32>
    %c0_330 = arith.constant 0 : index
    %c0_331 = arith.constant 0 : index
    %1202 = vector.load %arg6[%c0_330, %c0_331] : memref<16x8xf32, #tpu.memory_space<vmem>>, vector<16x8xf32>
    tpu.vector_store %arg6[%c0_330, %c0_331], %1201 {strides = array<i32>} : memref<16x8xf32, #tpu.memory_space<vmem>>, vector<16x8xf32>,
    return
  }
  func.func @transform_0(%arg0: i32) -> (i32, i32) {
    %c0_i32 = arith.constant 0 : i32
    %c0_i32_0 = arith.constant 0 : i32
    %c0_i32_1 = arith.constant 0 : i32
    return %c0_i32, %c0_i32_0 : i32, i32
  }
  func.func @transform_1(%arg0: i32) -> (i32, i32) {
    %c0_i32 = arith.constant 0 : i32
    %c0_i32_0 = arith.constant 0 : i32
    %c0_i32_1 = arith.constant 0 : i32
    return %c0_i32, %c0_i32_0 : i32, i32
  }
  func.func @transform_2(%arg0: i32) -> (i32, i32) {
    %c0_i32 = arith.constant 0 : i32
    %c0_i32_0 = arith.constant 0 : i32
    %c0_i32_1 = arith.constant 0 : i32
    return %c0_i32, %c0_i32_0 : i32, i32
  }
  func.func @transform_3(%arg0: i32) -> (i32, i32) {
    %c0_i32 = arith.constant 0 : i32
    %c0_i32_0 = arith.constant 0 : i32
    %c0_i32_1 = arith.constant 0 : i32
    return %c0_i32, %c0_i32_0 : i32, i32
  }
  func.func @transform_4(%arg0: i32) -> (i32, i32) {
    %c0_i32 = arith.constant 0 : i32
    %c0_i32_0 = arith.constant 0 : i32
    %c0_i32_1 = arith.constant 0 : i32
    return %c0_i32, %c0_i32_0 : i32, i32
  }
  func.func @transform_5(%arg0: i32) -> (i32, i32) {
    %c0_i32 = arith.constant 0 : i32
    %c0_i32_0 = arith.constant 0 : i32
    %c0_i32_1 = arith.constant 0 : i32
    return %c0_i32, %c0_i32_0 : i32, i32
  }
}

</mosaic_0001>

<bundles_post_ra>
// kernel: tpu_custom_call.1
= control target key start
LH: loop header
LB: loop body
LE: loop exit
PB: predicated region body
PF: predicated region fallthrough
CT: control target
= control target key end

     0   :  { %vm38_vm0 = vcmask 1045504   ;;  %vm25_vm1 = vcmask 48128   ;;  %vm136_vm2 = vcmask 123904   ;;  %v7229_v8 = vmov 0.0   ;;  %s7232_s9 = smov 96   ;;  %s7233_s12 = smov 16   ;;  %s8341_s3 = inlined_call_operand.vmem [shape: f32[6,128], index: 3, kind: input, shape index: {}]   ;;  %s8342_s0 = inlined_call_operand.vmem [shape: f32[32,6], index: 0, kind: input, shape index: {}]   ;;  %s8343_s2 = inlined_call_operand.vmem [shape: f32[64,32], index: 2, kind: input, shape index: {}]   ;;  %s8344_s1 = inlined_call_operand.vmem [shape: f32[2,32], index: 1, kind: input, shape index: {}]   ;;  %s8345_s4 = inlined_call_operand.vmem [shape: f32[32,8], index: 4, kind: input, shape index: {}]   ;;  %s8346_s5 = inlined_call_operand.vmem [shape: f32[16,8], index: 5, kind: output, shape index: {}]  }
   0x1   :  { %v24_v0 = vld [vmem:[%s8341_s3] sm:$0x3f]  ;;  %v22_v1 = vld [vmem:[%s8342_s0 + $0x10] sm:$0xff]  ;;  %v23_v2 = vld [vmem:[%s8342_s0 + $0x18] sm:$0xff]  ;;  %vm7230_vm3 = vmmov 0   ;;  %vm147_vm4 = vcmask 130048  }
   0x2   :  { %7068 = vmatprep.subr.msk.mxu1 %vm38_vm0, %v24_v0  ;;  %6606 = vmatprep.mubr.msk.f32.mxu1 %vm25_vm1, %v22_v1  ;;  %v20_v3 = vld [vmem:[%s8342_s0] sm:$0xff]  ;;  %v21_v4 = vld [vmem:[%s8342_s0 + $0x8] sm:$0xff]  ;;  %v7333_v26 = vld [vmem:[%s8343_s2 + $0x18] sm:$0xff]  ;;  %s7234_s13 = smov 64   ;;  %s7235_s18 = smov 32   ;;  %vm328_vm5 = vcmask 255104  }
   0x3   :  { %7069 = vmatpush3.msk.msra.mxu1 %vm38_vm0, %v24_v0  ;;  %6601 = vmatprep.subr.msk.mxu0 %vm38_vm0, %v24_v0  ;;  %v7288_v5 = vld [vmem:[%s8343_s2 + $0x8] sm:$0xff]  ;;  %v7293_v6 = vld [vmem:[%s8344_s1] sm:$0x3]  ;;  %s7231_s1 = smov 112   ;;  %v7342_v27 = vld [vmem:[%s8343_s2 + $0x10] sm:$0xff]  ;;  %vm6226_vm6 = vcmask 1041408  }
   0x4   :  { %6607 = vmatmul.mubr.msk.f32.vlgmr.msra.gmra.mxu1 %vm25_vm1, %v23_v2  ;;  %6602 = vmatpush3.msk.msra.mxu0 %vm38_vm0, %v24_v0  ;;  %v137_v7 = vsel %vm136_vm2, %v7293_v6, 0.0  ;;  %v7304_v9 = vld [vmem:[%s8343_s2] sm:$0xff]  ;;  %v7357_v50 = vld [vmem:[%s8343_s2 + $0x28] sm:$0xff]  ;;  %vm6228_vm7 = vcmask 1043456   ;;  %vm6238_vm8 = vcmask 261120   ;;  %vm6320_vm9 = vcmask 64512  }
   0x5   :  { %6603 = vmatprep.mubr.msk.f32.mxu0 %vm25_vm1, %v20_v3  ;;  %6609 = vmatprep.subr.mxu1 %v7229_v8  ;;  %v138_v10 = vrot.slane %v137_v7, 4  ;;  %v7362_v51 = vld [vmem:[%s8343_s2 + $0x20] sm:$0xff] }
   0x6   :  { %6604 = vmatmul.mubr.msk.f32.vlgmr.msra.gmra.mxu0 %vm25_vm1, %v21_v4  ;;  %6610 = vmatpush3.msra.mxu1 %v7288_v5 }
   0x7   :  { %6611 = vmatprep.subr.mxu1 %v7229_v8  ;;  %6613 = vmatprep.mubr.msk.f32.mxu1 %vm7230_vm3, %v7229_v8  ;;  %v139_v11 = vadd.f32 %v138_v10, %v137_v7  ;;  %v7388_v7 = vld [vmem:[%s8343_s2 + $0x38] sm:$0xff]  ;;  %v7395_v10 = vld [vmem:[%s8343_s2 + $0x30] sm:$0xff] }
   0x8   :  { %6612 = vmatpush3.msra.mxu1 %v7304_v9  ;;  %6623 = vmatprep.subr.mxu0 %v7229_v8 }
   0x9   :  { %v140_v12 = vrot.slane %v139_v11, 2  ;;  %6616 = vmatprep.subr.mxu1 %v7229_v8  ;;  %6627 = vmatprep.mubr.msk.f32.mxu0 %vm7230_vm3, %v7229_v8 }
   0xa   :  { %6624 = vmatpush3.msra.mxu0 %v7357_v50 }
   0xb   :  { %v141_v13 = vadd.f32 %v140_v12, %v139_v11  ;;  %6625 = vmatprep.subr.mxu0 %v7229_v8 }
   0xc   :  { %6626 = vmatpush3.msra.mxu0 %v7362_v51 }
   0xd   :  { %v142_v14 = vrot.slane %v141_v13, 1  ;;  %6637 = vmatprep.subr.mxu0 %v7229_v8 }
   0xf   :  { %v143_v15 = vadd.f32 %v142_v14, %v141_v13 }
  0x11   :  { %v145_v16 = vmul.f32 0.5, %v143_v15 }
  0x13   :  { %v146_v17 = vsub.f32 %v7293_v6, %v145_v16 }
  0x15   :  { %6614 = vmatmul.mubr.msk.f32.vlgmr.msra.gmra.mxu1 %vm147_vm4, %v146_v17 }
  0x16   :  { %6620 = vmatprep.mubr.msk.f32.mxu1 %vm7230_vm3, %v7229_v8  ;;  %6617 = vmatpush3.msra.mxu1 %v7333_v26 }
  0x17   :  { %6618 = vmatprep.subr.mxu1 %v7229_v8 }
  0x18   :  { %6619 = vmatpush3.msra.mxu1 %v7342_v27 }
  0x19   :  { %6630 = vmatprep.subr.mxu1 %v7229_v8 }
  0xc4   :  { %v7320_v18 = vpop.f32.mrf.mxu1 }
  0xc6   :  { %v7322_v19 = vpop.f32.mrf.mxu0  ;;  %v7324_v20 = vpop.f32.mrf.mxu1 }
  0xc8   :  { %v7326_v21 = vpop.f32.mrf.mxu0 }
  0xd5   :  { %v217_v22 = vpop.f32.mrf.mxu1 }
  0xd6   :  { %v218_v23 = vadd.f32 %v217_v22, %v7326_v21 }
  0xd7   :  { %v6615_v24 = vpop.f32.mrf.mxu1 }
  0xd8   :  { %7077 = vtanh.f32 %v218_v23  ;;  %v221_v28 = vmax.f32 %v218_v23, 0.0 }
  0xda   :  { %v222_v29 = vmin.f32 %v221_v28, 6.0 }
  0xe5   :  { %v7078_v25 = vpop.eup %7077 }
  0xe6   :  { %225 = vrot.lane.b32.xlu0 %v7078_v25, %s7231_s1 }
  0xea   :  { %239 = vrot.lane.b32.xlu0 %v7326_v21, %s7232_s9 }
 0x158   :  { %v226_v30 = vpop.permute.xlu0 %225 }
 0x159   :  { %v228_v31 = vmul.f32 %v226_v30, %v222_v29 }
 0x15b   :  { %v229_v32 = vsel %vm136_vm2, %v228_v31, 0.0 }
 0x15c   :  { %v230_v33 = vrot.slane %v229_v32, 4  ;;  %v240_v41 = vpop.permute.xlu0 %239 }
 0x15e   :  { %v231_v34 = vadd.f32 %v230_v33, %v229_v32 }
 0x160   :  { %v232_v35 = vrot.slane %v231_v34, 2 }
 0x162   :  { %v233_v36 = vadd.f32 %v232_v35, %v231_v34  ;;  %v527_v35 = vrot.slane %v7326_v21, 2 }
 0x164   :  { %v234_v37 = vrot.slane %v233_v36, 1 }
 0x166   :  { %v235_v38 = vadd.f32 %v234_v37, %v233_v36 }
 0x168   :  { %v236_v39 = vmul.f32 0.5, %v235_v38 }
 0x16a   :  { %v237_v40 = vsub.f32 %v228_v31, %v236_v39 }
 0x16c   :  { %6621 = vmatmul.mubr.msk.f32.vlgmr.msra.gmra.mxu1 %vm147_vm4, %v237_v40 }
 0x16d   :  { %6634 = vmatprep.mubr.msk.f32.mxu1 %vm7230_vm3, %v7229_v8  ;;  %6631 = vmatpush3.msra.mxu1 %v7388_v7 }
 0x16e   :  { %6632 = vmatprep.subr.mxu1 %v7229_v8 }
 0x16f   :  { %6633 = vmatpush3.msra.mxu1 %v7395_v10 }
 0x170   :  { %6644 = vmatprep.subr.mxu1 %v7229_v8 }
 0x22c   :  { %v311_v42 = vpop.f32.mrf.mxu1 }
 0x22d   :  { %v312_v43 = vadd.f32 %v311_v42, %v240_v41 }
 0x22e   :  { %v6622_v44 = vpop.f32.mrf.mxu1 }
 0x22f   :  { %7079 = vtanh.f32 %v312_v43  ;;  %v315_v46 = vmax.f32 %v312_v43, 0.0 }
 0x231   :  { %v316_v47 = vmin.f32 %v315_v46, 6.0 }
 0x23c   :  { %v7080_v45 = vpop.eup %7079 }
 0x23d   :  { %319 = vrot.lane.b32.xlu1 %v7080_v45, %s7231_s1 }
 0x2af   :  { %v320_v48 = vpop.permute.xlu1 %319 }
 0x2b0   :  { %v322_v49 = vmul.f32 %v320_v48, %v316_v47 }
 0x2b2   :  { %324 = vrot.lane.b32.xlu1 %v322_v49, %s7233_s12 }
 0x2b6   :  { %341 = vrot.lane.b32.xlu1 %v7326_v21, %s7234_s13 }
 0x2ba   :  { %433 = vrot.lane.b32.xlu1 %v7326_v21, %s7235_s18 }
 0x324   :  { %v325_v52 = vpop.permute.xlu1 %324 }
 0x325   :  { %v7371_v53 = vadd.f32 %v325_v52, %v7293_v6 }
 0x327   :  { %v329_v54 = vsel %vm328_vm5, %v7371_v53, 0.0 }
 0x328   :  { %v330_v55 = vrot.slane %v329_v54, 4  ;;  %v342_v0 = vpop.permute.xlu1 %341 }
 0x32a   :  { %v331_v56 = vadd.f32 %v330_v55, %v329_v54 }
 0x32c   :  { %v332_v57 = vrot.slane %v331_v56, 2  ;;  %v434_v30 = vpop.permute.xlu1 %433 }
 0x32e   :  { %v333_v58 = vadd.f32 %v332_v57, %v331_v56 }
 0x330   :  { %v334_v59 = vrot.slane %v333_v58, 1 }
 0x332   :  { %v335_v60 = vadd.f32 %v334_v59, %v333_v58 }
 0x334   :  { %v336_v61 = vmul.f32 0.5, %v335_v60 }
 0x336   :  { %v337_v62 = vsub.f32 %v7371_v53, %v336_v61 }
 0x338   :  { %339 = vrot.lane.b32.xlu0 %v337_v62, %s7231_s1 }
 0x3aa   :  { %v340_v63 = vpop.permute.xlu0 %339 }
 0x3ab   :  { %6628 = vmatmul.mubr.msk.f32.vlgmr.msra.gmra.mxu0 %vm147_vm4, %v340_v63 }
 0x3ac   :  { %6638 = vmatpush3.msra.mxu0 %v7288_v5  ;;  %6641 = vmatprep.mubr.msk.f32.mxu0 %vm7230_vm3, %v7229_v8 }
 0x3ad   :  { %6639 = vmatprep.subr.mxu0 %v7229_v8 }
 0x3ae   :  { %6640 = vmatpush3.msra.mxu0 %v7304_v9 }
 0x3af   :  { %6651 = vmatprep.subr.mxu0 %v7229_v8 }
 0x46b   :  { %v412_v1 = vpop.f32.mrf.mxu0 }
 0x46c   :  { %v413_v2 = vadd.f32 %v412_v1, %v342_v0 }
 0x46d   :  { %v6629_v3 = vpop.f32.mrf.mxu0 }
 0x46e   :  { %7081 = vtanh.f32 %v413_v2  ;;  %v416_v11 = vmax.f32 %v413_v2, 0.0 }
 0x470   :  { %v417_v12 = vmin.f32 %v416_v11, 6.0 }
 0x47b   :  { %v7082_v4 = vpop.eup %7081 }
 0x47c   :  { %420 = vrot.lane.b32.xlu0 %v7082_v4, %s7231_s1 }
 0x4ee   :  { %v421_v13 = vpop.permute.xlu0 %420 }
 0x4ef   :  { %v423_v14 = vmul.f32 %v421_v13, %v417_v12 }
 0x4f1   :  { %v424_v15 = vsel %vm136_vm2, %v423_v14, 0.0 }
 0x4f2   :  { %v425_v16 = vrot.slane %v424_v15, 4 }
 0x4f4   :  { %v426_v17 = vadd.f32 %v425_v16, %v424_v15 }
 0x4f6   :  { %v427_v22 = vrot.slane %v426_v17, 2 }
 0x4f8   :  { %v428_v23 = vadd.f32 %v427_v22, %v426_v17 }
 0x4fa   :  { %v429_v24 = vrot.slane %v428_v23, 1 }
 0x4fc   :  { %v430_v25 = vadd.f32 %v429_v24, %v428_v23 }
 0x4fe   :  { %v431_v28 = vmul.f32 0.5, %v430_v25 }
 0x500   :  { %v432_v29 = vsub.f32 %v423_v14, %v431_v28 }
 0x502   :  { %6635 = vmatmul.mubr.msk.f32.vlgmr.msra.gmra.mxu1 %vm147_vm4, %v432_v29 }
 0x503   :  { %6645 = vmatpush3.msra.mxu1 %v7333_v26  ;;  %6648 = vmatprep.mubr.msk.f32.mxu1 %vm7230_vm3, %v7229_v8 }
 0x504   :  { %6646 = vmatprep.subr.mxu1 %v7229_v8 }
 0x505   :  { %6647 = vmatpush3.msra.mxu1 %v7342_v27 }
 0x506   :  { %6658 = vmatprep.subr.mxu1 %v7229_v8 }
 0x5c2   :  { %v505_v31 = vpop.f32.mrf.mxu1 }
 0x5c3   :  { %v506_v32 = vadd.f32 %v505_v31, %v434_v30 }
 0x5c4   :  { %v6636_v33 = vpop.f32.mrf.mxu1 }
 0x5c5   :  { %7083 = vtanh.f32 %v506_v32  ;;  %v509_v36 = vmax.f32 %v506_v32, 0.0 }
 0x5c7   :  { %v510_v37 = vmin.f32 %v509_v36, 6.0 }
 0x5d2   :  { %v7084_v34 = vpop.eup %7083 }
 0x5d3   :  { %513 = vrot.lane.b32.xlu0 %v7084_v34, %s7231_s1 }
 0x5d7   :  { %619 = vrot.lane.b32.xlu0 %v527_v35, %s7232_s9 }
 0x645   :  { %v514_v38 = vpop.permute.xlu0 %513 }
 0x646   :  { %v516_v39 = vmul.f32 %v514_v38, %v510_v37 }
 0x648   :  { %v7411_v40 = vadd.f32 %v516_v39, %v7293_v6 }
 0x649   :  { %v620_v11 = vpop.permute.xlu0 %619 }
 0x64a   :  { %v518_v41 = vsel %vm136_vm2, %v7411_v40, 0.0 }
 0x64b   :  { %v519_v42 = vrot.slane %v518_v41, 4 }
 0x64d   :  { %v520_v43 = vadd.f32 %v519_v42, %v518_v41 }
 0x64f   :  { %v521_v44 = vrot.slane %v520_v43, 2 }
 0x651   :  { %v522_v45 = vadd.f32 %v521_v44, %v520_v43 }
 0x653   :  { %v523_v46 = vrot.slane %v522_v45, 1 }
 0x655   :  { %v524_v47 = vadd.f32 %v523_v46, %v522_v45 }
 0x657   :  { %v525_v48 = vmul.f32 0.5, %v524_v47 }
 0x659   :  { %v526_v49 = vsub.f32 %v7411_v40, %v525_v48 }
 0x65b   :  { %6642 = vmatmul.mubr.msk.f32.vlgmr.msra.gmra.mxu0 %vm147_vm4, %v526_v49 }
 0x65c   :  { %6652 = vmatpush3.msra.mxu0 %v7357_v50  ;;  %6655 = vmatprep.mubr.msk.f32.mxu0 %vm7230_vm3, %v7229_v8 }
 0x65d   :  { %6653 = vmatprep.subr.mxu0 %v7229_v8 }
 0x65e   :  { %6654 = vmatpush3.msra.mxu0 %v7362_v51 }
 0x65f   :  { %6665 = vmatprep.subr.mxu0 %v7229_v8 }
 0x71b   :  { %v598_v6 = vpop.f32.mrf.mxu0 }
 0x71c   :  { %v599_v52 = vadd.f32 %v598_v6, %v527_v35 }
 0x71d   :  { %v6643_v54 = vpop.f32.mrf.mxu0 }
 0x71e   :  { %7085 = vtanh.f32 %v599_v52  ;;  %v602_v56 = vmax.f32 %v599_v52, 0.0 }
 0x720   :  { %v603_v57 = vmin.f32 %v602_v56, 6.0 }
 0x72b   :  { %v7086_v55 = vpop.eup %7085 }
 0x72c   :  { %606 = vrot.lane.b32.xlu1 %v7086_v55, %s7231_s1 }
 0x79e   :  { %v607_v58 = vpop.permute.xlu1 %606 }
 0x79f   :  { %v609_v59 = vmul.f32 %v607_v58, %v603_v57 }
 0x7a1   :  { %v610_v60 = vsel %vm136_vm2, %v609_v59, 0.0 }
 0x7a2   :  { %v611_v61 = vrot.slane %v610_v60, 4 }
 0x7a4   :  { %v612_v62 = vadd.f32 %v611_v61, %v610_v60 }
 0x7a6   :  { %v613_v63 = vrot.slane %v612_v62, 2 }
 0x7a8   :  { %v614_v0 = vadd.f32 %v613_v63, %v612_v62  ;;  %v906_v63 = vrot.slane %v7326_v21, 4 }
 0x7aa   :  { %v615_v1 = vrot.slane %v614_v0, 1 }
 0x7ac   :  { %v616_v2 = vadd.f32 %v615_v1, %v614_v0 }
 0x7ae   :  { %v617_v3 = vmul.f32 0.5, %v616_v2 }
 0x7b0   :  { %v618_v4 = vsub.f32 %v609_v59, %v617_v3 }
 0x7b2   :  { %6649 = vmatmul.mubr.msk.f32.vlgmr.msra.gmra.mxu1 %vm147_vm4, %v618_v4 }
 0x7b3   :  { %6659 = vmatpush3.msra.mxu1 %v7388_v7  ;;  %6662 = vmatprep.mubr.msk.f32.mxu1 %vm7230_vm3, %v7229_v8 }
 0x7b4   :  { %6660 = vmatprep.subr.mxu1 %v7229_v8 }
 0x7b5   :  { %6661 = vmatpush3.msra.mxu1 %v7395_v10 }
 0x7b6   :  { %6672 = vmatprep.subr.mxu1 %v7229_v8 }
 0x872   :  { %v691_v12 = vpop.f32.mrf.mxu1 }
 0x873   :  { %v692_v13 = vadd.f32 %v691_v12, %v620_v11 }
 0x874   :  { %v6650_v14 = vpop.f32.mrf.mxu1 }
 0x875   :  { %7087 = vtanh.f32 %v692_v13  ;;  %v695_v16 = vmax.f32 %v692_v13, 0.0 }
 0x877   :  { %v696_v17 = vmin.f32 %v695_v16, 6.0 }
 0x882   :  { %v7088_v15 = vpop.eup %7087 }
 0x883   :  { %699 = vrot.lane.b32.xlu1 %v7088_v15, %s7231_s1 }
 0x8f5   :  { %v700_v22 = vpop.permute.xlu1 %699 }
 0x8f6   :  { %v702_v23 = vmul.f32 %v700_v22, %v696_v17 }
 0x8f8   :  { %704 = vrot.lane.b32.xlu0 %v702_v23, %s7233_s12 }
 0x8fc   :  { %720 = vrot.lane.b32.xlu0 %v527_v35, %s7234_s13 }
 0x900   :  { %812 = vrot.lane.b32.xlu0 %v527_v35, %s7235_s18 }
 0x96a   :  { %v705_v24 = vpop.permute.xlu0 %704 }
 0x96b   :  { %v7437_v25 = vadd.f32 %v705_v24, %v7371_v53 }
 0x96d   :  { %v708_v28 = vsel %vm328_vm5, %v7437_v25, 0.0 }
 0x96e   :  { %v709_v29 = vrot.slane %v708_v28, 4  ;;  %v721_v53 = vpop.permute.xlu0 %720 }
 0x970   :  { %v710_v30 = vadd.f32 %v709_v29, %v708_v28 }
 0x972   :  { %v711_v31 = vrot.slane %v710_v30, 2  ;;  %v813_v58 = vpop.permute.xlu0 %812 }
 0x974   :  { %v712_v32 = vadd.f32 %v711_v31, %v710_v30 }
 0x976   :  { %v713_v33 = vrot.slane %v712_v32, 1 }
 0x978   :  { %v714_v34 = vadd.f32 %v713_v33, %v712_v32 }
 0x97a   :  { %v715_v36 = vmul.f32 0.5, %v714_v34 }
 0x97c   :  { %v716_v37 = vsub.f32 %v7437_v25, %v715_v36 }
 0x97e   :  { %718 = vrot.lane.b32.xlu1 %v716_v37, %s7231_s1 }
 0x9f0   :  { %v719_v38 = vpop.permute.xlu1 %718 }
 0x9f1   :  { %6656 = vmatmul.mubr.msk.f32.vlgmr.msra.gmra.mxu0 %vm147_vm4, %v719_v38 }
 0x9f2   :  { %6666 = vmatpush3.msra.mxu0 %v7288_v5  ;;  %6669 = vmatprep.mubr.msk.f32.mxu0 %vm7230_vm3, %v7229_v8 }
 0x9f3   :  { %6667 = vmatprep.subr.mxu0 %v7229_v8 }
 0x9f4   :  { %6668 = vmatpush3.msra.mxu0 %v7304_v9 }
 0x9f5   :  { %6679 = vmatprep.subr.mxu0 %v7229_v8 }
 0xab1   :  { %v791_v35 = vpop.f32.mrf.mxu0 }
 0xab2   :  { %v792_v39 = vadd.f32 %v791_v35, %v721_v53 }
 0xab3   :  { %v6657_v41 = vpop.f32.mrf.mxu0 }
 0xab4   :  { %7089 = vtanh.f32 %v792_v39  ;;  %v795_v43 = vmax.f32 %v792_v39, 0.0 }
 0xab6   :  { %v796_v44 = vmin.f32 %v795_v43, 6.0 }
 0xac1   :  { %v7090_v42 = vpop.eup %7089 }
 0xac2   :  { %799 = vrot.lane.b32.xlu1 %v7090_v42, %s7231_s1 }
 0xb34   :  { %v800_v45 = vpop.permute.xlu1 %799 }
 0xb35   :  { %v802_v46 = vmul.f32 %v800_v45, %v796_v44 }
 0xb37   :  { %v803_v47 = vsel %vm136_vm2, %v802_v46, 0.0 }
 0xb38   :  { %v804_v48 = vrot.slane %v803_v47, 4 }
 0xb3a   :  { %v805_v49 = vadd.f32 %v804_v48, %v803_v47 }
 0xb3c   :  { %v806_v6 = vrot.slane %v805_v49, 2 }
 0xb3e   :  { %v807_v52 = vadd.f32 %v806_v6, %v805_v49 }
 0xb40   :  { %v808_v54 = vrot.slane %v807_v52, 1 }
 0xb42   :  { %v809_v55 = vadd.f32 %v808_v54, %v807_v52 }
 0xb44   :  { %v810_v56 = vmul.f32 0.5, %v809_v55 }
 0xb46   :  { %v811_v57 = vsub.f32 %v802_v46, %v810_v56 }
 0xb48   :  { %6663 = vmatmul.mubr.msk.f32.vlgmr.msra.gmra.mxu1 %vm147_vm4, %v811_v57 }
 0xb49   :  { %6673 = vmatpush3.msra.mxu1 %v7333_v26  ;;  %6676 = vmatprep.mubr.msk.f32.mxu1 %vm7230_vm3, %v7229_v8 }
 0xb4a   :  { %6674 = vmatprep.subr.mxu1 %v7229_v8 }
 0xb4b   :  { %6675 = vmatpush3.msra.mxu1 %v7342_v27 }
 0xb4c   :  { %6686 = vmatprep.subr.mxu1 %v7229_v8 }
 0xc08   :  { %v884_v59 = vpop.f32.mrf.mxu1 }
 0xc09   :  { %v885_v60 = vadd.f32 %v884_v59, %v813_v58 }
 0xc0a   :  { %v6664_v61 = vpop.f32.mrf.mxu1 }
 0xc0b   :  { %7091 = vtanh.f32 %v885_v60  ;;  %v888_v0 = vmax.f32 %v885_v60, 0.0 }
 0xc0d   :  { %v889_v1 = vmin.f32 %v888_v0, 6.0 }
 0xc18   :  { %v7092_v62 = vpop.eup %7091 }
 0xc19   :  { %892 = vrot.lane.b32.xlu1 %v7092_v62, %s7231_s1 }
 0xc1d   :  { %998 = vrot.lane.b32.xlu1 %v906_v63, %s7232_s9 }
 0xc8b   :  { %v893_v2 = vpop.permute.xlu1 %892 }
 0xc8c   :  { %v895_v3 = vmul.f32 %v893_v2, %v889_v1 }
 0xc8e   :  { %v7463_v4 = vadd.f32 %v895_v3, %v7411_v40 }
 0xc8f   :  { %v999_v43 = vpop.permute.xlu1 %998 }
 0xc90   :  { %v897_v11 = vsel %vm136_vm2, %v7463_v4, 0.0 }
 0xc91   :  { %v898_v12 = vrot.slane %v897_v11, 4 }
 0xc93   :  { %v899_v13 = vadd.f32 %v898_v12, %v897_v11 }
 0xc95   :  { %v900_v14 = vrot.slane %v899_v13, 2 }
 0xc97   :  { %v901_v15 = vadd.f32 %v900_v14, %v899_v13 }
 0xc99   :  { %v902_v16 = vrot.slane %v901_v15, 1 }
 0xc9b   :  { %v903_v17 = vadd.f32 %v902_v16, %v901_v15 }
 0xc9d   :  { %v904_v22 = vmul.f32 0.5, %v903_v17 }
 0xc9f   :  { %v905_v23 = vsub.f32 %v7463_v4, %v904_v22 }
 0xca1   :  { %6670 = vmatmul.mubr.msk.f32.vlgmr.msra.gmra.mxu0 %vm147_vm4, %v905_v23 }
 0xca2   :  { %6680 = vmatpush3.msra.mxu0 %v7357_v50  ;;  %6683 = vmatprep.mubr.msk.f32.mxu0 %vm7230_vm3, %v7229_v8 }
 0xca3   :  { %6681 = vmatprep.subr.mxu0 %v7229_v8 }
 0xca4   :  { %6682 = vmatpush3.msra.mxu0 %v7362_v51 }
 0xca5   :  { %6693 = vmatprep.subr.mxu0 %v7229_v8 }
 0xd61   :  { %v977_v40 = vpop.f32.mrf.mxu0 }
 0xd62   :  { %v978_v24 = vadd.f32 %v977_v40, %v906_v63 }
 0xd63   :  { %v6671_v28 = vpop.f32.mrf.mxu0 }
 0xd64   :  { %7093 = vtanh.f32 %v978_v24  ;;  %v981_v30 = vmax.f32 %v978_v24, 0.0 }
 0xd66   :  { %v982_v31 = vmin.f32 %v981_v30, 6.0 }
 0xd71   :  { %v7094_v29 = vpop.eup %7093 }
 0xd72   :  { %985 = vrot.lane.b32.xlu0 %v7094_v29, %s7231_s1 }
 0xde4   :  { %v986_v32 = vpop.permute.xlu0 %985 }
 0xde5   :  { %v988_v33 = vmul.f32 %v986_v32, %v982_v31 }
 0xde7   :  { %v989_v34 = vsel %vm136_vm2, %v988_v33, 0.0 }
 0xde8   :  { %v990_v36 = vrot.slane %v989_v34, 4 }
 0xdea   :  { %v991_v37 = vadd.f32 %v990_v36, %v989_v34 }
 0xdec   :  { %v992_v38 = vrot.slane %v991_v37, 2 }
 0xdee   :  { %v993_v53 = vadd.f32 %v992_v38, %v991_v37  ;;  %v1285_v38 = vrot.slane %v7326_v21, 6 }
 0xdf0   :  { %v994_v35 = vrot.slane %v993_v53, 1 }
 0xdf2   :  { %v995_v39 = vadd.f32 %v994_v35, %v993_v53 }
 0xdf4   :  { %v996_v41 = vmul.f32 0.5, %v995_v39 }
 0xdf6   :  { %v997_v42 = vsub.f32 %v988_v33, %v996_v41 }
 0xdf8   :  { %6677 = vmatmul.mubr.msk.f32.vlgmr.msra.gmra.mxu1 %vm147_vm4, %v997_v42 }
 0xdf9   :  { %6687 = vmatpush3.msra.mxu1 %v7388_v7  ;;  %6690 = vmatprep.mubr.msk.f32.mxu1 %vm7230_vm3, %v7229_v8 }
 0xdfa   :  { %6688 = vmatprep.subr.mxu1 %v7229_v8 }
 0xdfb   :  { %6689 = vmatpush3.msra.mxu1 %v7395_v10 }
 0xdfc   :  { %6700 = vmatprep.subr.mxu1 %v7229_v8 }
 0xeb8   :  { %v1070_v44 = vpop.f32.mrf.mxu1 }
 0xeb9   :  { %v1071_v45 = vadd.f32 %v1070_v44, %v999_v43 }
 0xeba   :  { %v6678_v46 = vpop.f32.mrf.mxu1 }
 0xebb   :  { %7095 = vtanh.f32 %v1071_v45  ;;  %v1074_v48 = vmax.f32 %v1071_v45, 0.0 }
 0xebd   :  { %v1075_v49 = vmin.f32 %v1074_v48, 6.0 }
 0xec8   :  { %v7096_v47 = vpop.eup %7095 }
 0xec9   :  { %1078 = vrot.lane.b32.xlu0 %v7096_v47, %s7231_s1 }
 0xf3b   :  { %v1079_v6 = vpop.permute.xlu0 %1078 }
 0xf3c   :  { %v1081_v52 = vmul.f32 %v1079_v6, %v1075_v49 }
 0xf3e   :  { %1083 = vrot.lane.b32.xlu1 %v1081_v52, %s7233_s12 }
 0xf42   :  { %1099 = vrot.lane.b32.xlu1 %v906_v63, %s7234_s13 }
 0xf46   :  { %1191 = vrot.lane.b32.xlu1 %v906_v63, %s7235_s18 }
 0xfb0   :  { %v1084_v54 = vpop.permute.xlu1 %1083 }
 0xfb1   :  { %v7489_v55 = vadd.f32 %v1084_v54, %v7437_v25 }
 0xfb3   :  { %v1087_v56 = vsel %vm328_vm5, %v7489_v55, 0.0 }
 0xfb4   :  { %v1088_v57 = vrot.slane %v1087_v56, 4  ;;  %v1100_v25 = vpop.permute.xlu1 %1099 }
 0xfb6   :  { %v1089_v58 = vadd.f32 %v1088_v57, %v1087_v56 }
 0xfb8   :  { %v1090_v59 = vrot.slane %v1089_v58, 2  ;;  %v1192_v32 = vpop.permute.xlu1 %1191 }
 0xfba   :  { %v1091_v60 = vadd.f32 %v1090_v59, %v1089_v58 }
 0xfbc   :  { %v1092_v61 = vrot.slane %v1091_v60, 1 }
 0xfbe   :  { %v1093_v62 = vadd.f32 %v1092_v61, %v1091_v60 }
 0xfc0   :  { %v1094_v0 = vmul.f32 0.5, %v1093_v62 }
 0xfc2   :  { %v1095_v1 = vsub.f32 %v7489_v55, %v1094_v0 }
 0xfc4   :  { %1097 = vrot.lane.b32.xlu0 %v1095_v1, %s7231_s1 }
0x1036   :  { %v1098_v2 = vpop.permute.xlu0 %1097 }
0x1037   :  { %6684 = vmatmul.mubr.msk.f32.vlgmr.msra.gmra.mxu0 %vm147_vm4, %v1098_v2 }
0x1038   :  { %6694 = vmatpush3.msra.mxu0 %v7288_v5  ;;  %6697 = vmatprep.mubr.msk.f32.mxu0 %vm7230_vm3, %v7229_v8 }
0x1039   :  { %6695 = vmatprep.subr.mxu0 %v7229_v8 }
0x103a   :  { %6696 = vmatpush3.msra.mxu0 %v7304_v9 }
0x103b   :  { %6707 = vmatprep.subr.mxu0 %v7229_v8 }
0x10f7   :  { %v1170_v63 = vpop.f32.mrf.mxu0 }
0x10f8   :  { %v1171_v3 = vadd.f32 %v1170_v63, %v1100_v25 }
0x10f9   :  { %v6685_v11 = vpop.f32.mrf.mxu0 }
0x10fa   :  { %7097 = vtanh.f32 %v1171_v3  ;;  %v1174_v13 = vmax.f32 %v1171_v3, 0.0 }
0x10fc   :  { %v1175_v14 = vmin.f32 %v1174_v13, 6.0 }
0x1107   :  { %v7098_v12 = vpop.eup %7097 }
0x1108   :  { %1178 = vrot.lane.b32.xlu0 %v7098_v12, %s7231_s1 }
0x117a   :  { %v1179_v15 = vpop.permute.xlu0 %1178 }
0x117b   :  { %v1181_v16 = vmul.f32 %v1179_v15, %v1175_v14 }
0x117d   :  { %v1182_v17 = vsel %vm136_vm2, %v1181_v16, 0.0 }
0x117e   :  { %v1183_v22 = vrot.slane %v1182_v17, 4 }
0x1180   :  { %v1184_v23 = vadd.f32 %v1183_v22, %v1182_v17 }
0x1182   :  { %v1185_v40 = vrot.slane %v1184_v23, 2 }
0x1184   :  { %v1186_v24 = vadd.f32 %v1185_v40, %v1184_v23 }
0x1186   :  { %v1187_v28 = vrot.slane %v1186_v24, 1 }
0x1188   :  { %v1188_v29 = vadd.f32 %v1187_v28, %v1186_v24 }
0x118a   :  { %v1189_v30 = vmul.f32 0.5, %v1188_v29 }
0x118c   :  { %v1190_v31 = vsub.f32 %v1181_v16, %v1189_v30 }
0x118e   :  { %6691 = vmatmul.mubr.msk.f32.vlgmr.msra.gmra.mxu1 %vm147_vm4, %v1190_v31 }
0x118f   :  { %6701 = vmatpush3.msra.mxu1 %v7333_v26  ;;  %6704 = vmatprep.mubr.msk.f32.mxu1 %vm7230_vm3, %v7229_v8 }
0x1190   :  { %6702 = vmatprep.subr.mxu1 %v7229_v8 }
0x1191   :  { %6703 = vmatpush3.msra.mxu1 %v7342_v27 }
0x1192   :  { %6714 = vmatprep.subr.mxu1 %v7229_v8 }
0x124e   :  { %v1263_v33 = vpop.f32.mrf.mxu1 }
0x124f   :  { %v1264_v34 = vadd.f32 %v1263_v33, %v1192_v32 }
0x1250   :  { %v6692_v36 = vpop.f32.mrf.mxu1 }
0x1251   :  { %7099 = vtanh.f32 %v1264_v34  ;;  %v1267_v53 = vmax.f32 %v1264_v34, 0.0 }
0x1253   :  { %v1268_v35 = vmin.f32 %v1267_v53, 6.0 }
0x125e   :  { %v7100_v37 = vpop.eup %7099 }
0x125f   :  { %1271 = vrot.lane.b32.xlu0 %v7100_v37, %s7231_s1 }
0x1263   :  { %1377 = vrot.lane.b32.xlu0 %v1285_v38, %s7232_s9 }
0x12d1   :  { %v1272_v39 = vpop.permute.xlu0 %1271 }
0x12d2   :  { %v1274_v41 = vmul.f32 %v1272_v39, %v1268_v35 }
0x12d4   :  { %v7515_v42 = vadd.f32 %v1274_v41, %v7463_v4 }
0x12d5   :  { %v1378_v12 = vpop.permute.xlu0 %1377 }
0x12d6   :  { %v1276_v43 = vsel %vm136_vm2, %v7515_v42, 0.0 }
0x12d7   :  { %v1277_v44 = vrot.slane %v1276_v43, 4 }
0x12d9   :  { %v1278_v45 = vadd.f32 %v1277_v44, %v1276_v43 }
0x12db   :  { %v1279_v46 = vrot.slane %v1278_v45, 2 }
0x12dd   :  { %v1280_v47 = vadd.f32 %v1279_v46, %v1278_v45 }
0x12df   :  { %v1281_v48 = vrot.slane %v1280_v47, 1 }
0x12e1   :  { %v1282_v49 = vadd.f32 %v1281_v48, %v1280_v47 }
0x12e3   :  { %v1283_v6 = vmul.f32 0.5, %v1282_v49 }
0x12e5   :  { %v1284_v21 = vsub.f32 %v7515_v42, %v1283_v6 }
0x12e7   :  { %6698 = vmatmul.mubr.msk.f32.vlgmr.msra.gmra.mxu0 %vm147_vm4, %v1284_v21 }
0x12e8   :  { %6708 = vmatpush3.msra.mxu0 %v7357_v50  ;;  %6711 = vmatprep.mubr.msk.f32.mxu0 %vm7230_vm3, %v7229_v8 }
0x12e9   :  { %6709 = vmatprep.subr.mxu0 %v7229_v8 }
0x12ea   :  { %6710 = vmatpush3.msra.mxu0 %v7362_v51 }
0x12eb   :  { %6721 = vmatprep.subr.mxu0 %v7229_v8 }
0x13a7   :  { %v1356_v4 = vpop.f32.mrf.mxu0 }
0x13a8   :  { %v1357_v52 = vadd.f32 %v1356_v4, %v1285_v38 }
0x13a9   :  { %v6699_v54 = vpop.f32.mrf.mxu0 }
0x13aa   :  { %7101 = vtanh.f32 %v1357_v52  ;;  %v1360_v57 = vmax.f32 %v1357_v52, 0.0 }
0x13ac   :  { %v1361_v58 = vmin.f32 %v1360_v57, 6.0 }
0x13b7   :  { %v7102_v56 = vpop.eup %7101 }
0x13b8   :  { %1364 = vrot.lane.b32.xlu1 %v7102_v56, %s7231_s1 }
0x142a   :  { %v1365_v59 = vpop.permute.xlu1 %1364 }
0x142b   :  { %v1367_v60 = vmul.f32 %v1365_v59, %v1361_v58 }
0x142d   :  { %v1368_v61 = vsel %vm136_vm2, %v1367_v60, 0.0 }
0x142e   :  { %v1369_v62 = vrot.slane %v1368_v61, 4 }
0x1430   :  { %v1370_v0 = vadd.f32 %v1369_v62, %v1368_v61 }
0x1432   :  { %v1371_v1 = vrot.slane %v1370_v0, 2 }
0x1434   :  { %v1372_v2 = vadd.f32 %v1371_v1, %v1370_v0 }
0x1436   :  { %v1373_v25 = vrot.slane %v1372_v2, 1 }
0x1438   :  { %v1374_v63 = vadd.f32 %v1373_v25, %v1372_v2 }
0x143a   :  { %v1375_v3 = vmul.f32 0.5, %v1374_v63 }
0x143c   :  { %v1376_v11 = vsub.f32 %v1367_v60, %v1375_v3 }
0x143e   :  { %6705 = vmatmul.mubr.msk.f32.vlgmr.msra.gmra.mxu1 %vm147_vm4, %v1376_v11 }
0x143f   :  { %6715 = vmatpush3.msra.mxu1 %v7388_v7  ;;  %6718 = vmatprep.mubr.msk.f32.mxu1 %vm7230_vm3, %v7229_v8 }
0x1440   :  { %6716 = vmatprep.subr.mxu1 %v7229_v8 }
0x1441   :  { %6717 = vmatpush3.msra.mxu1 %v7395_v10 }
0x1442   :  { %6728 = vmatprep.subr.mxu1 %v7229_v8 }
0x14fe   :  { %v1449_v13 = vpop.f32.mrf.mxu1 }
0x14ff   :  { %v1450_v14 = vadd.f32 %v1449_v13, %v1378_v12 }
0x1500   :  { %v6706_v15 = vpop.f32.mrf.mxu1 }
0x1501   :  { %7103 = vtanh.f32 %v1450_v14  ;;  %v1453_v17 = vmax.f32 %v1450_v14, 0.0 }
0x1503   :  { %v1454_v22 = vmin.f32 %v1453_v17, 6.0 }
0x150e   :  { %v7104_v16 = vpop.eup %7103 }
0x150f   :  { %1457 = vrot.lane.b32.xlu1 %v7104_v16, %s7231_s1 }
0x1581   :  { %v1458_v23 = vpop.permute.xlu1 %1457 }
0x1582   :  { %v1460_v40 = vmul.f32 %v1458_v23, %v1454_v22 }
0x1584   :  { %1462 = vrot.lane.b32.xlu0 %v1460_v40, %s7233_s12 }
0x1588   :  { %1478 = vrot.lane.b32.xlu0 %v1285_v38, %s7234_s13 }
0x158c   :  { %1570 = vrot.lane.b32.xlu0 %v1285_v38, %s7235_s18 }
0x15f6   :  { %v1463_v24 = vpop.permute.xlu0 %1462 }
0x15f7   :  { %v7541_v28 = vadd.f32 %v1463_v24, %v7489_v55 }
0x15f9   :  { %v1466_v29 = vsel %vm328_vm5, %v7541_v28, 0.0 }
0x15fa   :  { %v1467_v30 = vrot.slane %v1466_v29, 4  ;;  %v1479_v55 = vpop.permute.xlu0 %1478 }
0x15fc   :  { %v1468_v31 = vadd.f32 %v1467_v30, %v1466_v29 }
0x15fe   :  { %v1469_v32 = vrot.slane %v1468_v31, 2  ;;  %v1571_v56 = vpop.permute.xlu0 %1570 }
0x1600   :  { %v1470_v33 = vadd.f32 %v1469_v32, %v1468_v31 }
0x1602   :  { %v1471_v34 = vrot.slane %v1470_v33, 1 }
0x1604   :  { %v1472_v36 = vadd.f32 %v1471_v34, %v1470_v33 }
0x1606   :  { %v1473_v37 = vmul.f32 0.5, %v1472_v36 }
0x1608   :  { %v1474_v53 = vsub.f32 %v7541_v28, %v1473_v37 }
0x160a   :  { %1476 = vrot.lane.b32.xlu1 %v1474_v53, %s7231_s1 }
0x167c   :  { %v1477_v35 = vpop.permute.xlu1 %1476 }
0x167d   :  { %6712 = vmatmul.mubr.msk.f32.vlgmr.msra.gmra.mxu0 %vm147_vm4, %v1477_v35 }
0x167e   :  { %6722 = vmatpush3.msra.mxu0 %v7288_v5  ;;  %6725 = vmatprep.mubr.msk.f32.mxu0 %vm7230_vm3, %v7229_v8 }
0x167f   :  { %6723 = vmatprep.subr.mxu0 %v7229_v8 }
0x1680   :  { %6724 = vmatpush3.msra.mxu0 %v7304_v9 }
0x1681   :  { %6735 = vmatprep.subr.mxu0 %v7229_v8 }
0x173d   :  { %v1549_v38 = vpop.f32.mrf.mxu0 }
0x173e   :  { %v1550_v39 = vadd.f32 %v1549_v38, %v1479_v55 }
0x173f   :  { %v6713_v41 = vpop.f32.mrf.mxu0 }
0x1740   :  { %7105 = vtanh.f32 %v1550_v39  ;;  %v1553_v44 = vmax.f32 %v1550_v39, 0.0 }
0x1742   :  { %v1554_v45 = vmin.f32 %v1553_v44, 6.0 }
0x174d   :  { %v7106_v43 = vpop.eup %7105 }
0x174e   :  { %1557 = vrot.lane.b32.xlu1 %v7106_v43, %s7231_s1 }
0x17c0   :  { %v1558_v5 = vpop.permute.xlu1 %1557 }
0x17c1   :  { %v1560_v46 = vmul.f32 %v1558_v5, %v1554_v45 }
0x17c3   :  { %v1561_v47 = vsel %vm136_vm2, %v1560_v46, 0.0 }
0x17c4   :  { %v1562_v48 = vrot.slane %v1561_v47, 4 }
0x17c6   :  { %v1563_v49 = vadd.f32 %v1562_v48, %v1561_v47 }
0x17c8   :  { %v1564_v6 = vrot.slane %v1563_v49, 2 }
0x17ca   :  { %v1565_v9 = vadd.f32 %v1564_v6, %v1563_v49 }
0x17cc   :  { %v1566_v21 = vrot.slane %v1565_v9, 1 }
0x17ce   :  { %v1567_v4 = vadd.f32 %v1566_v21, %v1565_v9 }
0x17d0   :  { %v1568_v52 = vmul.f32 0.5, %v1567_v4 }
0x17d2   :  { %v1569_v54 = vsub.f32 %v1560_v46, %v1568_v52  ;;  %v7615_v52 = vld [vmem:[%s8343_s2] sm:$0xff] }
0x17d4   :  { %6719 = vmatmul.mubr.msk.f32.vlgmr.msra.gmra.mxu1 %vm147_vm4, %v1569_v54 }
0x17d5   :  { %6729 = vmatpush3.msra.mxu1 %v7333_v26  ;;  %6732 = vmatprep.mubr.msk.f32.mxu1 %vm7230_vm3, %v7229_v8 }
0x17d6   :  { %6730 = vmatprep.subr.mxu1 %v7229_v8 }
0x17d7   :  { %6731 = vmatpush3.msra.mxu1 %v7342_v27 }
0x17d8   :  { %6742 = vmatprep.subr.mxu1 %v7229_v8 }
0x1894   :  { %v1642_v57 = vpop.f32.mrf.mxu1 }
0x1895   :  { %v1643_v58 = vadd.f32 %v1642_v57, %v1571_v56 }
0x1896   :  { %v6720_v59 = vpop.f32.mrf.mxu1 }
0x1897   :  { %7107 = vtanh.f32 %v1643_v58  ;;  %v1646_v26 = vmax.f32 %v1643_v58, 0.0 }
0x1899   :  { %v1647_v61 = vmin.f32 %v1646_v26, 6.0 }
0x18a4   :  { %v7108_v60 = vpop.eup %7107 }
0x18a5   :  { %1650 = vrot.lane.b32.xlu1 %v7108_v60, %s7231_s1 }
0x18a9   :  { %1755 = vrot.lane.b32.xlu1 %v7322_v19, %s7232_s9 }
0x1917   :  { %v1651_v62 = vpop.permute.xlu1 %1650 }
0x1918   :  { %v1653_v0 = vmul.f32 %v1651_v62, %v1647_v61 }
0x191a   :  { %v7567_v1 = vadd.f32 %v1653_v0, %v7515_v42 }
0x191b   :  { %v1756_v37 = vpop.permute.xlu1 %1755 }
0x191c   :  { %v1655_v27 = vsel %vm136_vm2, %v7567_v1, 0.0 }
0x191d   :  { %v1656_v2 = vrot.slane %v1655_v27, 4 }
0x191f   :  { %v1657_v25 = vadd.f32 %v1656_v2, %v1655_v27 }
0x1921   :  { %v1658_v63 = vrot.slane %v1657_v25, 2 }
0x1923   :  { %v1659_v3 = vadd.f32 %v1658_v63, %v1657_v25 }
0x1925   :  { %v1660_v11 = vrot.slane %v1659_v3, 1 }
0x1927   :  { %v1661_v12 = vadd.f32 %v1660_v11, %v1659_v3 }
0x1929   :  { %v1662_v13 = vmul.f32 0.5, %v1661_v12 }
0x192b   :  { %v1663_v14 = vsub.f32 %v7567_v1, %v1662_v13 }
0x192d   :  { %6726 = vmatmul.mubr.msk.f32.vlgmr.msra.gmra.mxu0 %vm147_vm4, %v1663_v14  ;;  %v7625_v14 = vld [vmem:[%s8343_s2 + $0x18] sm:$0xff] }
0x192e   :  { %6736 = vmatpush3.msra.mxu0 %v7357_v50  ;;  %6739 = vmatprep.mubr.msk.f32.mxu0 %vm7230_vm3, %v7229_v8 }
0x192f   :  { %6737 = vmatprep.subr.mxu0 %v7229_v8 }
0x1930   :  { %6738 = vmatpush3.msra.mxu0 %v7362_v51 }
0x1931   :  { %6749 = vmatprep.subr.mxu0 %v7229_v8 }
0x19ed   :  { %v1733_v42 = vpop.f32.mrf.mxu0 }
0x19ee   :  { %v1734_v15 = vadd.f32 %v7322_v19, %v1733_v42  ;;  %v7634_v42 = vld [vmem:[%s8343_s2 + $0x10] sm:$0xff] }
0x19ef   :  { %v6727_v16 = vpop.f32.mrf.mxu0 }
0x19f0   :  { %7109 = vtanh.f32 %v1734_v15  ;;  %v1737_v22 = vmax.f32 %v1734_v15, 0.0 }
0x19f2   :  { %v1738_v23 = vmin.f32 %v1737_v22, 6.0 }
0x19fd   :  { %v7110_v17 = vpop.eup %7109 }
0x19fe   :  { %1741 = vrot.lane.b32.xlu0 %v7110_v17, %s7231_s1 }
0x1a70   :  { %v1742_v50 = vpop.permute.xlu0 %1741 }
0x1a71   :  { %v1744_v40 = vmul.f32 %v1742_v50, %v1738_v23  ;;  %v7640_v50 = vrot.slane %v7322_v19, 2 }
0x1a73   :  { %v1745_v24 = vsel %vm136_vm2, %v1744_v40, 0.0 }
0x1a74   :  { %v1746_v29 = vrot.slane %v1745_v24, 4 }
0x1a76   :  { %v1747_v30 = vadd.f32 %v1746_v29, %v1745_v24 }
0x1a78   :  { %v1748_v31 = vrot.slane %v1747_v30, 2 }
0x1a7a   :  { %v1749_v51 = vadd.f32 %v1748_v31, %v1747_v30 }
0x1a7c   :  { %v1750_v32 = vrot.slane %v1749_v51, 1 }
0x1a7e   :  { %v1751_v33 = vadd.f32 %v1750_v32, %v1749_v51 }
0x1a80   :  { %v1752_v34 = vmul.f32 0.5, %v1751_v33 }
0x1a82   :  { %v1753_v36 = vsub.f32 %v1744_v40, %v1752_v34 }
0x1a84   :  { %6733 = vmatmul.mubr.msk.f32.vlgmr.msra.gmra.mxu1 %vm147_vm4, %v1753_v36 }
0x1a85   :  { %6743 = vmatpush3.msra.mxu1 %v7388_v7  ;;  %6746 = vmatprep.mubr.msk.f32.mxu1 %vm7230_vm3, %v7229_v8 }
0x1a86   :  { %6744 = vmatprep.subr.mxu1 %v7229_v8 }
0x1a87   :  { %6745 = vmatpush3.msra.mxu1 %v7395_v10 }
0x1a88   :  { %6756 = vmatprep.subr.mxu1 %v7229_v8 }
0x1b44   :  { %v1827_v53 = vpop.f32.mrf.mxu1 }
0x1b45   :  { %v1828_v35 = vadd.f32 %v1827_v53, %v1756_v37 }
0x1b46   :  { %v6734_v55 = vpop.f32.mrf.mxu1 }
0x1b47   :  { %7111 = vtanh.f32 %v1828_v35  ;;  %v1831_v39 = vmax.f32 %v1828_v35, 0.0 }
0x1b49   :  { %v1832_v41 = vmin.f32 %v1831_v39, 6.0 }
0x1b54   :  { %v7112_v38 = vpop.eup %7111 }
0x1b55   :  { %1835 = vrot.lane.b32.xlu0 %v7112_v38, %s7231_s1  ;;  %v7654_v38 = vld [vmem:[%s8343_s2 + $0x28] sm:$0xff] }
0x1bc7   :  { %v1836_v7 = vpop.permute.xlu0 %1835 }
0x1bc8   :  { %v1838_v43 = vmul.f32 %v1836_v7, %v1832_v41 }
0x1bca   :  { %1840 = vrot.lane.b32.xlu1 %v1838_v43, %s7233_s12 }
0x1bce   :  { %1856 = vrot.lane.b32.xlu1 %v7322_v19, %s7234_s13 }
0x1bd2   :  { %1948 = vrot.lane.b32.xlu1 %v7322_v19, %s7235_s18 }
0x1c3c   :  { %v1841_v10 = vpop.permute.xlu1 %1840 }
0x1c3d   :  { %v7596_v44 = vadd.f32 %v1841_v10, %v7541_v28  ;;  %v7606_v28 = vld [vmem:[%s8343_s2 + $0x8] sm:$0xff] }
0x1c3f   :  { %v1844_v45 = vsel %vm328_vm5, %v7596_v44, 0.0 }
0x1c40   :  { %v1845_v5 = vrot.slane %v1844_v45, 4  ;;  %v1857_v54 = vpop.permute.xlu1 %1856 }
0x1c42   :  { %v1846_v46 = vadd.f32 %v1845_v5, %v1844_v45 }
0x1c44   :  { %v1847_v47 = vrot.slane %v1846_v46, 2  ;;  %v1949_v15 = vpop.permute.xlu1 %1948 }
0x1c46   :  { %v1848_v48 = vadd.f32 %v1847_v47, %v1846_v46 }
0x1c48   :  { %v1849_v49 = vrot.slane %v1848_v48, 1 }
0x1c4a   :  { %v1850_v6 = vadd.f32 %v1849_v49, %v1848_v48 }
0x1c4c   :  { %v1851_v9 = vmul.f32 0.5, %v1850_v6 }
0x1c4e   :  { %v1852_v21 = vsub.f32 %v7596_v44, %v1851_v9 }
0x1c50   :  { %1854 = vrot.lane.b32.xlu0 %v1852_v21, %s7231_s1 }
0x1cc2   :  { %v1855_v4 = vpop.permute.xlu0 %1854 }
0x1cc3   :  { %6740 = vmatmul.mubr.msk.f32.vlgmr.msra.gmra.mxu0 %vm147_vm4, %v1855_v4 }
0x1cc4   :  { %6750 = vmatpush3.msra.mxu0 %v7606_v28  ;;  %6753 = vmatprep.mubr.msk.f32.mxu0 %vm7230_vm3, %v7229_v8 }
0x1cc5   :  { %6751 = vmatprep.subr.mxu0 %v7229_v8 }
0x1cc6   :  { %6752 = vmatpush3.msra.mxu0 %v7615_v52 }
0x1cc7   :  { %6763 = vmatprep.subr.mxu0 %v7229_v8 }
0x1d83   :  { %v1927_v56 = vpop.f32.mrf.mxu0 }
0x1d84   :  { %v1928_v57 = vadd.f32 %v1927_v56, %v1857_v54 }
0x1d85   :  { %v6741_v58 = vpop.f32.mrf.mxu0 }
0x1d86   :  { %7113 = vtanh.f32 %v1928_v57  ;;  %v1931_v60 = vmax.f32 %v1928_v57, 0.0  ;;  %v7674_v57 = vld [vmem:[%s8343_s2 + $0x38] sm:$0xff]  ;;  %v7683_v58 = vld [vmem:[%s8343_s2 + $0x30] sm:$0xff] }
0x1d88   :  { %v1932_v26 = vmin.f32 %v1931_v60, 6.0 }
0x1d93   :  { %v7114_v59 = vpop.eup %7113 }
0x1d94   :  { %1935 = vrot.lane.b32.xlu0 %v7114_v59, %s7231_s1 }
0x1e06   :  { %v1936_v61 = vpop.permute.xlu0 %1935 }
0x1e07   :  { %v1938_v62 = vmul.f32 %v1936_v61, %v1932_v26 }
0x1e09   :  { %v1939_v0 = vsel %vm136_vm2, %v1938_v62, 0.0 }
0x1e0a   :  { %v1940_v27 = vrot.slane %v1939_v0, 4 }
0x1e0c   :  { %v1941_v2 = vadd.f32 %v1940_v27, %v1939_v0 }
0x1e0e   :  { %v1942_v25 = vrot.slane %v1941_v2, 2 }
0x1e10   :  { %v1943_v63 = vadd.f32 %v1942_v25, %v1941_v2 }
0x1e12   :  { %v1944_v3 = vrot.slane %v1943_v63, 1 }
0x1e14   :  { %v1945_v11 = vadd.f32 %v1944_v3, %v1943_v63 }
0x1e16   :  { %v1946_v12 = vmul.f32 0.5, %v1945_v11 }
0x1e18   :  { %v1947_v13 = vsub.f32 %v1938_v62, %v1946_v12 }
0x1e1a   :  { %6747 = vmatmul.mubr.msk.f32.vlgmr.msra.gmra.mxu1 %vm147_vm4, %v1947_v13 }
0x1e1b   :  { %6757 = vmatpush3.msra.mxu1 %v7625_v14  ;;  %6760 = vmatprep.mubr.msk.f32.mxu1 %vm7230_vm3, %v7229_v8 }
0x1e1c   :  { %6758 = vmatprep.subr.mxu1 %v7229_v8 }
0x1e1d   :  { %6759 = vmatpush3.msra.mxu1 %v7634_v42 }
0x1e1e   :  { %6770 = vmatprep.subr.mxu1 %v7229_v8 }
0x1eda   :  { %v2020_v16 = vpop.f32.mrf.mxu1 }
0x1edb   :  { %v2021_v17 = vadd.f32 %v2020_v16, %v1949_v15 }
0x1edc   :  { %v6748_v22 = vpop.f32.mrf.mxu1 }
0x1edd   :  { %7115 = vtanh.f32 %v2021_v17  ;;  %v2024_v40 = vmax.f32 %v2021_v17, 0.0 }
0x1edf   :  { %v2025_v24 = vmin.f32 %v2024_v40, 6.0 }
0x1eea   :  { %v7116_v23 = vpop.eup %7115 }
0x1eeb   :  { %2028 = vrot.lane.b32.xlu0 %v7116_v23, %s7231_s1 }
0x1eef   :  { %2134 = vrot.lane.b32.xlu0 %v7640_v50, %s7232_s9 }
0x1f5d   :  { %v2029_v29 = vpop.permute.xlu0 %2028 }
0x1f5e   :  { %v2031_v30 = vmul.f32 %v2029_v29, %v2025_v24 }
0x1f60   :  { %v7645_v31 = vadd.f32 %v2031_v30, %v7567_v1  ;;  %v7663_v1 = vld [vmem:[%s8343_s2 + $0x20] sm:$0xff] }
0x1f61   :  { %v2135_v59 = vpop.permute.xlu0 %2134 }
0x1f62   :  { %v2033_v51 = vsel %vm136_vm2, %v7645_v31, 0.0 }
0x1f63   :  { %v2034_v32 = vrot.slane %v2033_v51, 4 }
0x1f65   :  { %v2035_v33 = vadd.f32 %v2034_v32, %v2033_v51 }
0x1f67   :  { %v2036_v34 = vrot.slane %v2035_v33, 2 }
0x1f69   :  { %v2037_v36 = vadd.f32 %v2036_v34, %v2035_v33 }
0x1f6b   :  { %v2038_v37 = vrot.slane %v2037_v36, 1 }
0x1f6d   :  { %v2039_v53 = vadd.f32 %v2038_v37, %v2037_v36 }
0x1f6f   :  { %v2040_v35 = vmul.f32 0.5, %v2039_v53 }
0x1f71   :  { %v2041_v55 = vsub.f32 %v7645_v31, %v2040_v35 }
0x1f73   :  { %6754 = vmatmul.mubr.msk.f32.vlgmr.msra.gmra.mxu0 %vm147_vm4, %v2041_v55 }
0x1f74   :  { %6764 = vmatpush3.msra.mxu0 %v7654_v38  ;;  %6767 = vmatprep.mubr.msk.f32.mxu0 %vm7230_vm3, %v7229_v8 }
0x1f75   :  { %6765 = vmatprep.subr.mxu0 %v7229_v8 }
0x1f76   :  { %6766 = vmatpush3.msra.mxu0 %v7663_v1 }
0x1f77   :  { %6777 = vmatprep.subr.mxu0 %v7229_v8 }
0x2033   :  { %v2113_v39 = vpop.f32.mrf.mxu0 }
0x2034   :  { %v2114_v41 = vadd.f32 %v2113_v39, %v7640_v50 }
0x2035   :  { %v6755_v7 = vpop.f32.mrf.mxu0 }
0x2036   :  { %7117 = vtanh.f32 %v2114_v41  ;;  %v2117_v10 = vmax.f32 %v2114_v41, 0.0 }
0x2038   :  { %v2118_v45 = vmin.f32 %v2117_v10, 6.0 }
0x2043   :  { %v7118_v43 = vpop.eup %7117 }
0x2044   :  { %2121 = vrot.lane.b32.xlu1 %v7118_v43, %s7231_s1 }
0x20b6   :  { %v2122_v5 = vpop.permute.xlu1 %2121 }
0x20b7   :  { %v2124_v46 = vmul.f32 %v2122_v5, %v2118_v45 }
0x20b9   :  { %v2125_v47 = vsel %vm136_vm2, %v2124_v46, 0.0 }
0x20ba   :  { %v2126_v48 = vrot.slane %v2125_v47, 4 }
0x20bc   :  { %v2127_v49 = vadd.f32 %v2126_v48, %v2125_v47 }
0x20be   :  { %v2128_v6 = vrot.slane %v2127_v49, 2 }
0x20c0   :  { %v2129_v9 = vadd.f32 %v2128_v6, %v2127_v49  ;;  %v2421_v49 = vrot.slane %v7322_v19, 4 }
0x20c2   :  { %v2130_v21 = vrot.slane %v2129_v9, 1 }
0x20c4   :  { %v2131_v4 = vadd.f32 %v2130_v21, %v2129_v9 }
0x20c6   :  { %v2132_v54 = vmul.f32 0.5, %v2131_v4 }
0x20c8   :  { %v2133_v56 = vsub.f32 %v2124_v46, %v2132_v54 }
0x20ca   :  { %6761 = vmatmul.mubr.msk.f32.vlgmr.msra.gmra.mxu1 %vm147_vm4, %v2133_v56 }
0x20cb   :  { %6771 = vmatpush3.msra.mxu1 %v7674_v57  ;;  %6774 = vmatprep.mubr.msk.f32.mxu1 %vm7230_vm3, %v7229_v8 }
0x20cc   :  { %6772 = vmatprep.subr.mxu1 %v7229_v8 }
0x20cd   :  { %6773 = vmatpush3.msra.mxu1 %v7683_v58 }
0x20ce   :  { %6784 = vmatprep.subr.mxu1 %v7229_v8 }
0x218a   :  { %v2206_v60 = vpop.f32.mrf.mxu1 }
0x218b   :  { %v2207_v26 = vadd.f32 %v2206_v60, %v2135_v59 }
0x218c   :  { %v6762_v61 = vpop.f32.mrf.mxu1 }
0x218d   :  { %7119 = vtanh.f32 %v2207_v26  ;;  %v2210_v0 = vmax.f32 %v2207_v26, 0.0 }
0x218f   :  { %v2211_v27 = vmin.f32 %v2210_v0, 6.0 }
0x219a   :  { %v7120_v62 = vpop.eup %7119 }
0x219b   :  { %2214 = vrot.lane.b32.xlu1 %v7120_v62, %s7231_s1 }
0x220d   :  { %v2215_v2 = vpop.permute.xlu1 %2214 }
0x220e   :  { %v2217_v25 = vmul.f32 %v2215_v2, %v2211_v27 }
0x2210   :  { %2219 = vrot.lane.b32.xlu0 %v2217_v25, %s7233_s12 }
0x2214   :  { %2235 = vrot.lane.b32.xlu0 %v7640_v50, %s7234_s13 }
0x2218   :  { %2327 = vrot.lane.b32.xlu0 %v7640_v50, %s7235_s18 }
0x2282   :  { %v2220_v63 = vpop.permute.xlu0 %2219 }
0x2283   :  { %v7694_v3 = vadd.f32 %v2220_v63, %v7596_v44 }
0x2285   :  { %v2223_v11 = vsel %vm328_vm5, %v7694_v3, 0.0 }
0x2286   :  { %v2224_v12 = vrot.slane %v2223_v11, 4  ;;  %v2236_v44 = vpop.permute.xlu0 %2235 }
0x2288   :  { %v2225_v13 = vadd.f32 %v2224_v12, %v2223_v11 }
0x228a   :  { %v2226_v15 = vrot.slane %v2225_v13, 2  ;;  %v2328_v45 = vpop.permute.xlu0 %2327 }
0x228c   :  { %v2227_v16 = vadd.f32 %v2226_v15, %v2225_v13 }
0x228e   :  { %v2228_v17 = vrot.slane %v2227_v16, 1 }
0x2290   :  { %v2229_v22 = vadd.f32 %v2228_v17, %v2227_v16 }
0x2292   :  { %v2230_v23 = vmul.f32 0.5, %v2229_v22 }
0x2294   :  { %v2231_v40 = vsub.f32 %v7694_v3, %v2230_v23 }
0x2296   :  { %2233 = vrot.lane.b32.xlu1 %v2231_v40, %s7231_s1 }
0x2308   :  { %v2234_v24 = vpop.permute.xlu1 %2233 }
0x2309   :  { %6768 = vmatmul.mubr.msk.f32.vlgmr.msra.gmra.mxu0 %vm147_vm4, %v2234_v24 }
0x230a   :  { %6778 = vmatpush3.msra.mxu0 %v7606_v28  ;;  %6781 = vmatprep.mubr.msk.f32.mxu0 %vm7230_vm3, %v7229_v8 }
0x230b   :  { %6779 = vmatprep.subr.mxu0 %v7229_v8 }
0x230c   :  { %6780 = vmatpush3.msra.mxu0 %v7615_v52 }
0x230d   :  { %6791 = vmatprep.subr.mxu0 %v7229_v8 }
0x23c9   :  { %v2306_v50 = vpop.f32.mrf.mxu0 }
0x23ca   :  { %v2307_v29 = vadd.f32 %v2306_v50, %v2236_v44 }
0x23cb   :  { %v6769_v30 = vpop.f32.mrf.mxu0 }
0x23cc   :  { %7121 = vtanh.f32 %v2307_v29  ;;  %v2310_v32 = vmax.f32 %v2307_v29, 0.0 }
0x23ce   :  { %v2311_v33 = vmin.f32 %v2310_v32, 6.0 }
0x23d9   :  { %v7122_v51 = vpop.eup %7121 }
0x23da   :  { %2314 = vrot.lane.b32.xlu1 %v7122_v51, %s7231_s1 }
0x244c   :  { %v2315_v34 = vpop.permute.xlu1 %2314 }
0x244d   :  { %v2317_v36 = vmul.f32 %v2315_v34, %v2311_v33 }
0x244f   :  { %v2318_v37 = vsel %vm136_vm2, %v2317_v36, 0.0 }
0x2450   :  { %v2319_v53 = vrot.slane %v2318_v37, 4 }
0x2452   :  { %v2320_v35 = vadd.f32 %v2319_v53, %v2318_v37 }
0x2454   :  { %v2321_v55 = vrot.slane %v2320_v35, 2 }
0x2456   :  { %v2322_v39 = vadd.f32 %v2321_v55, %v2320_v35 }
0x2458   :  { %v2323_v41 = vrot.slane %v2322_v39, 1 }
0x245a   :  { %v2324_v7 = vadd.f32 %v2323_v41, %v2322_v39 }
0x245c   :  { %v2325_v43 = vmul.f32 0.5, %v2324_v7 }
0x245e   :  { %v2326_v10 = vsub.f32 %v2317_v36, %v2325_v43 }
0x2460   :  { %6775 = vmatmul.mubr.msk.f32.vlgmr.msra.gmra.mxu1 %vm147_vm4, %v2326_v10 }
0x2461   :  { %6785 = vmatpush3.msra.mxu1 %v7625_v14  ;;  %6788 = vmatprep.mubr.msk.f32.mxu1 %vm7230_vm3, %v7229_v8 }
0x2462   :  { %6786 = vmatprep.subr.mxu1 %v7229_v8 }
0x2463   :  { %6787 = vmatpush3.msra.mxu1 %v7634_v42 }
0x2464   :  { %6798 = vmatprep.subr.mxu1 %v7229_v8 }
0x2520   :  { %v2399_v5 = vpop.f32.mrf.mxu1 }
0x2521   :  { %v2400_v46 = vadd.f32 %v2399_v5, %v2328_v45 }
0x2522   :  { %v6776_v47 = vpop.f32.mrf.mxu1 }
0x2523   :  { %7123 = vtanh.f32 %v2400_v46  ;;  %v2403_v6 = vmax.f32 %v2400_v46, 0.0 }
0x2525   :  { %v2404_v9 = vmin.f32 %v2403_v6, 6.0 }
0x2530   :  { %v7124_v48 = vpop.eup %7123 }
0x2531   :  { %2407 = vrot.lane.b32.xlu1 %v7124_v48, %s7231_s1 }
0x2535   :  { %2513 = vrot.lane.b32.xlu1 %v2421_v49, %s7232_s9 }
0x25a3   :  { %v2408_v21 = vpop.permute.xlu1 %2407 }
0x25a4   :  { %v2410_v4 = vmul.f32 %v2408_v21, %v2404_v9 }
0x25a6   :  { %v7720_v54 = vadd.f32 %v2410_v4, %v7645_v31 }
0x25a7   :  { %v2514_v51 = vpop.permute.xlu1 %2513 }
0x25a8   :  { %v2412_v56 = vsel %vm136_vm2, %v7720_v54, 0.0 }
0x25a9   :  { %v2413_v59 = vrot.slane %v2412_v56, 4 }
0x25ab   :  { %v2414_v60 = vadd.f32 %v2413_v59, %v2412_v56 }
0x25ad   :  { %v2415_v26 = vrot.slane %v2414_v60, 2 }
0x25af   :  { %v2416_v61 = vadd.f32 %v2415_v26, %v2414_v60 }
0x25b1   :  { %v2417_v62 = vrot.slane %v2416_v61, 1 }
0x25b3   :  { %v2418_v0 = vadd.f32 %v2417_v62, %v2416_v61 }
0x25b5   :  { %v2419_v27 = vmul.f32 0.5, %v2418_v0 }
0x25b7   :  { %v2420_v2 = vsub.f32 %v7720_v54, %v2419_v27 }
0x25b9   :  { %6782 = vmatmul.mubr.msk.f32.vlgmr.msra.gmra.mxu0 %vm147_vm4, %v2420_v2 }
0x25ba   :  { %6792 = vmatpush3.msra.mxu0 %v7654_v38  ;;  %6795 = vmatprep.mubr.msk.f32.mxu0 %vm7230_vm3, %v7229_v8 }
0x25bb   :  { %6793 = vmatprep.subr.mxu0 %v7229_v8 }
0x25bc   :  { %6794 = vmatpush3.msra.mxu0 %v7663_v1 }
0x25bd   :  { %6805 = vmatprep.subr.mxu0 %v7229_v8 }
0x2679   :  { %v2492_v31 = vpop.f32.mrf.mxu0 }
0x267a   :  { %v2493_v25 = vadd.f32 %v2492_v31, %v2421_v49 }
0x267b   :  { %v6783_v63 = vpop.f32.mrf.mxu0 }
0x267c   :  { %7125 = vtanh.f32 %v2493_v25  ;;  %v2496_v12 = vmax.f32 %v2493_v25, 0.0 }
0x267e   :  { %v2497_v13 = vmin.f32 %v2496_v12, 6.0 }
0x2689   :  { %v7126_v11 = vpop.eup %7125 }
0x268a   :  { %2500 = vrot.lane.b32.xlu0 %v7126_v11, %s7231_s1 }
0x26fc   :  { %v2501_v15 = vpop.permute.xlu0 %2500 }
0x26fd   :  { %v2503_v16 = vmul.f32 %v2501_v15, %v2497_v13 }
0x26ff   :  { %v2504_v17 = vsel %vm136_vm2, %v2503_v16, 0.0 }
0x2700   :  { %v2505_v22 = vrot.slane %v2504_v17, 4 }
0x2702   :  { %v2506_v23 = vadd.f32 %v2505_v22, %v2504_v17 }
0x2704   :  { %v2507_v40 = vrot.slane %v2506_v23, 2 }
0x2706   :  { %v2508_v24 = vadd.f32 %v2507_v40, %v2506_v23  ;;  %v2800_v23 = vrot.slane %v7322_v19, 6 }
0x2708   :  { %v2509_v44 = vrot.slane %v2508_v24, 1 }
0x270a   :  { %v2510_v50 = vadd.f32 %v2509_v44, %v2508_v24 }
0x270c   :  { %v2511_v29 = vmul.f32 0.5, %v2510_v50 }
0x270e   :  { %v2512_v30 = vsub.f32 %v2503_v16, %v2511_v29 }
0x2710   :  { %6789 = vmatmul.mubr.msk.f32.vlgmr.msra.gmra.mxu1 %vm147_vm4, %v2512_v30 }
0x2711   :  { %6799 = vmatpush3.msra.mxu1 %v7674_v57  ;;  %6802 = vmatprep.mubr.msk.f32.mxu1 %vm7230_vm3, %v7229_v8 }
0x2712   :  { %6800 = vmatprep.subr.mxu1 %v7229_v8 }
0x2713   :  { %6801 = vmatpush3.msra.mxu1 %v7683_v58 }
0x2714   :  { %6812 = vmatprep.subr.mxu1 %v7229_v8 }
0x27d0   :  { %v2585_v32 = vpop.f32.mrf.mxu1 }
0x27d1   :  { %v2586_v33 = vadd.f32 %v2585_v32, %v2514_v51 }
0x27d2   :  { %v6790_v34 = vpop.f32.mrf.mxu1 }
0x27d3   :  { %7127 = vtanh.f32 %v2586_v33  ;;  %v2589_v37 = vmax.f32 %v2586_v33, 0.0 }
0x27d5   :  { %v2590_v53 = vmin.f32 %v2589_v37, 6.0 }
0x27e0   :  { %v7128_v36 = vpop.eup %7127 }
0x27e1   :  { %2593 = vrot.lane.b32.xlu0 %v7128_v36, %s7231_s1 }
0x2853   :  { %v2594_v35 = vpop.permute.xlu0 %2593 }
0x2854   :  { %v2596_v55 = vmul.f32 %v2594_v35, %v2590_v53 }
0x2856   :  { %2598 = vrot.lane.b32.xlu1 %v2596_v55, %s7233_s12 }
0x285a   :  { %2614 = vrot.lane.b32.xlu1 %v2421_v49, %s7234_s13 }
0x285e   :  { %2706 = vrot.lane.b32.xlu1 %v2421_v49, %s7235_s18 }
0x28c8   :  { %v2599_v39 = vpop.permute.xlu1 %2598 }
0x28c9   :  { %v7746_v41 = vadd.f32 %v2599_v39, %v7694_v3 }
0x28cb   :  { %v2602_v7 = vsel %vm328_vm5, %v7746_v41, 0.0 }
0x28cc   :  { %v2603_v43 = vrot.slane %v2602_v7, 4  ;;  %v2615_v3 = vpop.permute.xlu1 %2614 }
0x28ce   :  { %v2604_v10 = vadd.f32 %v2603_v43, %v2602_v7 }
0x28d0   :  { %v2605_v45 = vrot.slane %v2604_v10, 2  ;;  %v2707_v13 = vpop.permute.xlu1 %2706 }
0x28d2   :  { %v2606_v5 = vadd.f32 %v2605_v45, %v2604_v10 }
0x28d4   :  { %v2607_v46 = vrot.slane %v2606_v5, 1 }
0x28d6   :  { %v2608_v47 = vadd.f32 %v2607_v46, %v2606_v5 }
0x28d8   :  { %v2609_v48 = vmul.f32 0.5, %v2608_v47 }
0x28da   :  { %v2610_v6 = vsub.f32 %v7746_v41, %v2609_v48 }
0x28dc   :  { %2612 = vrot.lane.b32.xlu0 %v2610_v6, %s7231_s1 }
0x294e   :  { %v2613_v9 = vpop.permute.xlu0 %2612 }
0x294f   :  { %6796 = vmatmul.mubr.msk.f32.vlgmr.msra.gmra.mxu0 %vm147_vm4, %v2613_v9 }
0x2950   :  { %6806 = vmatpush3.msra.mxu0 %v7606_v28  ;;  %6809 = vmatprep.mubr.msk.f32.mxu0 %vm7230_vm3, %v7229_v8 }
0x2951   :  { %6807 = vmatprep.subr.mxu0 %v7229_v8 }
0x2952   :  { %6808 = vmatpush3.msra.mxu0 %v7615_v52 }
0x2953   :  { %6819 = vmatprep.subr.mxu0 %v7229_v8 }
0x2a0f   :  { %v2685_v49 = vpop.f32.mrf.mxu0 }
0x2a10   :  { %v2686_v21 = vadd.f32 %v2685_v49, %v2615_v3 }
0x2a11   :  { %v6797_v4 = vpop.f32.mrf.mxu0 }
0x2a12   :  { %7129 = vtanh.f32 %v2686_v21  ;;  %v2689_v59 = vmax.f32 %v2686_v21, 0.0 }
0x2a14   :  { %v2690_v60 = vmin.f32 %v2689_v59, 6.0 }
0x2a1f   :  { %v7130_v56 = vpop.eup %7129 }
0x2a20   :  { %2693 = vrot.lane.b32.xlu0 %v7130_v56, %s7231_s1 }
0x2a92   :  { %v2694_v26 = vpop.permute.xlu0 %2693 }
0x2a93   :  { %v2696_v61 = vmul.f32 %v2694_v26, %v2690_v60 }
0x2a95   :  { %v2697_v62 = vsel %vm136_vm2, %v2696_v61, 0.0 }
0x2a96   :  { %v2698_v0 = vrot.slane %v2697_v62, 4 }
0x2a98   :  { %v2699_v27 = vadd.f32 %v2698_v0, %v2697_v62 }
0x2a9a   :  { %v2700_v2 = vrot.slane %v2699_v27, 2 }
0x2a9c   :  { %v2701_v31 = vadd.f32 %v2700_v2, %v2699_v27 }
0x2a9e   :  { %v2702_v25 = vrot.slane %v2701_v31, 1 }
0x2aa0   :  { %v2703_v63 = vadd.f32 %v2702_v25, %v2701_v31 }
0x2aa2   :  { %v2704_v11 = vmul.f32 0.5, %v2703_v63 }
0x2aa4   :  { %v2705_v12 = vsub.f32 %v2696_v61, %v2704_v11 }
0x2aa6   :  { %6803 = vmatmul.mubr.msk.f32.vlgmr.msra.gmra.mxu1 %vm147_vm4, %v2705_v12 }
0x2aa7   :  { %6813 = vmatpush3.msra.mxu1 %v7625_v14  ;;  %6816 = vmatprep.mubr.msk.f32.mxu1 %vm7230_vm3, %v7229_v8 }
0x2aa8   :  { %6814 = vmatprep.subr.mxu1 %v7229_v8 }
0x2aa9   :  { %6815 = vmatpush3.msra.mxu1 %v7634_v42 }
0x2aaa   :  { %6826 = vmatprep.subr.mxu1 %v7229_v8 }
0x2b66   :  { %v2778_v15 = vpop.f32.mrf.mxu1 }
0x2b67   :  { %v2779_v16 = vadd.f32 %v2778_v15, %v2707_v13 }
0x2b68   :  { %v6804_v17 = vpop.f32.mrf.mxu1 }
0x2b69   :  { %7131 = vtanh.f32 %v2779_v16  ;;  %v2782_v40 = vmax.f32 %v2779_v16, 0.0 }
0x2b6b   :  { %v2783_v24 = vmin.f32 %v2782_v40, 6.0 }
0x2b76   :  { %v7132_v22 = vpop.eup %7131 }
0x2b77   :  { %2786 = vrot.lane.b32.xlu0 %v7132_v22, %s7231_s1 }
0x2b7b   :  { %2892 = vrot.lane.b32.xlu0 %v2800_v23, %s7232_s9 }
0x2be9   :  { %v2787_v44 = vpop.permute.xlu0 %2786 }
0x2bea   :  { %v2789_v50 = vmul.f32 %v2787_v44, %v2783_v24 }
0x2bec   :  { %v7772_v29 = vadd.f32 %v2789_v50, %v7720_v54 }
0x2bed   :  { %v2893_v4 = vpop.permute.xlu0 %2892 }
0x2bee   :  { %v2791_v30 = vsel %vm136_vm2, %v7772_v29, 0.0 }
0x2bef   :  { %v2792_v51 = vrot.slane %v2791_v30, 4 }
0x2bf1   :  { %v2793_v32 = vadd.f32 %v2792_v51, %v2791_v30 }
0x2bf3   :  { %v2794_v33 = vrot.slane %v2793_v32, 2 }
0x2bf5   :  { %v2795_v34 = vadd.f32 %v2794_v33, %v2793_v32 }
0x2bf7   :  { %v2796_v36 = vrot.slane %v2795_v34, 1 }
0x2bf9   :  { %v2797_v37 = vadd.f32 %v2796_v36, %v2795_v34 }
0x2bfb   :  { %v2798_v53 = vmul.f32 0.5, %v2797_v37 }
0x2bfd   :  { %v2799_v19 = vsub.f32 %v7772_v29, %v2798_v53 }
0x2bff   :  { %6810 = vmatmul.mubr.msk.f32.vlgmr.msra.gmra.mxu0 %vm147_vm4, %v2799_v19 }
0x2c00   :  { %6820 = vmatpush3.msra.mxu0 %v7654_v38  ;;  %6823 = vmatprep.mubr.msk.f32.mxu0 %vm7230_vm3, %v7229_v8 }
0x2c01   :  { %6821 = vmatprep.subr.mxu0 %v7229_v8 }
0x2c02   :  { %6822 = vmatpush3.msra.mxu0 %v7663_v1 }
0x2c03   :  { %6833 = vmatprep.subr.mxu0 %v7229_v8 }
0x2cbf   :  { %v2871_v54 = vpop.f32.mrf.mxu0 }
0x2cc0   :  { %v2872_v35 = vadd.f32 %v2871_v54, %v2800_v23 }
0x2cc1   :  { %v6811_v55 = vpop.f32.mrf.mxu0 }
0x2cc2   :  { %7133 = vtanh.f32 %v2872_v35  ;;  %v2875_v7 = vmax.f32 %v2872_v35, 0.0 }
0x2cc4   :  { %v2876_v43 = vmin.f32 %v2875_v7, 6.0 }
0x2ccf   :  { %v7134_v39 = vpop.eup %7133 }
0x2cd0   :  { %2879 = vrot.lane.b32.xlu1 %v7134_v39, %s7231_s1 }
0x2d42   :  { %v2880_v10 = vpop.permute.xlu1 %2879 }
0x2d43   :  { %v2882_v45 = vmul.f32 %v2880_v10, %v2876_v43 }
0x2d45   :  { %v2883_v5 = vsel %vm136_vm2, %v2882_v45, 0.0 }
0x2d46   :  { %v2884_v46 = vrot.slane %v2883_v5, 4 }
0x2d48   :  { %v2885_v47 = vadd.f32 %v2884_v46, %v2883_v5 }
0x2d4a   :  { %v2886_v48 = vrot.slane %v2885_v47, 2 }
0x2d4c   :  { %v2887_v6 = vadd.f32 %v2886_v48, %v2885_v47 }
0x2d4e   :  { %v2888_v9 = vrot.slane %v2887_v6, 1 }
0x2d50   :  { %v2889_v3 = vadd.f32 %v2888_v9, %v2887_v6 }
0x2d52   :  { %v2890_v49 = vmul.f32 0.5, %v2889_v3 }
0x2d54   :  { %v2891_v21 = vsub.f32 %v2882_v45, %v2890_v49 }
0x2d56   :  { %6817 = vmatmul.mubr.msk.f32.vlgmr.msra.gmra.mxu1 %vm147_vm4, %v2891_v21 }
0x2d57   :  { %6827 = vmatpush3.msra.mxu1 %v7674_v57  ;;  %6830 = vmatprep.mubr.msk.f32.mxu1 %vm7230_vm3, %v7229_v8 }
0x2d58   :  { %6828 = vmatprep.subr.mxu1 %v7229_v8 }
0x2d59   :  { %6829 = vmatpush3.msra.mxu1 %v7683_v58 }
0x2d5a   :  { %6840 = vmatprep.subr.mxu1 %v7229_v8 }
0x2e16   :  { %v2964_v56 = vpop.f32.mrf.mxu1 }
0x2e17   :  { %v2965_v59 = vadd.f32 %v2964_v56, %v2893_v4 }
0x2e18   :  { %v6818_v60 = vpop.f32.mrf.mxu1 }
0x2e19   :  { %7135 = vtanh.f32 %v2965_v59  ;;  %v2968_v61 = vmax.f32 %v2965_v59, 0.0 }
0x2e1b   :  { %v2969_v62 = vmin.f32 %v2968_v61, 6.0 }
0x2e26   :  { %v7136_v26 = vpop.eup %7135 }
0x2e27   :  { %2972 = vrot.lane.b32.xlu1 %v7136_v26, %s7231_s1 }
0x2e99   :  { %v2973_v0 = vpop.permute.xlu1 %2972 }
0x2e9a   :  { %v2975_v27 = vmul.f32 %v2973_v0, %v2969_v62 }
0x2e9c   :  { %2977 = vrot.lane.b32.xlu0 %v2975_v27, %s7233_s12 }
0x2ea0   :  { %2993 = vrot.lane.b32.xlu0 %v2800_v23, %s7234_s13 }
0x2ea4   :  { %3085 = vrot.lane.b32.xlu0 %v2800_v23, %s7235_s18 }
0x2f0e   :  { %v2978_v2 = vpop.permute.xlu0 %2977 }
0x2f0f   :  { %v7798_v31 = vadd.f32 %v2978_v2, %v7746_v41 }
0x2f11   :  { %v2981_v25 = vsel %vm328_vm5, %v7798_v31, 0.0 }
0x2f12   :  { %v2982_v63 = vrot.slane %v2981_v25, 4  ;;  %v2994_v41 = vpop.permute.xlu0 %2993 }
0x2f14   :  { %v2983_v11 = vadd.f32 %v2982_v63, %v2981_v25 }
0x2f16   :  { %v2984_v12 = vrot.slane %v2983_v11, 2  ;;  %v3086_v7 = vpop.permute.xlu0 %3085 }
0x2f18   :  { %v2985_v13 = vadd.f32 %v2984_v12, %v2983_v11 }
0x2f1a   :  { %v2986_v15 = vrot.slane %v2985_v13, 1 }
0x2f1c   :  { %v2987_v16 = vadd.f32 %v2986_v15, %v2985_v13 }
0x2f1e   :  { %v2988_v17 = vmul.f32 0.5, %v2987_v16 }
0x2f20   :  { %v2989_v22 = vsub.f32 %v7798_v31, %v2988_v17 }
0x2f22   :  { %2991 = vrot.lane.b32.xlu1 %v2989_v22, %s7231_s1 }
0x2f94   :  { %v2992_v40 = vpop.permute.xlu1 %2991 }
0x2f95   :  { %6824 = vmatmul.mubr.msk.f32.vlgmr.msra.gmra.mxu0 %vm147_vm4, %v2992_v40 }
0x2f96   :  { %6834 = vmatpush3.msra.mxu0 %v7606_v28  ;;  %6837 = vmatprep.mubr.msk.f32.mxu0 %vm7230_vm3, %v7229_v8 }
0x2f97   :  { %6835 = vmatprep.subr.mxu0 %v7229_v8 }
0x2f98   :  { %6836 = vmatpush3.msra.mxu0 %v7615_v52 }
0x2f99   :  { %6847 = vmatprep.subr.mxu0 %v7229_v8 }
0x3055   :  { %v3064_v23 = vpop.f32.mrf.mxu0 }
0x3056   :  { %v3065_v24 = vadd.f32 %v3064_v23, %v2994_v41 }
0x3057   :  { %v6825_v44 = vpop.f32.mrf.mxu0 }
0x3058   :  { %7137 = vtanh.f32 %v3065_v24  ;;  %v3068_v30 = vmax.f32 %v3065_v24, 0.0 }
0x305a   :  { %v3069_v51 = vmin.f32 %v3068_v30, 6.0 }
0x3065   :  { %v7138_v50 = vpop.eup %7137 }
0x3066   :  { %3072 = vrot.lane.b32.xlu1 %v7138_v50, %s7231_s1 }
0x30d8   :  { %v3073_v32 = vpop.permute.xlu1 %3072 }
0x30d9   :  { %v3075_v33 = vmul.f32 %v3073_v32, %v3069_v51 }
0x30db   :  { %v3076_v34 = vsel %vm136_vm2, %v3075_v33, 0.0 }
0x30dc   :  { %v3077_v36 = vrot.slane %v3076_v34, 4 }
0x30de   :  { %v3078_v37 = vadd.f32 %v3077_v36, %v3076_v34 }
0x30e0   :  { %v3079_v53 = vrot.slane %v3078_v37, 2 }
0x30e2   :  { %v3080_v19 = vadd.f32 %v3079_v53, %v3078_v37 }
0x30e4   :  { %v3081_v54 = vrot.slane %v3080_v19, 1 }
0x30e6   :  { %v3082_v35 = vadd.f32 %v3081_v54, %v3080_v19 }
0x30e8   :  { %v3083_v55 = vmul.f32 0.5, %v3082_v35 }
0x30ea   :  { %v3084_v39 = vsub.f32 %v3075_v33, %v3083_v55 }
0x30ec   :  { %6831 = vmatmul.mubr.msk.f32.vlgmr.msra.gmra.mxu1 %vm147_vm4, %v3084_v39 }
0x30ed   :  { %6841 = vmatpush3.msra.mxu1 %v7625_v14  ;;  %6844 = vmatprep.mubr.msk.f32.mxu1 %vm7230_vm3, %v7229_v8 }
0x30ee   :  { %6842 = vmatprep.subr.mxu1 %v7229_v8 }
0x30ef   :  { %6843 = vmatpush3.msra.mxu1 %v7634_v42 }
0x30f0   :  { %6854 = vmatprep.subr.mxu1 %v7229_v8 }
0x31ac   :  { %v3157_v43 = vpop.f32.mrf.mxu1 }
0x31ad   :  { %v3158_v10 = vadd.f32 %v3157_v43, %v3086_v7 }
0x31ae   :  { %v6832_v45 = vpop.f32.mrf.mxu1 }
0x31af   :  { %7139 = vtanh.f32 %v3158_v10  ;;  %v3161_v46 = vmax.f32 %v3158_v10, 0.0 }
0x31b1   :  { %v3162_v47 = vmin.f32 %v3161_v46, 6.0 }
0x31bc   :  { %v7140_v5 = vpop.eup %7139 }
0x31bd   :  { %3165 = vrot.lane.b32.xlu1 %v7140_v5, %s7231_s1 }
0x31c1   :  { %3270 = vrot.lane.b32.xlu1 %v7324_v20, %s7232_s9 }
0x322f   :  { %v3166_v48 = vpop.permute.xlu1 %3165 }
0x3230   :  { %v3168_v6 = vmul.f32 %v3166_v48, %v3162_v47 }
0x3232   :  { %v7824_v9 = vadd.f32 %v3168_v6, %v7772_v29 }
0x3233   :  { %v3271_v24 = vpop.permute.xlu1 %3270 }
0x3234   :  { %v3170_v3 = vsel %vm136_vm2, %v7824_v9, 0.0 }
0x3235   :  { %v3171_v49 = vrot.slane %v3170_v3, 4 }
0x3237   :  { %v3172_v21 = vadd.f32 %v3171_v49, %v3170_v3 }
0x3239   :  { %v3173_v4 = vrot.slane %v3172_v21, 2 }
0x323b   :  { %v3174_v56 = vadd.f32 %v3173_v4, %v3172_v21 }
0x323d   :  { %v3175_v59 = vrot.slane %v3174_v56, 1 }
0x323f   :  { %v3176_v60 = vadd.f32 %v3175_v59, %v3174_v56 }
0x3241   :  { %v3177_v26 = vmul.f32 0.5, %v3176_v60 }
0x3243   :  { %v3178_v61 = vsub.f32 %v7824_v9, %v3177_v26 }
0x3245   :  { %6838 = vmatmul.mubr.msk.f32.vlgmr.msra.gmra.mxu0 %vm147_vm4, %v3178_v61 }
0x3246   :  { %6848 = vmatpush3.msra.mxu0 %v7654_v38  ;;  %6851 = vmatprep.mubr.msk.f32.mxu0 %vm7230_vm3, %v7229_v8 }
0x3247   :  { %6849 = vmatprep.subr.mxu0 %v7229_v8 }
0x3248   :  { %6850 = vmatpush3.msra.mxu0 %v7663_v1 }
0x3249   :  { %6861 = vmatprep.subr.mxu0 %v7229_v8 }
0x3305   :  { %v3248_v29 = vpop.f32.mrf.mxu0 }
0x3306   :  { %v3249_v62 = vadd.f32 %v3248_v29, %v7324_v20 }
0x3307   :  { %v6839_v0 = vpop.f32.mrf.mxu0 }
0x3308   :  { %7141 = vtanh.f32 %v3249_v62  ;;  %v3252_v2 = vmax.f32 %v3249_v62, 0.0 }
0x330a   :  { %v3253_v25 = vmin.f32 %v3252_v2, 6.0 }
0x3315   :  { %v7142_v27 = vpop.eup %7141 }
0x3316   :  { %3256 = vrot.lane.b32.xlu0 %v7142_v27, %s7231_s1 }
0x3388   :  { %v3257_v63 = vpop.permute.xlu0 %3256 }
0x3389   :  { %v3259_v11 = vmul.f32 %v3257_v63, %v3253_v25 }
0x338b   :  { %v3260_v12 = vsel %vm136_vm2, %v3259_v11, 0.0 }
0x338c   :  { %v3261_v13 = vrot.slane %v3260_v12, 4 }
0x338e   :  { %v3262_v15 = vadd.f32 %v3261_v13, %v3260_v12 }
0x3390   :  { %v3263_v16 = vrot.slane %v3262_v15, 2 }
0x3392   :  { %v3264_v17 = vadd.f32 %v3263_v16, %v3262_v15 }
0x3394   :  { %v3265_v22 = vrot.slane %v3264_v17, 1 }
0x3396   :  { %v3266_v40 = vadd.f32 %v3265_v22, %v3264_v17 }
0x3398   :  { %v3267_v41 = vmul.f32 0.5, %v3266_v40 }
0x339a   :  { %v3268_v23 = vsub.f32 %v3259_v11, %v3267_v41  ;;  %v3558_v11 = vrot.slane %v7324_v20, 2 }
0x339c   :  { %6845 = vmatmul.mubr.msk.f32.vlgmr.msra.gmra.mxu1 %vm147_vm4, %v3268_v23 }
0x339d   :  { %6855 = vmatpush3.msra.mxu1 %v7674_v57  ;;  %6858 = vmatprep.mubr.msk.f32.mxu1 %vm7230_vm3, %v7229_v8 }
0x339e   :  { %6856 = vmatprep.subr.mxu1 %v7229_v8 }
0x339f   :  { %6857 = vmatpush3.msra.mxu1 %v7683_v58 }
0x33a0   :  { %6868 = vmatprep.subr.mxu1 %v7229_v8 }
0x345c   :  { %v3342_v44 = vpop.f32.mrf.mxu1 }
0x345d   :  { %v3343_v50 = vadd.f32 %v3342_v44, %v3271_v24 }
0x345e   :  { %v6846_v30 = vpop.f32.mrf.mxu1 }
0x345f   :  { %7143 = vtanh.f32 %v3343_v50  ;;  %v3346_v32 = vmax.f32 %v3343_v50, 0.0 }
0x3461   :  { %v3347_v33 = vmin.f32 %v3346_v32, 6.0 }
0x346c   :  { %v7144_v51 = vpop.eup %7143 }
0x346d   :  { %3350 = vrot.lane.b32.xlu0 %v7144_v51, %s7231_s1 }
0x34df   :  { %v3351_v34 = vpop.permute.xlu0 %3350 }
0x34e0   :  { %v3353_v36 = vmul.f32 %v3351_v34, %v3347_v33 }
0x34e2   :  { %3355 = vrot.lane.b32.xlu1 %v3353_v36, %s7233_s12 }
0x34e6   :  { %3371 = vrot.lane.b32.xlu1 %v7324_v20, %s7234_s13 }
0x34ea   :  { %3463 = vrot.lane.b32.xlu1 %v7324_v20, %s7235_s18 }
0x3554   :  { %v3356_v37 = vpop.permute.xlu1 %3355 }
0x3555   :  { %v7853_v53 = vadd.f32 %v3356_v37, %v7798_v31 }
0x3557   :  { %v3359_v19 = vsel %vm328_vm5, %v7853_v53, 0.0 }
0x3558   :  { %v3360_v54 = vrot.slane %v3359_v19, 4  ;;  %v3372_v31 = vpop.permute.xlu1 %3371 }
0x355a   :  { %v3361_v35 = vadd.f32 %v3360_v54, %v3359_v19 }
0x355c   :  { %v3362_v55 = vrot.slane %v3361_v35, 2  ;;  %v3464_v0 = vpop.permute.xlu1 %3463 }
0x355e   :  { %v3363_v39 = vadd.f32 %v3362_v55, %v3361_v35 }
0x3560   :  { %v3364_v7 = vrot.slane %v3363_v39, 1 }
0x3562   :  { %v3365_v43 = vadd.f32 %v3364_v7, %v3363_v39 }
0x3564   :  { %v3366_v10 = vmul.f32 0.5, %v3365_v43 }
0x3566   :  { %v3367_v45 = vsub.f32 %v7853_v53, %v3366_v10 }
0x3568   :  { %3369 = vrot.lane.b32.xlu0 %v3367_v45, %s7231_s1 }
0x35da   :  { %v3370_v5 = vpop.permute.xlu0 %3369 }
0x35db   :  { %6852 = vmatmul.mubr.msk.f32.vlgmr.msra.gmra.mxu0 %vm147_vm4, %v3370_v5 }
0x35dc   :  { %6862 = vmatpush3.msra.mxu0 %v7606_v28  ;;  %6865 = vmatprep.mubr.msk.f32.mxu0 %vm7230_vm3, %v7229_v8 }
0x35dd   :  { %6863 = vmatprep.subr.mxu0 %v7229_v8 }
0x35de   :  { %6864 = vmatpush3.msra.mxu0 %v7615_v52 }
0x35df   :  { %6875 = vmatprep.subr.mxu0 %v7229_v8 }
0x369b   :  { %v3442_v46 = vpop.f32.mrf.mxu0 }
0x369c   :  { %v3443_v47 = vadd.f32 %v3442_v46, %v3372_v31 }
0x369d   :  { %v6853_v48 = vpop.f32.mrf.mxu0 }
0x369e   :  { %7145 = vtanh.f32 %v3443_v47  ;;  %v3446_v3 = vmax.f32 %v3443_v47, 0.0 }
0x36a0   :  { %v3447_v49 = vmin.f32 %v3446_v3, 6.0 }
0x36ab   :  { %v7146_v6 = vpop.eup %7145 }
0x36ac   :  { %3450 = vrot.lane.b32.xlu0 %v7146_v6, %s7231_s1 }
0x371e   :  { %v3451_v28 = vpop.permute.xlu0 %3450 }
0x371f   :  { %v3453_v21 = vmul.f32 %v3451_v28, %v3447_v49 }
0x3721   :  { %v3454_v4 = vsel %vm136_vm2, %v3453_v21, 0.0 }
0x3722   :  { %v3455_v56 = vrot.slane %v3454_v4, 4 }
0x3724   :  { %v3456_v59 = vadd.f32 %v3455_v56, %v3454_v4 }
0x3726   :  { %v3457_v60 = vrot.slane %v3456_v59, 2 }
0x3728   :  { %v3458_v52 = vadd.f32 %v3457_v60, %v3456_v59 }
0x372a   :  { %v3459_v26 = vrot.slane %v3458_v52, 1 }
0x372c   :  { %v3460_v61 = vadd.f32 %v3459_v26, %v3458_v52 }
0x372e   :  { %v3461_v29 = vmul.f32 0.5, %v3460_v61 }
0x3730   :  { %v3462_v62 = vsub.f32 %v3453_v21, %v3461_v29  ;;  %v7915_v29 = vld [vmem:[%s8343_s2 + $0x8] sm:$0xff] }
0x3732   :  { %6859 = vmatmul.mubr.msk.f32.vlgmr.msra.gmra.mxu1 %vm147_vm4, %v3462_v62  ;;  %v7924_v62 = vld [vmem:[%s8343_s2] sm:$0xff] }
0x3733   :  { %6869 = vmatpush3.msra.mxu1 %v7625_v14  ;;  %6872 = vmatprep.mubr.msk.f32.mxu1 %vm7230_vm3, %v7229_v8 }
0x3734   :  { %6870 = vmatprep.subr.mxu1 %v7229_v8 }
0x3735   :  { %6871 = vmatpush3.msra.mxu1 %v7634_v42 }
0x3736   :  { %6882 = vmatprep.subr.mxu1 %v7229_v8 }
0x37f2   :  { %v3535_v27 = vpop.f32.mrf.mxu1 }
0x37f3   :  { %v3536_v2 = vadd.f32 %v3535_v27, %v3464_v0 }
0x37f4   :  { %v6860_v25 = vpop.f32.mrf.mxu1 }
0x37f5   :  { %7147 = vtanh.f32 %v3536_v2  ;;  %v3539_v14 = vmax.f32 %v3536_v2, 0.0 }
0x37f7   :  { %v3540_v12 = vmin.f32 %v3539_v14, 6.0 }
0x3802   :  { %v7148_v63 = vpop.eup %7147 }
0x3803   :  { %3543 = vrot.lane.b32.xlu0 %v7148_v63, %s7231_s1 }
0x3807   :  { %3650 = vrot.lane.b32.xlu0 %v3558_v11, %s7232_s9 }
0x3875   :  { %v3544_v13 = vpop.permute.xlu0 %3543 }
0x3876   :  { %v3546_v15 = vmul.f32 %v3544_v13, %v3540_v12 }
0x3878   :  { %v7879_v42 = vadd.f32 %v3546_v15, %v7824_v9 }
0x3879   :  { %v3651_v10 = vpop.permute.xlu0 %3650 }
0x387a   :  { %v3549_v16 = vsel %vm136_vm2, %v7879_v42, 0.0 }
0x387b   :  { %v3550_v17 = vrot.slane %v3549_v16, 4 }
0x387d   :  { %v3551_v22 = vadd.f32 %v3550_v17, %v3549_v16 }
0x387f   :  { %v3552_v40 = vrot.slane %v3551_v22, 2 }
0x3881   :  { %v3553_v41 = vadd.f32 %v3552_v40, %v3551_v22 }
0x3883   :  { %v3554_v23 = vrot.slane %v3553_v41, 1 }
0x3885   :  { %v3555_v24 = vadd.f32 %v3554_v23, %v3553_v41 }
0x3887   :  { %v3556_v44 = vmul.f32 0.5, %v3555_v24 }
0x3889   :  { %v3557_v50 = vsub.f32 %v7879_v42, %v3556_v44 }
0x388b   :  { %6866 = vmatmul.mubr.msk.f32.vlgmr.msra.gmra.mxu0 %vm147_vm4, %v3557_v50  ;;  %v7934_v50 = vld [vmem:[%s8343_s2 + $0x18] sm:$0xff] }
0x388c   :  { %6876 = vmatpush3.msra.mxu0 %v7654_v38  ;;  %6879 = vmatprep.mubr.msk.f32.mxu0 %vm7230_vm3, %v7229_v8 }
0x388d   :  { %6877 = vmatprep.subr.mxu0 %v7229_v8 }
0x388e   :  { %6878 = vmatpush3.msra.mxu0 %v7663_v1 }
0x388f   :  { %6889 = vmatprep.subr.mxu0 %v7229_v8 }
0x394b   :  { %v3629_v9 = vpop.f32.mrf.mxu0 }
0x394c   :  { %v3630_v30 = vadd.f32 %v3629_v9, %v3558_v11  ;;  %v7943_v9 = vld [vmem:[%s8343_s2 + $0x10] sm:$0xff] }
0x394d   :  { %v6867_v51 = vpop.f32.mrf.mxu0 }
0x394e   :  { %7149 = vtanh.f32 %v3630_v30  ;;  %v3633_v33 = vmax.f32 %v3630_v30, 0.0 }
0x3950   :  { %v3634_v34 = vmin.f32 %v3633_v33, 6.0 }
0x395b   :  { %v7150_v32 = vpop.eup %7149 }
0x395c   :  { %3637 = vrot.lane.b32.xlu1 %v7150_v32, %s7231_s1 }
0x39ce   :  { %v3638_v36 = vpop.permute.xlu1 %3637 }
0x39cf   :  { %v3640_v38 = vmul.f32 %v3638_v36, %v3634_v34  ;;  %v7949_v36 = vrot.slane %v7324_v20, 4 }
0x39d1   :  { %v3641_v37 = vsel %vm136_vm2, %v3640_v38, 0.0 }
0x39d2   :  { %v3642_v19 = vrot.slane %v3641_v37, 4 }
0x39d4   :  { %v3643_v54 = vadd.f32 %v3642_v19, %v3641_v37 }
0x39d6   :  { %v3644_v35 = vrot.slane %v3643_v54, 2 }
0x39d8   :  { %v3645_v55 = vadd.f32 %v3644_v35, %v3643_v54 }
0x39da   :  { %v3646_v1 = vrot.slane %v3645_v55, 1 }
0x39dc   :  { %v3647_v39 = vadd.f32 %v3646_v1, %v3645_v55 }
0x39de   :  { %v3648_v7 = vmul.f32 0.5, %v3647_v39 }
0x39e0   :  { %v3649_v43 = vsub.f32 %v3640_v38, %v3648_v7 }
0x39e2   :  { %6873 = vmatmul.mubr.msk.f32.vlgmr.msra.gmra.mxu1 %vm147_vm4, %v3649_v43 }
0x39e3   :  { %6883 = vmatpush3.msra.mxu1 %v7674_v57  ;;  %6886 = vmatprep.mubr.msk.f32.mxu1 %vm7230_vm3, %v7229_v8 }
0x39e4   :  { %6884 = vmatprep.subr.mxu1 %v7229_v8 }
0x39e5   :  { %6885 = vmatpush3.msra.mxu1 %v7683_v58 }
0x39e6   :  { %6896 = vmatprep.subr.mxu1 %v7229_v8 }
0x3aa2   :  { %v3722_v45 = vpop.f32.mrf.mxu1 }
0x3aa3   :  { %v3723_v5 = vadd.f32 %v3722_v45, %v3651_v10 }
0x3aa4   :  { %v6874_v31 = vpop.f32.mrf.mxu1 }
0x3aa5   :  { %7151 = vtanh.f32 %v3723_v5  ;;  %v3726_v47 = vmax.f32 %v3723_v5, 0.0 }
0x3aa7   :  { %v3727_v48 = vmin.f32 %v3726_v47, 6.0  ;;  %v7972_v47 = vld [vmem:[%s8343_s2 + $0x20] sm:$0xff] }
0x3ab2   :  { %v7152_v46 = vpop.eup %7151 }
0x3ab3   :  { %3730 = vrot.lane.b32.xlu1 %v7152_v46, %s7231_s1  ;;  %v7963_v46 = vld [vmem:[%s8343_s2 + $0x28] sm:$0xff] }
0x3b25   :  { %v3731_v57 = vpop.permute.xlu1 %3730 }
0x3b26   :  { %v3733_v6 = vmul.f32 %v3731_v57, %v3727_v48 }
0x3b28   :  { %3735 = vrot.lane.b32.xlu0 %v3733_v6, %s7233_s12 }
0x3b2c   :  { %3751 = vrot.lane.b32.xlu0 %v3558_v11, %s7234_s13 }
0x3b30   :  { %3843 = vrot.lane.b32.xlu0 %v3558_v11, %s7235_s18 }
0x3b9a   :  { %v3736_v58 = vpop.permute.xlu0 %3735 }
0x3b9b   :  { %v7905_v3 = vadd.f32 %v3736_v58, %v7853_v53 }
0x3b9d   :  { %v3739_v49 = vsel %vm328_vm5, %v7905_v3, 0.0 }
0x3b9e   :  { %v3740_v28 = vrot.slane %v3739_v49, 4  ;;  %v3752_v0 = vpop.permute.xlu0 %3751 }
0x3ba0   :  { %v3741_v21 = vadd.f32 %v3740_v28, %v3739_v49 }
0x3ba2   :  { %v3742_v4 = vrot.slane %v3741_v21, 2  ;;  %v3844_v30 = vpop.permute.xlu0 %3843 }
0x3ba4   :  { %v3743_v56 = vadd.f32 %v3742_v4, %v3741_v21 }
0x3ba6   :  { %v3744_v59 = vrot.slane %v3743_v56, 1 }
0x3ba8   :  { %v3745_v60 = vadd.f32 %v3744_v59, %v3743_v56 }
0x3baa   :  { %v3746_v52 = vmul.f32 0.5, %v3745_v60 }
0x3bac   :  { %v3747_v26 = vsub.f32 %v7905_v3, %v3746_v52 }
0x3bae   :  { %3749 = vrot.lane.b32.xlu1 %v3747_v26, %s7231_s1 }
0x3c20   :  { %v3750_v61 = vpop.permute.xlu1 %3749 }
0x3c21   :  { %6880 = vmatmul.mubr.msk.f32.vlgmr.msra.gmra.mxu0 %vm147_vm4, %v3750_v61 }
0x3c22   :  { %6890 = vmatpush3.msra.mxu0 %v7915_v29  ;;  %6893 = vmatprep.mubr.msk.f32.mxu0 %vm7230_vm3, %v7229_v8 }
0x3c23   :  { %6891 = vmatprep.subr.mxu0 %v7229_v8 }
0x3c24   :  { %6892 = vmatpush3.msra.mxu0 %v7924_v62 }
0x3c25   :  { %6903 = vmatprep.subr.mxu0 %v7229_v8 }
0x3ce1   :  { %v3822_v27 = vpop.f32.mrf.mxu0 }
0x3ce2   :  { %v3823_v2 = vadd.f32 %v3822_v27, %v3752_v0 }
0x3ce3   :  { %v6881_v25 = vpop.f32.mrf.mxu0 }
0x3ce4   :  { %7153 = vtanh.f32 %v3823_v2  ;;  %v3826_v11 = vmax.f32 %v3823_v2, 0.0  ;;  %v7983_v25 = vld [vmem:[%s8343_s2 + $0x38] sm:$0xff] }
0x3ce6   :  { %v3827_v14 = vmin.f32 %v3826_v11, 6.0 }
0x3cf1   :  { %v7154_v63 = vpop.eup %7153 }
0x3cf2   :  { %3830 = vrot.lane.b32.xlu1 %v7154_v63, %s7231_s1  ;;  %v7992_v63 = vld [vmem:[%s8343_s2 + $0x30] sm:$0xff] }
0x3d64   :  { %v3831_v12 = vpop.permute.xlu1 %3830 }
0x3d65   :  { %v3833_v13 = vmul.f32 %v3831_v12, %v3827_v14 }
0x3d67   :  { %v3834_v15 = vsel %vm136_vm2, %v3833_v13, 0.0 }
0x3d68   :  { %v3835_v16 = vrot.slane %v3834_v15, 4 }
0x3d6a   :  { %v3836_v17 = vadd.f32 %v3835_v16, %v3834_v15 }
0x3d6c   :  { %v3837_v22 = vrot.slane %v3836_v17, 2 }
0x3d6e   :  { %v3838_v40 = vadd.f32 %v3837_v22, %v3836_v17 }
0x3d70   :  { %v3839_v41 = vrot.slane %v3838_v40, 1 }
0x3d72   :  { %v3840_v23 = vadd.f32 %v3839_v41, %v3838_v40 }
0x3d74   :  { %v3841_v24 = vmul.f32 0.5, %v3840_v23 }
0x3d76   :  { %v3842_v44 = vsub.f32 %v3833_v13, %v3841_v24 }
0x3d78   :  { %6887 = vmatmul.mubr.msk.f32.vlgmr.msra.gmra.mxu1 %vm147_vm4, %v3842_v44 }
0x3d79   :  { %6897 = vmatpush3.msra.mxu1 %v7934_v50  ;;  %6900 = vmatprep.mubr.msk.f32.mxu1 %vm7230_vm3, %v7229_v8 }
0x3d7a   :  { %6898 = vmatprep.subr.mxu1 %v7229_v8 }
0x3d7b   :  { %6899 = vmatpush3.msra.mxu1 %v7943_v9 }
0x3d7c   :  { %6910 = vmatprep.subr.mxu1 %v7229_v8 }
0x3e38   :  { %v3915_v51 = vpop.f32.mrf.mxu1 }
0x3e39   :  { %v3916_v32 = vadd.f32 %v3915_v51, %v3844_v30 }
0x3e3a   :  { %v6888_v33 = vpop.f32.mrf.mxu1 }
0x3e3b   :  { %7155 = vtanh.f32 %v3916_v32  ;;  %v3919_v38 = vmax.f32 %v3916_v32, 0.0 }
0x3e3d   :  { %v3920_v37 = vmin.f32 %v3919_v38, 6.0 }
0x3e48   :  { %v7156_v34 = vpop.eup %7155 }
0x3e49   :  { %3923 = vrot.lane.b32.xlu1 %v7156_v34, %s7231_s1 }
0x3e4d   :  { %4030 = vrot.lane.b32.xlu1 %v7949_v36, %s7232_s9 }
0x3ebb   :  { %v3924_v19 = vpop.permute.xlu1 %3923 }
0x3ebc   :  { %v3926_v54 = vmul.f32 %v3924_v19, %v3920_v37 }
0x3ebe   :  { %v7954_v35 = vadd.f32 %v3926_v54, %v7879_v42 }
0x3ebf   :  { %v4031_v11 = vpop.permute.xlu1 %4030 }
0x3ec0   :  { %v3929_v55 = vsel %vm136_vm2, %v7954_v35, 0.0 }
0x3ec1   :  { %v3930_v1 = vrot.slane %v3929_v55, 4 }
0x3ec3   :  { %v3931_v39 = vadd.f32 %v3930_v1, %v3929_v55 }
0x3ec5   :  { %v3932_v7 = vrot.slane %v3931_v39, 2 }
0x3ec7   :  { %v3933_v43 = vadd.f32 %v3932_v7, %v3931_v39 }
0x3ec9   :  { %v3934_v10 = vrot.slane %v3933_v43, 1 }
0x3ecb   :  { %v3935_v45 = vadd.f32 %v3934_v10, %v3933_v43 }
0x3ecd   :  { %v3936_v5 = vmul.f32 0.5, %v3935_v45 }
0x3ecf   :  { %v3937_v31 = vsub.f32 %v7954_v35, %v3936_v5 }
0x3ed1   :  { %6894 = vmatmul.mubr.msk.f32.vlgmr.msra.gmra.mxu0 %vm147_vm4, %v3937_v31 }
0x3ed2   :  { %6904 = vmatpush3.msra.mxu0 %v7963_v46  ;;  %6907 = vmatprep.mubr.msk.f32.mxu0 %vm7230_vm3, %v7229_v8 }
0x3ed3   :  { %6905 = vmatprep.subr.mxu0 %v7229_v8 }
0x3ed4   :  { %6906 = vmatpush3.msra.mxu0 %v7972_v47 }
0x3ed5   :  { %6917 = vmatprep.subr.mxu0 %v7229_v8 }
0x3f91   :  { %v4009_v48 = vpop.f32.mrf.mxu0 }
0x3f92   :  { %v4010_v57 = vadd.f32 %v4009_v48, %v7949_v36 }
0x3f93   :  { %v6895_v6 = vpop.f32.mrf.mxu0 }
0x3f94   :  { %7157 = vtanh.f32 %v4010_v57  ;;  %v4013_v49 = vmax.f32 %v4010_v57, 0.0 }
0x3f96   :  { %v4014_v28 = vmin.f32 %v4013_v49, 6.0 }
0x3fa1   :  { %v7158_v58 = vpop.eup %7157 }
0x3fa2   :  { %4017 = vrot.lane.b32.xlu0 %v7158_v58, %s7231_s1 }
0x4014   :  { %v4018_v21 = vpop.permute.xlu0 %4017 }
0x4015   :  { %v4020_v4 = vmul.f32 %v4018_v21, %v4014_v28 }
0x4017   :  { %v4021_v56 = vsel %vm136_vm2, %v4020_v4, 0.0 }
0x4018   :  { %v4022_v59 = vrot.slane %v4021_v56, 4 }
0x401a   :  { %v4023_v60 = vadd.f32 %v4022_v59, %v4021_v56 }
0x401c   :  { %v4024_v52 = vrot.slane %v4023_v60, 2 }
0x401e   :  { %v4025_v26 = vadd.f32 %v4024_v52, %v4023_v60 }
0x4020   :  { %v4026_v61 = vrot.slane %v4025_v26, 1 }
0x4022   :  { %v4027_v0 = vadd.f32 %v4026_v61, %v4025_v26  ;;  %v4318_v26 = vrot.slane %v7324_v20, 6 }
0x4024   :  { %v4028_v27 = vmul.f32 0.5, %v4027_v0 }
0x4026   :  { %v4029_v2 = vsub.f32 %v4020_v4, %v4028_v27 }
0x4028   :  { %6901 = vmatmul.mubr.msk.f32.vlgmr.msra.gmra.mxu1 %vm147_vm4, %v4029_v2 }
0x4029   :  { %6911 = vmatpush3.msra.mxu1 %v7983_v25  ;;  %6914 = vmatprep.mubr.msk.f32.mxu1 %vm7230_vm3, %v7229_v8 }
0x402a   :  { %6912 = vmatprep.subr.mxu1 %v7229_v8 }
0x402b   :  { %6913 = vmatpush3.msra.mxu1 %v7992_v63 }
0x402c   :  { %6924 = vmatprep.subr.mxu1 %v7229_v8 }
0x40e8   :  { %v4102_v14 = vpop.f32.mrf.mxu1 }
0x40e9   :  { %v4103_v12 = vadd.f32 %v4102_v14, %v4031_v11 }
0x40ea   :  { %v6902_v13 = vpop.f32.mrf.mxu1 }
0x40eb   :  { %7159 = vtanh.f32 %v4103_v12  ;;  %v4106_v16 = vmax.f32 %v4103_v12, 0.0 }
0x40ed   :  { %v4107_v17 = vmin.f32 %v4106_v16, 6.0 }
0x40f8   :  { %v7160_v15 = vpop.eup %7159 }
0x40f9   :  { %4110 = vrot.lane.b32.xlu0 %v7160_v15, %s7231_s1 }
0x416b   :  { %v4111_v22 = vpop.permute.xlu0 %4110 }
0x416c   :  { %v4113_v40 = vmul.f32 %v4111_v22, %v4107_v17 }
0x416e   :  { %4115 = vrot.lane.b32.xlu1 %v4113_v40, %s7233_s12 }
0x4172   :  { %4131 = vrot.lane.b32.xlu1 %v7949_v36, %s7234_s13 }
0x4176   :  { %4223 = vrot.lane.b32.xlu1 %v7949_v36, %s7235_s18 }
0x41e0   :  { %v4116_v41 = vpop.permute.xlu1 %4115 }
0x41e1   :  { %v8003_v23 = vadd.f32 %v4116_v41, %v7905_v3 }
0x41e3   :  { %v4119_v24 = vsel %vm328_vm5, %v8003_v23, 0.0 }
0x41e4   :  { %v4120_v44 = vrot.slane %v4119_v24, 4  ;;  %v4132_v36 = vpop.permute.xlu1 %4131 }
0x41e6   :  { %v4121_v30 = vadd.f32 %v4120_v44, %v4119_v24 }
0x41e8   :  { %v4122_v51 = vrot.slane %v4121_v30, 2  ;;  %v4224_v4 = vpop.permute.xlu1 %4223 }
0x41ea   :  { %v4123_v32 = vadd.f32 %v4122_v51, %v4121_v30 }
0x41ec   :  { %v4124_v33 = vrot.slane %v4123_v32, 1 }
0x41ee   :  { %v4125_v34 = vadd.f32 %v4124_v33, %v4123_v32 }
0x41f0   :  { %v4126_v38 = vmul.f32 0.5, %v4125_v34 }
0x41f2   :  { %v4127_v37 = vsub.f32 %v8003_v23, %v4126_v38 }
0x41f4   :  { %4129 = vrot.lane.b32.xlu0 %v4127_v37, %s7231_s1 }
0x4266   :  { %v4130_v19 = vpop.permute.xlu0 %4129 }
0x4267   :  { %6908 = vmatmul.mubr.msk.f32.vlgmr.msra.gmra.mxu0 %vm147_vm4, %v4130_v19 }
0x4268   :  { %6918 = vmatpush3.msra.mxu0 %v7915_v29  ;;  %6921 = vmatprep.mubr.msk.f32.mxu0 %vm7230_vm3, %v7229_v8 }
0x4269   :  { %6919 = vmatprep.subr.mxu0 %v7229_v8 }
0x426a   :  { %6920 = vmatpush3.msra.mxu0 %v7924_v62 }
0x426b   :  { %6931 = vmatprep.subr.mxu0 %v7229_v8 }
0x4327   :  { %v4202_v54 = vpop.f32.mrf.mxu0 }
0x4328   :  { %v4203_v55 = vadd.f32 %v4202_v54, %v4132_v36 }
0x4329   :  { %v6909_v1 = vpop.f32.mrf.mxu0 }
0x432a   :  { %7161 = vtanh.f32 %v4203_v55  ;;  %v4206_v7 = vmax.f32 %v4203_v55, 0.0 }
0x432c   :  { %v4207_v43 = vmin.f32 %v4206_v7, 6.0 }
0x4337   :  { %v7162_v39 = vpop.eup %7161 }
0x4338   :  { %4210 = vrot.lane.b32.xlu0 %v7162_v39, %s7231_s1 }
0x43aa   :  { %v4211_v10 = vpop.permute.xlu0 %4210 }
0x43ab   :  { %v4213_v45 = vmul.f32 %v4211_v10, %v4207_v43 }
0x43ad   :  { %v4214_v5 = vsel %vm136_vm2, %v4213_v45, 0.0 }
0x43ae   :  { %v4215_v31 = vrot.slane %v4214_v5, 4 }
0x43b0   :  { %v4216_v48 = vadd.f32 %v4215_v31, %v4214_v5 }
0x43b2   :  { %v4217_v57 = vrot.slane %v4216_v48, 2 }
0x43b4   :  { %v4218_v6 = vadd.f32 %v4217_v57, %v4216_v48 }
0x43b6   :  { %v4219_v58 = vrot.slane %v4218_v6, 1 }
0x43b8   :  { %v4220_v49 = vadd.f32 %v4219_v58, %v4218_v6 }
0x43ba   :  { %v4221_v28 = vmul.f32 0.5, %v4220_v49 }
0x43bc   :  { %v4222_v21 = vsub.f32 %v4213_v45, %v4221_v28 }
0x43be   :  { %6915 = vmatmul.mubr.msk.f32.vlgmr.msra.gmra.mxu1 %vm147_vm4, %v4222_v21 }
0x43bf   :  { %6925 = vmatpush3.msra.mxu1 %v7934_v50  ;;  %6928 = vmatprep.mubr.msk.f32.mxu1 %vm7230_vm3, %v7229_v8 }
0x43c0   :  { %6926 = vmatprep.subr.mxu1 %v7229_v8 }
0x43c1   :  { %6927 = vmatpush3.msra.mxu1 %v7943_v9 }
0x43c2   :  { %6938 = vmatprep.subr.mxu1 %v7229_v8 }
0x447e   :  { %v4295_v56 = vpop.f32.mrf.mxu1 }
0x447f   :  { %v4296_v59 = vadd.f32 %v4295_v56, %v4224_v4 }
0x4480   :  { %v6916_v60 = vpop.f32.mrf.mxu1 }
0x4481   :  { %7163 = vtanh.f32 %v4296_v59  ;;  %v4299_v61 = vmax.f32 %v4296_v59, 0.0 }
0x4483   :  { %v4300_v0 = vmin.f32 %v4299_v61, 6.0 }
0x448e   :  { %v7164_v52 = vpop.eup %7163 }
0x448f   :  { %4303 = vrot.lane.b32.xlu0 %v7164_v52, %s7231_s1 }
0x4493   :  { %4410 = vrot.lane.b32.xlu0 %v4318_v26, %s7232_s9 }
0x4501   :  { %v4304_v27 = vpop.permute.xlu0 %4303 }
0x4502   :  { %v4306_v2 = vmul.f32 %v4304_v27, %v4300_v0 }
0x4504   :  { %v8029_v11 = vadd.f32 %v4306_v2, %v7954_v35 }
0x4505   :  { %v4411_v43 = vpop.permute.xlu0 %4410 }
0x4506   :  { %v4309_v14 = vsel %vm136_vm2, %v8029_v11, 0.0 }
0x4507   :  { %v4310_v12 = vrot.slane %v4309_v14, 4 }
0x4509   :  { %v4311_v13 = vadd.f32 %v4310_v12, %v4309_v14 }
0x450b   :  { %v4312_v15 = vrot.slane %v4311_v13, 2 }
0x450d   :  { %v4313_v16 = vadd.f32 %v4312_v15, %v4311_v13 }
0x450f   :  { %v4314_v17 = vrot.slane %v4313_v16, 1 }
0x4511   :  { %v4315_v22 = vadd.f32 %v4314_v17, %v4313_v16 }
0x4513   :  { %v4316_v40 = vmul.f32 0.5, %v4315_v22 }
0x4515   :  { %v4317_v20 = vsub.f32 %v8029_v11, %v4316_v40 }
0x4517   :  { %6922 = vmatmul.mubr.msk.f32.vlgmr.msra.gmra.mxu0 %vm147_vm4, %v4317_v20 }
0x4518   :  { %6932 = vmatpush3.msra.mxu0 %v7963_v46  ;;  %6935 = vmatprep.mubr.msk.f32.mxu0 %vm7230_vm3, %v7229_v8 }
0x4519   :  { %6933 = vmatprep.subr.mxu0 %v7229_v8 }
0x451a   :  { %6934 = vmatpush3.msra.mxu0 %v7972_v47 }
0x451b   :  { %6945 = vmatprep.subr.mxu0 %v7229_v8 }
0x45d7   :  { %v4389_v41 = vpop.f32.mrf.mxu0 }
0x45d8   :  { %v4390_v24 = vadd.f32 %v4389_v41, %v4318_v26 }
0x45d9   :  { %v6923_v44 = vpop.f32.mrf.mxu0 }
0x45da   :  { %7165 = vtanh.f32 %v4390_v24  ;;  %v4393_v51 = vmax.f32 %v4390_v24, 0.0 }
0x45dc   :  { %v4394_v32 = vmin.f32 %v4393_v51, 6.0 }
0x45e7   :  { %v7166_v30 = vpop.eup %7165 }
0x45e8   :  { %4397 = vrot.lane.b32.xlu1 %v7166_v30, %s7231_s1 }
0x465a   :  { %v4398_v33 = vpop.permute.xlu1 %4397 }
0x465b   :  { %v4400_v34 = vmul.f32 %v4398_v33, %v4394_v32 }
0x465d   :  { %v4401_v38 = vsel %vm136_vm2, %v4400_v34, 0.0 }
0x465e   :  { %v4402_v37 = vrot.slane %v4401_v38, 4 }
0x4660   :  { %v4403_v19 = vadd.f32 %v4402_v37, %v4401_v38 }
0x4662   :  { %v4404_v36 = vrot.slane %v4403_v19, 2 }
0x4664   :  { %v4405_v54 = vadd.f32 %v4404_v36, %v4403_v19 }
0x4666   :  { %v4406_v55 = vrot.slane %v4405_v54, 1 }
0x4668   :  { %v4407_v1 = vadd.f32 %v4406_v55, %v4405_v54 }
0x466a   :  { %v4408_v39 = vmul.f32 0.5, %v4407_v1 }
0x466c   :  { %v4409_v7 = vsub.f32 %v4400_v34, %v4408_v39 }
0x466e   :  { %6929 = vmatmul.mubr.msk.f32.vlgmr.msra.gmra.mxu1 %vm147_vm4, %v4409_v7 }
0x466f   :  { %6939 = vmatpush3.msra.mxu1 %v7983_v25  ;;  %6942 = vmatprep.mubr.msk.f32.mxu1 %vm7230_vm3, %v7229_v8 }
0x4670   :  { %6940 = vmatprep.subr.mxu1 %v7229_v8 }
0x4671   :  { %6941 = vmatpush3.msra.mxu1 %v7992_v63 }
0x4672   :  { %6952 = vmatprep.subr.mxu1 %v7229_v8 }
0x472e   :  { %v4482_v10 = vpop.f32.mrf.mxu1 }
0x472f   :  { %v4483_v45 = vadd.f32 %v4482_v10, %v4411_v43 }
0x4730   :  { %v6930_v5 = vpop.f32.mrf.mxu1 }
0x4731   :  { %7167 = vtanh.f32 %v4483_v45  ;;  %v4486_v48 = vmax.f32 %v4483_v45, 0.0 }
0x4733   :  { %v4487_v57 = vmin.f32 %v4486_v48, 6.0 }
0x473e   :  { %v7168_v31 = vpop.eup %7167 }
0x473f   :  { %4490 = vrot.lane.b32.xlu1 %v7168_v31, %s7231_s1 }
0x47b1   :  { %v4491_v6 = vpop.permute.xlu1 %4490 }
0x47b2   :  { %v4493_v58 = vmul.f32 %v4491_v6, %v4487_v57 }
0x47b4   :  { %4495 = vrot.lane.b32.xlu0 %v4493_v58, %s7233_s12 }
0x47b8   :  { %4511 = vrot.lane.b32.xlu0 %v4318_v26, %s7234_s13 }
0x47bc   :  { %4603 = vrot.lane.b32.xlu0 %v4318_v26, %s7235_s18 }
0x4826   :  { %v4496_v49 = vpop.permute.xlu0 %4495 }
0x4827   :  { %v8055_v28 = vadd.f32 %v4496_v49, %v8003_v23 }
0x4829   :  { %v4499_v21 = vsel %vm328_vm5, %v8055_v28, 0.0 }
0x482a   :  { %v4500_v4 = vrot.slane %v4499_v21, 4  ;;  %v4512_v26 = vpop.permute.xlu0 %4511 }
0x482c   :  { %v4501_v56 = vadd.f32 %v4500_v4, %v4499_v21 }
0x482e   :  { %v4502_v59 = vrot.slane %v4501_v56, 2  ;;  %v4604_v38 = vpop.permute.xlu0 %4603 }
0x4830   :  { %v4503_v60 = vadd.f32 %v4502_v59, %v4501_v56 }
0x4832   :  { %v4504_v52 = vrot.slane %v4503_v60, 1 }
0x4834   :  { %v4505_v61 = vadd.f32 %v4504_v52, %v4503_v60 }
0x4836   :  { %v4506_v0 = vmul.f32 0.5, %v4505_v61 }
0x4838   :  { %v4507_v27 = vsub.f32 %v8055_v28, %v4506_v0 }
0x483a   :  { %4509 = vrot.lane.b32.xlu1 %v4507_v27, %s7231_s1 }
0x48ac   :  { %v4510_v2 = vpop.permute.xlu1 %4509 }
0x48ad   :  { %6936 = vmatmul.mubr.msk.f32.vlgmr.msra.gmra.mxu0 %vm147_vm4, %v4510_v2 }
0x48ae   :  { %6946 = vmatpush3.msra.mxu0 %v7915_v29  ;;  %6949 = vmatprep.mubr.msk.f32.mxu0 %vm7230_vm3, %v7229_v8 }
0x48af   :  { %6947 = vmatprep.subr.mxu0 %v7229_v8 }
0x48b0   :  { %6948 = vmatpush3.msra.mxu0 %v7924_v62 }
0x48b1   :  { %6959 = vmatprep.subr.mxu0 %v7229_v8 }
0x496d   :  { %v4582_v14 = vpop.f32.mrf.mxu0 }
0x496e   :  { %v4583_v12 = vadd.f32 %v4582_v14, %v4512_v26 }
0x496f   :  { %v6937_v13 = vpop.f32.mrf.mxu0 }
0x4970   :  { %7169 = vtanh.f32 %v4583_v12  ;;  %v4586_v16 = vmax.f32 %v4583_v12, 0.0 }
0x4972   :  { %v4587_v17 = vmin.f32 %v4586_v16, 6.0 }
0x497d   :  { %v7170_v15 = vpop.eup %7169 }
0x497e   :  { %4590 = vrot.lane.b32.xlu1 %v7170_v15, %s7231_s1 }
0x49f0   :  { %v4591_v22 = vpop.permute.xlu1 %4590 }
0x49f1   :  { %v4593_v40 = vmul.f32 %v4591_v22, %v4587_v17 }
0x49f3   :  { %v4594_v20 = vsel %vm136_vm2, %v4593_v40, 0.0 }
0x49f4   :  { %v4595_v41 = vrot.slane %v4594_v20, 4 }
0x49f6   :  { %v4596_v24 = vadd.f32 %v4595_v41, %v4594_v20 }
0x49f8   :  { %v4597_v44 = vrot.slane %v4596_v24, 2 }
0x49fa   :  { %v4598_v30 = vadd.f32 %v4597_v44, %v4596_v24 }
0x49fc   :  { %v4599_v51 = vrot.slane %v4598_v30, 1 }
0x49fe   :  { %v4600_v32 = vadd.f32 %v4599_v51, %v4598_v30 }
0x4a00   :  { %v4601_v33 = vmul.f32 0.5, %v4600_v32 }
0x4a02   :  { %v4602_v34 = vsub.f32 %v4593_v40, %v4601_v33 }
0x4a04   :  { %6943 = vmatmul.mubr.msk.f32.vlgmr.msra.gmra.mxu1 %vm147_vm4, %v4602_v34 }
0x4a05   :  { %6953 = vmatpush3.msra.mxu1 %v7934_v50  ;;  %6956 = vmatprep.mubr.msk.f32.mxu1 %vm7230_vm3, %v7229_v8 }
0x4a06   :  { %6954 = vmatprep.subr.mxu1 %v7229_v8 }
0x4a07   :  { %6955 = vmatpush3.msra.mxu1 %v7943_v9 }
0x4a08   :  { %6966 = vmatprep.subr.mxu1 %v7229_v8 }
0x4ac4   :  { %v4675_v37 = vpop.f32.mrf.mxu1 }
0x4ac5   :  { %v4676_v19 = vadd.f32 %v4675_v37, %v4604_v38 }
0x4ac6   :  { %v6944_v36 = vpop.f32.mrf.mxu1 }
0x4ac7   :  { %7171 = vtanh.f32 %v4676_v19  ;;  %v4679_v55 = vmax.f32 %v4676_v19, 0.0 }
0x4ac9   :  { %v4680_v1 = vmin.f32 %v4679_v55, 6.0 }
0x4ad4   :  { %v7172_v54 = vpop.eup %7171 }
0x4ad5   :  { %4683 = vrot.lane.b32.xlu1 %v7172_v54, %s7231_s1 }
0x4ad9   :  { %4789 = vrot.lane.b32.xlu1 %v7320_v18, %s7232_s9 }
0x4b47   :  { %v4684_v39 = vpop.permute.xlu1 %4683 }
0x4b48   :  { %v4686_v7 = vmul.f32 %v4684_v39, %v4680_v1 }
0x4b4a   :  { %v8081_v43 = vadd.f32 %v4686_v7, %v8029_v11 }
0x4b4b   :  { %v4790_v22 = vpop.permute.xlu1 %4789 }
0x4b4c   :  { %v4689_v10 = vsel %vm136_vm2, %v8081_v43, 0.0 }
0x4b4d   :  { %v4690_v45 = vrot.slane %v4689_v10, 4 }
0x4b4f   :  { %v4691_v5 = vadd.f32 %v4690_v45, %v4689_v10 }
0x4b51   :  { %v4692_v31 = vrot.slane %v4691_v5, 2 }
0x4b53   :  { %v4693_v48 = vadd.f32 %v4692_v31, %v4691_v5 }
0x4b55   :  { %v4694_v57 = vrot.slane %v4693_v48, 1 }
0x4b57   :  { %v4695_v6 = vadd.f32 %v4694_v57, %v4693_v48 }
0x4b59   :  { %v4696_v58 = vmul.f32 0.5, %v4695_v6 }
0x4b5b   :  { %v4697_v49 = vsub.f32 %v8081_v43, %v4696_v58 }
0x4b5d   :  { %6950 = vmatmul.mubr.msk.f32.vlgmr.msra.gmra.mxu0 %vm147_vm4, %v4697_v49 }
0x4b5e   :  { %6960 = vmatpush3.msra.mxu0 %v7963_v46  ;;  %6963 = vmatprep.mubr.msk.f32.mxu0 %vm7230_vm3, %v7229_v8 }
0x4b5f   :  { %6961 = vmatprep.subr.mxu0 %v7229_v8 }
0x4b60   :  { %6962 = vmatpush3.msra.mxu0 %v7972_v47 }
0x4b61   :  { %6973 = vmatprep.subr.mxu0 %v7229_v8 }
0x4c1d   :  { %v4767_v21 = vpop.f32.mrf.mxu0 }
0x4c1e   :  { %v4768_v4 = vadd.f32 %v7320_v18, %v4767_v21 }
0x4c1f   :  { %v6951_v56 = vpop.f32.mrf.mxu0 }
0x4c20   :  { %7173 = vtanh.f32 %v4768_v4  ;;  %v4771_v60 = vmax.f32 %v4768_v4, 0.0 }
0x4c22   :  { %v4772_v52 = vmin.f32 %v4771_v60, 6.0 }
0x4c2d   :  { %v7174_v59 = vpop.eup %7173 }
0x4c2e   :  { %4775 = vrot.lane.b32.xlu0 %v7174_v59, %s7231_s1 }
0x4ca0   :  { %v4776_v61 = vpop.permute.xlu0 %4775 }
0x4ca1   :  { %v4778_v0 = vmul.f32 %v4776_v61, %v4772_v52 }
0x4ca3   :  { %v4779_v27 = vsel %vm136_vm2, %v4778_v0, 0.0 }
0x4ca4   :  { %v4780_v2 = vrot.slane %v4779_v27, 4 }
0x4ca6   :  { %v4781_v26 = vadd.f32 %v4780_v2, %v4779_v27 }
0x4ca8   :  { %v4782_v14 = vrot.slane %v4781_v26, 2 }
0x4caa   :  { %v4783_v12 = vadd.f32 %v4782_v14, %v4781_v26 }
0x4cac   :  { %v4784_v13 = vrot.slane %v4783_v12, 1 }
0x4cae   :  { %v4785_v15 = vadd.f32 %v4784_v13, %v4783_v12 }
0x4cb0   :  { %v4786_v16 = vmul.f32 0.5, %v4785_v15 }
0x4cb2   :  { %v4787_v17 = vsub.f32 %v4778_v0, %v4786_v16  ;;  %v5077_v16 = vrot.slane %v7320_v18, 2 }
0x4cb4   :  { %6957 = vmatmul.mubr.msk.f32.vlgmr.msra.gmra.mxu1 %vm147_vm4, %v4787_v17 }
0x4cb5   :  { %6967 = vmatpush3.msra.mxu1 %v7983_v25  ;;  %6970 = vmatprep.mubr.msk.f32.mxu1 %vm7230_vm3, %v7229_v8 }
0x4cb6   :  { %6968 = vmatprep.subr.mxu1 %v7229_v8 }
0x4cb7   :  { %6969 = vmatpush3.msra.mxu1 %v7992_v63 }
0x4cb8   :  { %6980 = vmatprep.subr.mxu1 %v7229_v8 }
0x4d74   :  { %v4861_v40 = vpop.f32.mrf.mxu1 }
0x4d75   :  { %v4862_v20 = vadd.f32 %v4861_v40, %v4790_v22 }
0x4d76   :  { %v6958_v41 = vpop.f32.mrf.mxu1 }
0x4d77   :  { %7175 = vtanh.f32 %v4862_v20  ;;  %v4865_v44 = vmax.f32 %v4862_v20, 0.0 }
0x4d79   :  { %v4866_v30 = vmin.f32 %v4865_v44, 6.0 }
0x4d84   :  { %v7176_v24 = vpop.eup %7175 }
0x4d85   :  { %4869 = vrot.lane.b32.xlu0 %v7176_v24, %s7231_s1 }
0x4df7   :  { %v4870_v51 = vpop.permute.xlu0 %4869 }
0x4df8   :  { %v4872_v32 = vmul.f32 %v4870_v51, %v4866_v30 }
0x4dfa   :  { %4874 = vrot.lane.b32.xlu1 %v4872_v32, %s7233_s12 }
0x4dfe   :  { %4890 = vrot.lane.b32.xlu1 %v7320_v18, %s7234_s13 }
0x4e02   :  { %4982 = vrot.lane.b32.xlu1 %v7320_v18, %s7235_s18 }
0x4e6c   :  { %v4875_v33 = vpop.permute.xlu1 %4874 }
0x4e6d   :  { %v8110_v34 = vadd.f32 %v4875_v33, %v8055_v28 }
0x4e6f   :  { %v4878_v38 = vsel %vm328_vm5, %v8110_v34, 0.0 }
0x4e70   :  { %v4879_v37 = vrot.slane %v4878_v38, 4  ;;  %v4891_v45 = vpop.permute.xlu1 %4890 }
0x4e72   :  { %v4880_v19 = vadd.f32 %v4879_v37, %v4878_v38 }
0x4e74   :  { %v4881_v36 = vrot.slane %v4880_v19, 2  ;;  %v4983_v26 = vpop.permute.xlu1 %4982 }
0x4e76   :  { %v4882_v54 = vadd.f32 %v4881_v36, %v4880_v19 }
0x4e78   :  { %v4883_v55 = vrot.slane %v4882_v54, 1 }
0x4e7a   :  { %v4884_v1 = vadd.f32 %v4883_v55, %v4882_v54 }
0x4e7c   :  { %v4885_v39 = vmul.f32 0.5, %v4884_v1 }
0x4e7e   :  { %v4886_v7 = vsub.f32 %v8110_v34, %v4885_v39 }
0x4e80   :  { %4888 = vrot.lane.b32.xlu0 %v4886_v7, %s7231_s1 }
0x4ef2   :  { %v4889_v10 = vpop.permute.xlu0 %4888 }
0x4ef3   :  { %6964 = vmatmul.mubr.msk.f32.vlgmr.msra.gmra.mxu0 %vm147_vm4, %v4889_v10 }
0x4ef4   :  { %6974 = vmatpush3.msra.mxu0 %v7915_v29  ;;  %6977 = vmatprep.mubr.msk.f32.mxu0 %vm7230_vm3, %v7229_v8 }
0x4ef5   :  { %6975 = vmatprep.subr.mxu0 %v7229_v8 }
0x4ef6   :  { %6976 = vmatpush3.msra.mxu0 %v7924_v62 }
0x4ef7   :  { %6987 = vmatprep.subr.mxu0 %v7229_v8 }
0x4fb3   :  { %v4961_v5 = vpop.f32.mrf.mxu0 }
0x4fb4   :  { %v4962_v31 = vadd.f32 %v4961_v5, %v4891_v45 }
0x4fb5   :  { %v6965_v48 = vpop.f32.mrf.mxu0 }
0x4fb6   :  { %7177 = vtanh.f32 %v4962_v31  ;;  %v4965_v6 = vmax.f32 %v4962_v31, 0.0 }
0x4fb8   :  { %v4966_v58 = vmin.f32 %v4965_v6, 6.0 }
0x4fc3   :  { %v7178_v57 = vpop.eup %7177 }
0x4fc4   :  { %4969 = vrot.lane.b32.xlu0 %v7178_v57, %s7231_s1 }
0x5036   :  { %v4970_v49 = vpop.permute.xlu0 %4969 }
0x5037   :  { %v4972_v21 = vmul.f32 %v4970_v49, %v4966_v58 }
0x5039   :  { %v4973_v4 = vsel %vm136_vm2, %v4972_v21, 0.0 }
0x503a   :  { %v4974_v56 = vrot.slane %v4973_v4, 4 }
0x503c   :  { %v4975_v59 = vadd.f32 %v4974_v56, %v4973_v4 }
0x503e   :  { %v4976_v60 = vrot.slane %v4975_v59, 2 }
0x5040   :  { %v4977_v52 = vadd.f32 %v4976_v60, %v4975_v59 }
0x5042   :  { %v4978_v61 = vrot.slane %v4977_v52, 1 }
0x5044   :  { %v4979_v0 = vadd.f32 %v4978_v61, %v4977_v52 }
0x5046   :  { %v4980_v27 = vmul.f32 0.5, %v4979_v0 }
0x5048   :  { %v4981_v2 = vsub.f32 %v4972_v21, %v4980_v27 }
0x504a   :  { %6971 = vmatmul.mubr.msk.f32.vlgmr.msra.gmra.mxu1 %vm147_vm4, %v4981_v2 }
0x504b   :  { %6981 = vmatpush3.msra.mxu1 %v7934_v50  ;;  %6984 = vmatprep.mubr.msk.f32.mxu1 %vm7230_vm3, %v7229_v8 }
0x504c   :  { %6982 = vmatprep.subr.mxu1 %v7229_v8 }
0x504d   :  { %6983 = vmatpush3.msra.mxu1 %v7943_v9 }
0x504e   :  { %6994 = vmatprep.subr.mxu1 %v7229_v8 }
0x510a   :  { %v5054_v14 = vpop.f32.mrf.mxu1 }
0x510b   :  { %v5055_v12 = vadd.f32 %v5054_v14, %v4983_v26 }
0x510c   :  { %v6972_v13 = vpop.f32.mrf.mxu1 }
0x510d   :  { %7179 = vtanh.f32 %v5055_v12  ;;  %v5058_v17 = vmax.f32 %v5055_v12, 0.0 }
0x510f   :  { %v5059_v22 = vmin.f32 %v5058_v17, 6.0 }
0x511a   :  { %v7180_v15 = vpop.eup %7179 }
0x511b   :  { %5062 = vrot.lane.b32.xlu0 %v7180_v15, %s7231_s1 }
0x511f   :  { %5169 = vrot.lane.b32.xlu0 %v5077_v16, %s7232_s9 }
0x518d   :  { %v5063_v40 = vpop.permute.xlu0 %5062 }
0x518e   :  { %v5065_v20 = vmul.f32 %v5063_v40, %v5059_v22 }
0x5190   :  { %v8136_v41 = vadd.f32 %v5065_v20, %v8081_v43 }
0x5191   :  { %v5170_v56 = vpop.permute.xlu0 %5169 }
0x5192   :  { %v5068_v24 = vsel %vm136_vm2, %v8136_v41, 0.0 }
0x5193   :  { %v5069_v44 = vrot.slane %v5068_v24, 4 }
0x5195   :  { %v5070_v30 = vadd.f32 %v5069_v44, %v5068_v24 }
0x5197   :  { %v5071_v51 = vrot.slane %v5070_v30, 2 }
0x5199   :  { %v5072_v32 = vadd.f32 %v5071_v51, %v5070_v30 }
0x519b   :  { %v5073_v33 = vrot.slane %v5072_v32, 1 }
0x519d   :  { %v5074_v38 = vadd.f32 %v5073_v33, %v5072_v32 }
0x519f   :  { %v5075_v37 = vmul.f32 0.5, %v5074_v38 }
0x51a1   :  { %v5076_v19 = vsub.f32 %v8136_v41, %v5075_v37 }
0x51a3   :  { %6978 = vmatmul.mubr.msk.f32.vlgmr.msra.gmra.mxu0 %vm147_vm4, %v5076_v19 }
0x51a4   :  { %6988 = vmatpush3.msra.mxu0 %v7963_v46  ;;  %6991 = vmatprep.mubr.msk.f32.mxu0 %vm7230_vm3, %v7229_v8 }
0x51a5   :  { %6989 = vmatprep.subr.mxu0 %v7229_v8 }
0x51a6   :  { %6990 = vmatpush3.msra.mxu0 %v7972_v47 }
0x51a7   :  { %7001 = vmatprep.subr.mxu0 %v7229_v8 }
0x5263   :  { %v5148_v36 = vpop.f32.mrf.mxu0 }
0x5264   :  { %v5149_v54 = vadd.f32 %v5148_v36, %v5077_v16 }
0x5265   :  { %v6979_v55 = vpop.f32.mrf.mxu0 }
0x5266   :  { %7181 = vtanh.f32 %v5149_v54  ;;  %v5152_v39 = vmax.f32 %v5149_v54, 0.0 }
0x5268   :  { %v5153_v7 = vmin.f32 %v5152_v39, 6.0 }
0x5273   :  { %v7182_v1 = vpop.eup %7181 }
0x5274   :  { %5156 = vrot.lane.b32.xlu1 %v7182_v1, %s7231_s1 }
0x52e6   :  { %v5157_v10 = vpop.permute.xlu1 %5156 }
0x52e7   :  { %v5159_v45 = vmul.f32 %v5157_v10, %v5153_v7 }
0x52e9   :  { %v5160_v5 = vsel %vm136_vm2, %v5159_v45, 0.0 }
0x52ea   :  { %v5161_v31 = vrot.slane %v5160_v5, 4 }
0x52ec   :  { %v5162_v48 = vadd.f32 %v5161_v31, %v5160_v5 }
0x52ee   :  { %v5163_v57 = vrot.slane %v5162_v48, 2 }
0x52f0   :  { %v5164_v6 = vadd.f32 %v5163_v57, %v5162_v48 }
0x52f2   :  { %v5165_v58 = vrot.slane %v5164_v6, 1 }
0x52f4   :  { %v5166_v49 = vadd.f32 %v5165_v58, %v5164_v6 }
0x52f6   :  { %v5167_v21 = vmul.f32 0.5, %v5166_v49 }
0x52f8   :  { %v5168_v4 = vsub.f32 %v5159_v45, %v5167_v21  ;;  %v5457_v21 = vrot.slane %v7320_v18, 4 }
0x52fa   :  { %6985 = vmatmul.mubr.msk.f32.vlgmr.msra.gmra.mxu1 %vm147_vm4, %v5168_v4 }
0x52fb   :  { %6995 = vmatpush3.msra.mxu1 %v7983_v25  ;;  %6998 = vmatprep.mubr.msk.f32.mxu1 %vm7230_vm3, %v7229_v8 }
0x52fc   :  { %6996 = vmatprep.subr.mxu1 %v7229_v8 }
0x52fd   :  { %6997 = vmatpush3.msra.mxu1 %v7992_v63 }
0x52fe   :  { %7008 = vmatprep.subr.mxu1 %v7229_v8 }
0x53ba   :  { %v5241_v59 = vpop.f32.mrf.mxu1 }
0x53bb   :  { %v5242_v60 = vadd.f32 %v5241_v59, %v5170_v56 }
0x53bc   :  { %v6986_v52 = vpop.f32.mrf.mxu1 }
0x53bd   :  { %7183 = vtanh.f32 %v5242_v60  ;;  %v5245_v0 = vmax.f32 %v5242_v60, 0.0 }
0x53bf   :  { %v5246_v27 = vmin.f32 %v5245_v0, 6.0 }
0x53ca   :  { %v7184_v61 = vpop.eup %7183 }
0x53cb   :  { %5249 = vrot.lane.b32.xlu1 %v7184_v61, %s7231_s1 }
0x543d   :  { %v5250_v2 = vpop.permute.xlu1 %5249 }
0x543e   :  { %v5252_v26 = vmul.f32 %v5250_v2, %v5246_v27 }
0x5440   :  { %5254 = vrot.lane.b32.xlu0 %v5252_v26, %s7233_s12 }
0x5444   :  { %5270 = vrot.lane.b32.xlu0 %v5077_v16, %s7234_s13 }
0x5448   :  { %5362 = vrot.lane.b32.xlu0 %v5077_v16, %s7235_s18 }
0x54b2   :  { %v5255_v14 = vpop.permute.xlu0 %5254 }
0x54b3   :  { %v8162_v12 = vadd.f32 %v5255_v14, %v8110_v34 }
0x54b5   :  { %v5258_v13 = vsel %vm328_vm5, %v8162_v12, 0.0 }
0x54b6   :  { %v5259_v15 = vrot.slane %v5258_v13, 4  ;;  %v5271_v16 = vpop.permute.xlu0 %5270 }
0x54b8   :  { %v5260_v17 = vadd.f32 %v5259_v15, %v5258_v13 }
0x54ba   :  { %v5261_v22 = vrot.slane %v5260_v17, 2  ;;  %v5363_v48 = vpop.permute.xlu0 %5362 }
0x54bc   :  { %v5262_v40 = vadd.f32 %v5261_v22, %v5260_v17 }
0x54be   :  { %v5263_v20 = vrot.slane %v5262_v40, 1 }
0x54c0   :  { %v5264_v24 = vadd.f32 %v5263_v20, %v5262_v40 }
0x54c2   :  { %v5265_v44 = vmul.f32 0.5, %v5264_v24 }
0x54c4   :  { %v5266_v30 = vsub.f32 %v8162_v12, %v5265_v44 }
0x54c6   :  { %5268 = vrot.lane.b32.xlu1 %v5266_v30, %s7231_s1 }
0x5538   :  { %v5269_v51 = vpop.permute.xlu1 %5268 }
0x5539   :  { %6992 = vmatmul.mubr.msk.f32.vlgmr.msra.gmra.mxu0 %vm147_vm4, %v5269_v51 }
0x553a   :  { %7002 = vmatpush3.msra.mxu0 %v7915_v29  ;;  %7005 = vmatprep.mubr.msk.f32.mxu0 %vm7230_vm3, %v7229_v8 }
0x553b   :  { %7003 = vmatprep.subr.mxu0 %v7229_v8 }
0x553c   :  { %7004 = vmatpush3.msra.mxu0 %v7924_v62 }
0x553d   :  { %7015 = vmatprep.subr.mxu0 %v7229_v8 }
0x55f9   :  { %v5341_v32 = vpop.f32.mrf.mxu0 }
0x55fa   :  { %v5342_v33 = vadd.f32 %v5341_v32, %v5271_v16 }
0x55fb   :  { %v6993_v38 = vpop.f32.mrf.mxu0 }
0x55fc   :  { %7185 = vtanh.f32 %v5342_v33  ;;  %v5345_v19 = vmax.f32 %v5342_v33, 0.0 }
0x55fe   :  { %v5346_v36 = vmin.f32 %v5345_v19, 6.0 }
0x5609   :  { %v7186_v37 = vpop.eup %7185 }
0x560a   :  { %5349 = vrot.lane.b32.xlu1 %v7186_v37, %s7231_s1 }
0x567c   :  { %v5350_v29 = vpop.permute.xlu1 %5349 }
0x567d   :  { %v5352_v54 = vmul.f32 %v5350_v29, %v5346_v36 }
0x567f   :  { %v5353_v55 = vsel %vm136_vm2, %v5352_v54, 0.0 }
0x5680   :  { %v5354_v1 = vrot.slane %v5353_v55, 4 }
0x5682   :  { %v5355_v39 = vadd.f32 %v5354_v1, %v5353_v55 }
0x5684   :  { %v5356_v7 = vrot.slane %v5355_v39, 2 }
0x5686   :  { %v5357_v62 = vadd.f32 %v5356_v7, %v5355_v39 }
0x5688   :  { %v5358_v10 = vrot.slane %v5357_v62, 1 }
0x568a   :  { %v5359_v45 = vadd.f32 %v5358_v10, %v5357_v62 }
0x568c   :  { %v5360_v5 = vmul.f32 0.5, %v5359_v45 }
0x568e   :  { %v5361_v31 = vsub.f32 %v5352_v54, %v5360_v5 }
0x5690   :  { %6999 = vmatmul.mubr.msk.f32.vlgmr.msra.gmra.mxu1 %vm147_vm4, %v5361_v31 }
0x5691   :  { %7009 = vmatpush3.msra.mxu1 %v7934_v50  ;;  %7012 = vmatprep.mubr.msk.f32.mxu1 %vm7230_vm3, %v7229_v8 }
0x5692   :  { %7010 = vmatprep.subr.mxu1 %v7229_v8 }
0x5693   :  { %7011 = vmatpush3.msra.mxu1 %v7943_v9 }
0x5694   :  { %7022 = vmatprep.subr.mxu1 %v7229_v8 }
0x5750   :  { %v5434_v57 = vpop.f32.mrf.mxu1 }
0x5751   :  { %v5435_v6 = vadd.f32 %v5434_v57, %v5363_v48 }
0x5752   :  { %v7000_v58 = vpop.f32.mrf.mxu1 }
0x5753   :  { %7187 = vtanh.f32 %v5435_v6  ;;  %v5438_v50 = vmax.f32 %v5435_v6, 0.0 }
0x5755   :  { %v5439_v4 = vmin.f32 %v5438_v50, 6.0 }
0x5760   :  { %v7188_v49 = vpop.eup %7187 }
0x5761   :  { %5442 = vrot.lane.b32.xlu1 %v7188_v49, %s7231_s1 }
0x5765   :  { %5549 = vrot.lane.b32.xlu1 %v5457_v21, %s7232_s9 }
0x57d3   :  { %v5443_v56 = vpop.permute.xlu1 %5442 }
0x57d4   :  { %v5445_v59 = vmul.f32 %v5443_v56, %v5439_v4  ;;  %v7222_v56 = vld [vmem:[%s8343_s2] sm:$0xff] }
0x57d6   :  { %v8188_v9 = vadd.f32 %v5445_v59, %v8136_v41 }
0x57d7   :  { %v5550_v36 = vpop.permute.xlu1 %5549 }
0x57d8   :  { %v5448_v60 = vsel %vm136_vm2, %v8188_v9, 0.0 }
0x57d9   :  { %v5449_v52 = vrot.slane %v5448_v60, 4 }
0x57db   :  { %v5450_v61 = vadd.f32 %v5449_v52, %v5448_v60 }
0x57dd   :  { %v5451_v0 = vrot.slane %v5450_v61, 2 }
0x57df   :  { %v5452_v27 = vadd.f32 %v5451_v0, %v5450_v61 }
0x57e1   :  { %v5453_v2 = vrot.slane %v5452_v27, 1 }
0x57e3   :  { %v5454_v26 = vadd.f32 %v5453_v2, %v5452_v27 }
0x57e5   :  { %v5455_v14 = vmul.f32 0.5, %v5454_v26 }
0x57e7   :  { %v5456_v13 = vsub.f32 %v8188_v9, %v5455_v14 }
0x57e9   :  { %7006 = vmatmul.mubr.msk.f32.vlgmr.msra.gmra.mxu0 %vm147_vm4, %v5456_v13 }
0x57ea   :  { %7016 = vmatpush3.msra.mxu0 %v7963_v46  ;;  %7019 = vmatprep.mubr.msk.f32.mxu0 %vm7230_vm3, %v7229_v8 }
0x57eb   :  { %7017 = vmatprep.subr.mxu0 %v7229_v8 }
0x57ec   :  { %7018 = vmatpush3.msra.mxu0 %v7972_v47 }
0x57ed   :  { %7029 = vmatprep.subr.mxu0 %v7229_v8 }
0x58a9   :  { %v5528_v15 = vpop.f32.mrf.mxu0 }
0x58aa   :  { %v5529_v17 = vadd.f32 %v5528_v15, %v5457_v21 }
0x58ab   :  { %v7007_v22 = vpop.f32.mrf.mxu0 }
0x58ac   :  { %7189 = vtanh.f32 %v5529_v17  ;;  %v5532_v20 = vmax.f32 %v5529_v17, 0.0 }
0x58ae   :  { %v5533_v24 = vmin.f32 %v5532_v20, 6.0 }
0x58b9   :  { %v7190_v40 = vpop.eup %7189 }
0x58ba   :  { %5536 = vrot.lane.b32.xlu0 %v7190_v40, %s7231_s1 }
0x592c   :  { %v5537_v44 = vpop.permute.xlu0 %5536 }
0x592d   :  { %v5539_v46 = vmul.f32 %v5537_v44, %v5533_v24 }
0x592f   :  { %v5540_v30 = vsel %vm136_vm2, %v5539_v46, 0.0 }
0x5930   :  { %v5541_v51 = vrot.slane %v5540_v30, 4 }
0x5932   :  { %v5542_v16 = vadd.f32 %v5541_v51, %v5540_v30  ;;  %v7223_v30 = vld [vmem:[%s8343_s2 + $0x18] sm:$0xff]  ;;  %v7224_v51 = vld [vmem:[%s8343_s2 + $0x10] sm:$0xff] }
0x5934   :  { %v5543_v32 = vrot.slane %v5542_v16, 2 }
0x5936   :  { %v5544_v33 = vadd.f32 %v5543_v32, %v5542_v16 }
0x5938   :  { %v5545_v47 = vrot.slane %v5544_v33, 1 }
0x593a   :  { %v5546_v38 = vadd.f32 %v5545_v47, %v5544_v33 }
0x593c   :  { %v5547_v37 = vmul.f32 0.5, %v5546_v38 }
0x593e   :  { %v5548_v19 = vsub.f32 %v5539_v46, %v5547_v37  ;;  %v5837_v37 = vrot.slane %v7320_v18, 6 }
0x5940   :  { %7013 = vmatmul.mubr.msk.f32.vlgmr.msra.gmra.mxu1 %vm147_vm4, %v5548_v19 }
0x5941   :  { %7023 = vmatpush3.msra.mxu1 %v7983_v25  ;;  %7026 = vmatprep.mubr.msk.f32.mxu1 %vm7230_vm3, %v7229_v8 }
0x5942   :  { %7024 = vmatprep.subr.mxu1 %v7229_v8 }
0x5943   :  { %7025 = vmatpush3.msra.mxu1 %v7992_v63 }
0x5944   :  { %7036 = vmatprep.subr.mxu1 %v7229_v8 }
0x5a00   :  { %v5621_v29 = vpop.f32.mrf.mxu1 }
0x5a01   :  { %v5622_v54 = vadd.f32 %v5621_v29, %v5550_v36 }
0x5a02   :  { %v7014_v55 = vpop.f32.mrf.mxu1 }
0x5a03   :  { %7191 = vtanh.f32 %v5622_v54  ;;  %v5625_v39 = vmax.f32 %v5622_v54, 0.0 }
0x5a05   :  { %v5626_v7 = vmin.f32 %v5625_v39, 6.0 }
0x5a10   :  { %v7192_v1 = vpop.eup %7191 }
0x5a11   :  { %5629 = vrot.lane.b32.xlu0 %v7192_v1, %s7231_s1 }
0x5a83   :  { %v5630_v25 = vpop.permute.xlu0 %5629 }
0x5a84   :  { %v5632_v62 = vmul.f32 %v5630_v25, %v5626_v7 }
0x5a86   :  { %5634 = vrot.lane.b32.xlu1 %v5632_v62, %s7233_s12 }
0x5a8a   :  { %5650 = vrot.lane.b32.xlu1 %v5457_v21, %s7234_s13 }
0x5a8e   :  { %5742 = vrot.lane.b32.xlu1 %v5457_v21, %s7235_s18  ;;  %v7221_v21 = vld [vmem:[%s8343_s2 + $0x8] sm:$0xff] }
0x5af8   :  { %v5635_v63 = vpop.permute.xlu1 %5634 }
0x5af9   :  { %v8214_v10 = vadd.f32 %v5635_v63, %v8162_v12 }
0x5afb   :  { %v5638_v45 = vsel %vm328_vm5, %v8214_v10, 0.0 }
0x5afc   :  { %v5639_v5 = vrot.slane %v5638_v45, 4  ;;  %v5651_v59 = vpop.permute.xlu1 %5650 }
0x5afe   :  { %v5640_v31 = vadd.f32 %v5639_v5, %v5638_v45 }
0x5b00   :  { %v5641_v48 = vrot.slane %v5640_v31, 2  ;;  %v5743_v16 = vpop.permute.xlu1 %5742 }
0x5b02   :  { %v5642_v57 = vadd.f32 %v5641_v48, %v5640_v31  ;;  %v7225_v31 = vld [vmem:[%s8343_s2 + $0x28] sm:$0xff]  ;;  %v7226_v48 = vld [vmem:[%s8343_s2 + $0x20] sm:$0xff] }
0x5b04   :  { %v5643_v6 = vrot.slane %v5642_v57, 1 }
0x5b06   :  { %v5644_v58 = vadd.f32 %v5643_v6, %v5642_v57 }
0x5b08   :  { %v5645_v49 = vmul.f32 0.5, %v5644_v58 }
0x5b0a   :  { %v5646_v50 = vsub.f32 %v8214_v10, %v5645_v49 }
0x5b0c   :  { %5648 = vrot.lane.b32.xlu0 %v5646_v50, %s7231_s1 }
0x5b7e   :  { %v5649_v4 = vpop.permute.xlu0 %5648 }
0x5b7f   :  { %7020 = vmatmul.mubr.msk.f32.vlgmr.msra.gmra.mxu0 %vm147_vm4, %v5649_v4 }
0x5b80   :  { %7030 = vmatpush3.msra.mxu0 %v7221_v21  ;;  %7033 = vmatprep.mubr.msk.f32.mxu0 %vm7230_vm3, %v7229_v8 }
0x5b81   :  { %7031 = vmatprep.subr.mxu0 %v7229_v8 }
0x5b82   :  { %7032 = vmatpush3.msra.mxu0 %v7222_v56 }
0x5b83   :  { %7043 = vmatprep.subr.mxu0 %v7229_v8 }
0x5c3f   :  { %v5721_v60 = vpop.f32.mrf.mxu0 }
0x5c40   :  { %v5722_v52 = vadd.f32 %v5721_v60, %v5651_v59 }
0x5c41   :  { %v7021_v61 = vpop.f32.mrf.mxu0 }
0x5c42   :  { %7193 = vtanh.f32 %v5722_v52  ;;  %v5725_v27 = vmax.f32 %v5722_v52, 0.0 }
0x5c44   :  { %v5726_v2 = vmin.f32 %v5725_v27, 6.0 }
0x5c4f   :  { %v7194_v0 = vpop.eup %7193 }
0x5c50   :  { %5729 = vrot.lane.b32.xlu0 %v7194_v0, %s7231_s1 }
0x5cc2   :  { %v5730_v26 = vpop.permute.xlu0 %5729 }
0x5cc3   :  { %v5732_v14 = vmul.f32 %v5730_v26, %v5726_v2 }
0x5cc5   :  { %v5733_v13 = vsel %vm136_vm2, %v5732_v14, 0.0 }
0x5cc6   :  { %v5734_v15 = vrot.slane %v5733_v13, 4 }
0x5cc8   :  { %v5735_v17 = vadd.f32 %v5734_v15, %v5733_v13  ;;  %v7227_v13 = vld [vmem:[%s8343_s2 + $0x38] sm:$0xff]  ;;  %v7228_v15 = vld [vmem:[%s8343_s2 + $0x30] sm:$0xff] }
0x5cca   :  { %v5736_v22 = vrot.slane %v5735_v17, 2 }
0x5ccc   :  { %v5737_v40 = vadd.f32 %v5736_v22, %v5735_v17 }
0x5cce   :  { %v5738_v20 = vrot.slane %v5737_v40, 1 }
0x5cd0   :  { %v5739_v24 = vadd.f32 %v5738_v20, %v5737_v40 }
0x5cd2   :  { %v5740_v44 = vmul.f32 0.5, %v5739_v24 }
0x5cd4   :  { %v5741_v46 = vsub.f32 %v5732_v14, %v5740_v44 }
0x5cd6   :  { %7027 = vmatmul.mubr.msk.f32.vlgmr.msra.gmra.mxu1 %vm147_vm4, %v5741_v46 }
0x5cd7   :  { %7037 = vmatpush3.msra.mxu1 %v7223_v30  ;;  %7040 = vmatprep.mubr.msk.f32.mxu1 %vm7230_vm3, %v7229_v8 }
0x5cd8   :  { %7038 = vmatprep.subr.mxu1 %v7229_v8 }
0x5cd9   :  { %7039 = vmatpush3.msra.mxu1 %v7224_v51 }
0x5cda   :  { %7050 = vmatprep.subr.mxu1 %v7229_v8 }
0x5d96   :  { %v5814_v32 = vpop.f32.mrf.mxu1 }
0x5d97   :  { %v5815_v33 = vadd.f32 %v5814_v32, %v5743_v16 }
0x5d98   :  { %v7028_v47 = vpop.f32.mrf.mxu1 }
0x5d99   :  { %7195 = vtanh.f32 %v5815_v33  ;;  %v5818_v19 = vmax.f32 %v5815_v33, 0.0 }
0x5d9b   :  { %v5819_v36 = vmin.f32 %v5818_v19, 6.0 }
0x5da6   :  { %v7196_v38 = vpop.eup %7195 }
0x5da7   :  { %5822 = vrot.lane.b32.xlu0 %v7196_v38, %s7231_s1 }
0x5dab   :  { %5929 = vrot.lane.b32.xlu0 %v5837_v37, %s7232_s9 }
0x5e19   :  { %v5823_v29 = vpop.permute.xlu0 %5822 }
0x5e1a   :  { %v5825_v54 = vmul.f32 %v5823_v29, %v5819_v36 }
0x5e1c   :  { %v8248_v55 = vadd.f32 %v5825_v54, %v8188_v9 }
0x5e1d   :  { %v5930_v17 = vpop.permute.xlu0 %5929 }
0x5e1e   :  { %v5828_v1 = vsel %vm136_vm2, %v8248_v55, 0.0 }
0x5e1f   :  { %v5829_v39 = vrot.slane %v5828_v1, 4 }
0x5e21   :  { %v5830_v7 = vadd.f32 %v5829_v39, %v5828_v1  ;;  %v4308_v39 = vsel %vm147_vm4, %v8029_v11, %v8003_v23 }
0x5e23   :  { %v5831_v25 = vrot.slane %v5830_v7, 2 }
0x5e25   :  { %v5832_v62 = vadd.f32 %v5831_v25, %v5830_v7  ;;  %v4688_v7 = vsel %vm147_vm4, %v8081_v43, %v8055_v28 }
0x5e27   :  { %v5833_v63 = vrot.slane %v5832_v62, 1 }
0x5e29   :  { %v5834_v45 = vadd.f32 %v5833_v63, %v5832_v62  ;;  %v6212_v62 = vrot.slane %v4308_v39, 4  ;;  %v6215_v63 = vrot.slane %v4688_v7, 2 }
0x5e2b   :  { %v5835_v5 = vmul.f32 0.5, %v5834_v45  ;;  %v3548_v45 = vsel %vm147_vm4, %v7879_v42, %v7853_v53 }
0x5e2d   :  { %v5836_v18 = vsub.f32 %v8248_v55, %v5835_v5 }
0x5e2f   :  { %7034 = vmatmul.mubr.msk.f32.vlgmr.msra.gmra.mxu0 %vm147_vm4, %v5836_v18 }
0x5e30   :  { %7044 = vmatpush3.msra.mxu0 %v7225_v31  ;;  %7047 = vmatprep.mubr.msk.f32.mxu0 %vm7230_vm3, %v7229_v8 }
0x5e31   :  { %7045 = vmatprep.subr.mxu0 %v7229_v8 }
0x5e32   :  { %7046 = vmatpush3.msra.mxu0 %v7226_v48 }
0x5eef   :  { %v5908_v57 = vpop.f32.mrf.mxu0 }
0x5ef0   :  { %v5909_v6 = vadd.f32 %v5908_v57, %v5837_v37 }
0x5ef1   :  { %v7035_v58 = vpop.f32.mrf.mxu0 }
0x5ef2   :  { %7197 = vtanh.f32 %v5909_v6  ;;  %v5912_v50 = vmax.f32 %v5909_v6, 0.0 }
0x5ef4   :  { %v5913_v4 = vmin.f32 %v5912_v50, 6.0 }
0x5eff   :  { %v7198_v49 = vpop.eup %7197 }
0x5f00   :  { %5916 = vrot.lane.b32.xlu1 %v7198_v49, %s7231_s1 }
0x5f72   :  { %v5917_v21 = vpop.permute.xlu1 %5916 }
0x5f73   :  { %v5919_v56 = vmul.f32 %v5917_v21, %v5913_v4 }
0x5f75   :  { %v5920_v59 = vsel %vm136_vm2, %v5919_v56, 0.0 }
0x5f76   :  { %v5921_v60 = vrot.slane %v5920_v59, 4 }
0x5f78   :  { %v5922_v52 = vadd.f32 %v5921_v60, %v5920_v59 }
0x5f7a   :  { %v5923_v61 = vrot.slane %v5922_v52, 2 }
0x5f7c   :  { %v5924_v0 = vadd.f32 %v5923_v61, %v5922_v52 }
0x5f7e   :  { %v5925_v27 = vrot.slane %v5924_v0, 1 }
0x5f80   :  { %v5926_v2 = vadd.f32 %v5925_v27, %v5924_v0 }
0x5f82   :  { %v5927_v26 = vmul.f32 0.5, %v5926_v2  ;;  %v6237_v2 = vld [vmem:[%s8345_s4 + $0x18] sm:$0xff] }
0x5f83   :  { %7057 = vmatprep.subr.mxu0 %v6237_v2 }
0x5f84   :  { %v5928_v14 = vsub.f32 %v5919_v56, %v5927_v26  ;;  %v6236_v26 = vld [vmem:[%s8345_s4 + $0x10] sm:$0xff] }
0x5f86   :  { %7041 = vmatmul.mubr.msk.f32.vlgmr.msra.gmra.mxu1 %vm147_vm4, %v5928_v14  ;;  %v6235_v14 = vld [vmem:[%s8345_s4 + $0x8] sm:$0xff] }
0x5f87   :  { %7051 = vmatpush3.msra.mxu1 %v7227_v13  ;;  %7054 = vmatprep.mubr.msk.f32.mxu1 %vm7230_vm3, %v7229_v8  ;;  %v6234_v13 = vld [vmem:[%s8345_s4] sm:$0xff] }
0x5f88   :  { %7052 = vmatprep.subr.mxu1 %v7229_v8 }
0x5f89   :  { %7053 = vmatpush3.msra.mxu1 %v7228_v15 }
0x6046   :  { %v6001_v22 = vpop.f32.mrf.mxu1 }
0x6047   :  { %v6002_v40 = vadd.f32 %v6001_v22, %v5930_v17  ;;  %v5447_v22 = vsel %vm147_vm4, %v8188_v9, %v8162_v12 }
0x6048   :  { %v7042_v20 = vpop.f32.mrf.mxu1 }
0x6049   :  { %7199 = vtanh.f32 %v6002_v40  ;;  %v6005_v44 = vmax.f32 %v6002_v40, 0.0  ;;  %v5827_v20 = vsel %vm147_vm4, %v8248_v55, %v8214_v10 }
0x604b   :  { %v6006_v46 = vmin.f32 %v6005_v44, 6.0 }
0x6056   :  { %v7200_v24 = vpop.eup %7199 }
0x6057   :  { %6009 = vrot.lane.b32.xlu1 %v7200_v24, %s7231_s1 }
0x60c9   :  { %v6010_v30 = vpop.permute.xlu1 %6009 }
0x60ca   :  { %v6012_v51 = vmul.f32 %v6010_v30, %v6006_v46  ;;  %v6218_v46 = vrot.slane %v5447_v22, 6  ;;  %v6221_v30 = vrot.slane %v5827_v20, 4 }
0x60cc   :  { %6014 = vrot.lane.b32.xlu0 %v6012_v51, %s7233_s12 }
0x60d0   :  { %6030 = vrot.lane.b32.xlu0 %v5837_v37, %s7234_s13 }
0x60d4   :  { %6122 = vrot.lane.b32.xlu0 %v5837_v37, %s7235_s18  ;;  %v3928_v37 = vsel %vm147_vm4, %v7954_v35, %v7905_v3 }
0x60d5   :  { %v6209_v25 = vrot.slane %v3928_v37, 6 }
0x60d7   :  { %v6227_v5 = vsel %vm6226_vm6, %v3548_v45, %v6209_v25 }
0x60d8   :  { %v6229_v35 = vsel %vm6228_vm7, %v6227_v5, %v6212_v62 }
0x60d9   :  { %v6230_v23 = vsel %vm38_vm0, %v6229_v35, %v6215_v63 }
0x613e   :  { %v6015_v8 = vpop.permute.xlu0 %6014 }
0x613f   :  { %v8280_v16 = vadd.f32 %v6015_v8, %v8214_v10  ;;  %v5067_v8 = vsel %vm147_vm4, %v8136_v41, %v8110_v34 }
0x6140   :  { %v6231_v12 = vsel %vm6226_vm6, %v5067_v8, %v6218_v46 }
0x6141   :  { %v6018_v32 = vsel %vm328_vm5, %v8280_v16, 0.0  ;;  %v6232_v9 = vsel %vm6228_vm7, %v6231_v12, %v6221_v30 }
0x6142   :  { %v6019_v33 = vrot.slane %v6018_v32, 4  ;;  %v6031_v11 = vpop.permute.xlu0 %6030 }
0x6144   :  { %v6020_v47 = vadd.f32 %v6019_v33, %v6018_v32 }
0x6146   :  { %v6021_v38 = vrot.slane %v6020_v47, 2  ;;  %v6123_v52 = vpop.permute.xlu0 %6122 }
0x6148   :  { %v6022_v19 = vadd.f32 %v6021_v38, %v6020_v47 }
0x614a   :  { %v6023_v36 = vrot.slane %v6022_v19, 1 }
0x614c   :  { %v6024_v29 = vadd.f32 %v6023_v36, %v6022_v19 }
0x614e   :  { %v6025_v54 = vmul.f32 0.5, %v6024_v29 }
0x6150   :  { %v6026_v1 = vsub.f32 %v8280_v16, %v6025_v54 }
0x6152   :  { %6028 = vrot.lane.b32.xlu1 %v6026_v1, %s7231_s1 }
0x61c4   :  { %v6029_v3 = vpop.permute.xlu1 %6028 }
0x61c5   :  { %7048 = vmatmul.mubr.msk.f32.vlgmr.msra.gmra.mxu0 %vm147_vm4, %v6029_v3 }
0x61c6   :  { %7065 = vmatprep.mubr.msk.f32.mxu0 %vm6238_vm8, %v6230_v23  ;;  %7058 = vmatpush3.msra.mxu0 %v6237_v2 }
0x61c7   :  { %7059 = vmatprep.subr.mxu0 %v6236_v26 }
0x61c8   :  { %7060 = vmatpush3.msra.mxu0 %v6236_v26 }
0x61c9   :  { %7061 = vmatprep.subr.mxu0 %v6235_v14 }
0x61ca   :  { %7062 = vmatpush3.msra.mxu0 %v6235_v14 }
0x61cb   :  { %7063 = vmatprep.subr.mxu0 %v6234_v13 }
0x61cc   :  { %7064 = vmatpush3.msra.mxu0 %v6234_v13 }
0x6285   :  { %v6101_v28 = vpop.f32.mrf.mxu0 }
0x6286   :  { %v6102_v43 = vadd.f32 %v6101_v28, %v6031_v11 }
0x6287   :  { %v7049_v18 = vpop.f32.mrf.mxu0 }
0x6288   :  { %7201 = vtanh.f32 %v6102_v43  ;;  %v6105_v53 = vmax.f32 %v6102_v43, 0.0 }
0x628a   :  { %v6106_v42 = vmin.f32 %v6105_v53, 6.0 }
0x6295   :  { %v7202_v31 = vpop.eup %7201 }
0x6296   :  { %6109 = vrot.lane.b32.xlu1 %v7202_v31, %s7231_s1 }
0x6308   :  { %v6110_v48 = vpop.permute.xlu1 %6109 }
0x6309   :  { %v6112_v57 = vmul.f32 %v6110_v48, %v6106_v42 }
0x630b   :  { %v6113_v6 = vsel %vm136_vm2, %v6112_v57, 0.0 }
0x630c   :  { %v6114_v58 = vrot.slane %v6113_v6, 4 }
0x630e   :  { %v6115_v49 = vadd.f32 %v6114_v58, %v6113_v6 }
0x6310   :  { %v6116_v50 = vrot.slane %v6115_v49, 2 }
0x6312   :  { %v6117_v4 = vadd.f32 %v6116_v50, %v6115_v49 }
0x6314   :  { %v6118_v21 = vrot.slane %v6117_v4, 1 }
0x6316   :  { %v6119_v56 = vadd.f32 %v6118_v21, %v6117_v4 }
0x6318   :  { %v6120_v59 = vmul.f32 0.5, %v6119_v56 }
0x631a   :  { %v6121_v60 = vsub.f32 %v6112_v57, %v6120_v59 }
0x631c   :  { %7055 = vmatmul.mubr.msk.f32.vlgmr.msra.gmra.mxu1 %vm147_vm4, %v6121_v60 }
0x63dc   :  { %v6194_v61 = vpop.f32.mrf.mxu1 }
0x63dd   :  { %v6195_v0 = vadd.f32 %v6194_v61, %v6123_v52 }
0x63de   :  { %v7056_v27 = vpop.f32.mrf.mxu1 }
0x63df   :  { %7203 = vtanh.f32 %v6195_v0  ;;  %v6198_v17 = vmax.f32 %v6195_v0, 0.0 }
0x63e1   :  { %v6199_v40 = vmin.f32 %v6198_v17, 6.0 }
0x63ec   :  { %v7204_v15 = vpop.eup %7203 }
0x63ed   :  { %6202 = vrot.lane.b32.xlu1 %v7204_v15, %s7231_s1 }
0x645f   :  { %v6203_v24 = vpop.permute.xlu1 %6202 }
0x6460   :  { %v6205_v44 = vmul.f32 %v6203_v24, %v6199_v40 }
0x6462   :  { %v6206_v51 = vadd.f32 %v6205_v44, %v8248_v55 }
0x6464   :  { %v6207_v32 = vsel %vm147_vm4, %v6206_v51, %v8280_v16 }
0x6465   :  { %v6224_v33 = vrot.slane %v6207_v32, 2 }
0x6467   :  { %v6233_v10 = vsel %vm38_vm0, %v6232_v9, %v6224_v33 }
0x6468   :  { %7066 = vmatmul.mubr.msk.f32.vlgmr.msra.gmra.mxu0 %vm6238_vm8, %v6233_v10 }
0x6528   :  { %v7067_v47 = vpop.f32.mrf.mxu0 }
0x6529   :  { %6322 = vst.msk [vmem:[%s8346_s5 + $0x8] sm:$0xff] %vm6320_vm9, %v7067_v47 }
0x652a   :  { %v6311_v55 = vpop.f32.mrf.mxu0 }
0x652b   :  { %6321 = vst.msk [vmem:[%s8346_s5] sm:$0xff] %vm6320_vm9, %v6311_v55 }

</bundles_post_ra>
